<compile_context>
chip_gen: v7x
topology: tpu7x:2x2x1
jax: 0.10.0
libtpu: 0.0.40
codegen_flags: <defaults>
</compile_context>

<pallas_src>
import math
import functools

import jax
import jax.numpy as jnp
from jax import lax
from jax.experimental import pallas as pl
from jax.experimental.pallas import tpu as pltpu


# ----------------------------- kernel helpers ------------------------------ #

def _layer_norm(x, gamma, beta, eps=1e-5):
    # PyTorch LayerNorm: biased variance over last dim, eps inside the sqrt.
    mu = jnp.mean(x, axis=-1, keepdims=True)
    var = jnp.mean((x - mu) ** 2, axis=-1, keepdims=True)
    return (x - mu) * lax.rsqrt(var + eps) * gamma + beta


def _softmax_last(x, approx=True):
    m = jnp.max(x, axis=-1, keepdims=True)
    e = jnp.exp(x - m)
    s = jnp.sum(e, axis=-1, keepdims=True)
    if approx:
        # EUP reciprocal: probabilities sum to ~1 (not exactly 1).  Pass
        # approx_softmax=False to the wrapper for exact jax.nn.softmax semantics.
        return e * pl.reciprocal(s, approx=True)
    return e / s


# ----------------------------- kernel -------------------------------------- #

def encoder_layer_kernel(
    x_ref,              # (1, S, D) f32: full sequence for this batch (resident across q tiles)
    wq_ref, bq_ref,     # (D, D) bf16, (1, D) f32
    wk_ref, bk_ref,     # (D, D) bf16, (1, D) f32
    wv_ref, bv_ref,     # (D, D) bf16, (1, D) f32
    wo_ref, bo_ref,     # (D, D) bf16, (1, D) f32
    w1_ref, b1_ref,     # (D, F) bf16, (1, F) f32
    w2_ref, b2_ref,     # (F, D) bf16, (1, D) f32
    g1_ref, be1_ref,    # (1, D) f32
    g2_ref, be2_ref,    # (1, D) f32
    o_ref,              # (1, TQ, D)
    x2_s,               # (S, D)       bf16 scratch: LN1(x) over the full sequence
    k_s, v_s,           # (H, S, Dh)   bf16 scratch: head-major K / V
    ctx_s,              # (TQ, D)      bf16 scratch: concatenated head contexts
    *,
    n_heads: int,
    q_tile: int,
    approx_softmax: bool,
):
    S = x_ref.shape[1]
    D = x_ref.shape[2]
    Dh = D // n_heads
    TQ = q_tile
    bf16 = jnp.bfloat16
    inv_sqrt_dh = 1.0 / math.sqrt(Dh)

    g1 = g1_ref[0]
    be1 = be1_ref[0]

    # --- once per batch element (first query tile): LN1 + K/V projection over the
    #     full sequence, stored head-major in persistent VMEM scratch ---
    # TODO(synk): for very long S, tile K/V along S with an online-softmax (flash)
    # loop instead of keeping full-sequence K/V resident in VMEM.
    @pl.when(pl.program_id(1) == 0)
    def _build_kv():
        x_full = x_ref[0].astype(jnp.float32)                        # (S, D)
        x2_full = _layer_norm(x_full, g1, be1).astype(bf16)
        x2_s[...] = x2_full
        k_full = jnp.dot(x2_full, wk_ref[...],
                         preferred_element_type=jnp.float32) + bk_ref[0]
        v_full = jnp.dot(x2_full, wv_ref[...],
                         preferred_element_type=jnp.float32) + bv_ref[0]
        for h in range(n_heads):
            lo = h * Dh
            k_s[h] = k_full[:, lo:lo + Dh].astype(bf16)
            v_s[h] = v_full[:, lo:lo + Dh].astype(bf16)

    # --- this query tile ---
    q_start = pl.multiple_of(pl.program_id(1) * TQ, TQ)
    x_q = x_ref[0, pl.ds(q_start, TQ), :].astype(jnp.float32)        # residual input
    x2_q = x2_s[pl.ds(q_start, TQ), :]                               # reuse LN1 (bf16)

    q = jnp.dot(x2_q, wq_ref[...], preferred_element_type=jnp.float32) + bq_ref[0]
    q = (q * inv_sqrt_dh).astype(bf16)                               # fold 1/sqrt(Dh) into Q

    # Per-head attention (static unroll).  K/V are leading-index views of the
    # head-major scratch (no lane slicing in the hot loop); each head's context is
    # written into its Dh-column slice of ctx_s so the output projection is one
    # full-depth (K = D) GEMM after the loop.
    # TODO(synk): attention-mask support omitted (mask=None path of the reference).
    for h in range(n_heads):
        lo = h * Dh
        qh = q[:, lo:lo + Dh]                                        # (TQ, Dh)
        scores = lax.dot_general(qh, k_s[h],
                                 dimension_numbers=(((1,), (1,)), ((), ())),
                                 preferred_element_type=jnp.float32)  # (TQ, S)
        probs = _softmax_last(scores, approx=approx_softmax)
        head_o = jnp.dot(probs.astype(bf16), v_s[h],
                         preferred_element_type=jnp.float32)          # (TQ, Dh)
        ctx_s[:, lo:lo + Dh] = head_o.astype(bf16)

    mha = jnp.dot(ctx_s[...], wo_ref[...],
                  preferred_element_type=jnp.float32) + bo_ref[0]
    x1 = x_q + mha                                    # dropout1 = identity (eval)

    # --- feed-forward with pre-norm residual ---
    x2 = _layer_norm(x1, g2_ref[0], be2_ref[0]).astype(bf16)
    h1 = jnp.dot(x2, w1_ref[...], preferred_element_type=jnp.float32) + b1_ref[0]
    h1 = jnp.maximum(h1, 0.0).astype(bf16)            # ReLU; inner dropout = identity
    ff = jnp.dot(h1, w2_ref[...], preferred_element_type=jnp.float32) + b2_ref[0]

    o_ref[0] = (x1 + ff).astype(o_ref.dtype)          # dropout2 = identity (eval)


# ----------------------------- wrapper -------------------------------------- #

def _tpu_vmem_capacity(default_bytes=64 << 20):
    try:
        return int(pltpu.get_tpu_info().vmem_capacity_bytes)
    except Exception:
        return default_bytes


def encoder_layer(x, params, n_heads, q_tile=256, approx_softmax=True):
    """x: (B, S, D) float32.  params: dict of f32 weights (see init_params).

    q_tile: rows per query/residual/FFN tile.  256 fills the 256-deep MXU on
    v6e/v7x; use 128 on v5e.  Clamped to S for short sequences.
    """
    B, S, D = x.shape
    F = params["w1"].shape[1]
    assert D % n_heads == 0
    q_tile = min(q_tile, S)
    assert S % q_tile == 0
    n_q = S // q_tile
    # bf16 slices of the LN1 scratch must start on a packed-sublane boundary.
    assert n_q == 1 or q_tile % 16 == 0
    Dh = D // n_heads

    bf16 = jnp.bfloat16
    # Split the fused qkv projection in the wrapper (so the hot loop never slices
    # weight refs) and store all matmul weights bf16: ~2x MXU rate, half the bytes.
    w_q = params["w_qkv"][:, :D].astype(bf16)
    w_k = params["w_qkv"][:, D:2 * D].astype(bf16)
    w_v = params["w_qkv"][:, 2 * D:].astype(bf16)
    b_q = params["b_qkv"][:, :D]
    b_k = params["b_qkv"][:, D:2 * D]
    b_v = params["b_qkv"][:, 2 * D:]
    w_out = params["w_out"].astype(bf16)
    w1 = params["w1"].astype(bf16)
    w2 = params["w2"].astype(bf16)

    kernel = functools.partial(encoder_layer_kernel, n_heads=n_heads,
                               q_tile=q_tile, approx_softmax=approx_softmax)

    # --- VMEM budget: weights single-buffered, x/out double-buffered, scratch, temps ---
    pad = lambda n, m: ((n + m - 1) // m) * m
    weight_bytes = 2 * (4 * D * D + 2 * D * F)                  # bf16, single-buffered
    small_bytes = 4 * (10 * D + F)                              # biases + LN params (f32)
    io_bytes = 2 * 4 * S * D + 2 * 4 * q_tile * D               # x block + out block (dbl-buf)
    scratch_bytes = 2 * (pad(S, 16) * D                         # x2_s
                         + 2 * n_heads * pad(S, 16) * pad(Dh, 128)   # k_s + v_s (lane-padded)
                         + q_tile * D)                          # ctx_s
    temp_bytes = 4 * (S * D + q_tile * (2 * S + 6 * D + F))     # f32 in-kernel temporaries
    vmem_budget = weight_bytes + small_bytes + io_bytes + scratch_bytes + temp_bytes
    # Generation-aware cap: ~15% headroom below physical VMEM (64 MiB v7x, 128 MiB v5e/v6e).
    vmem_cap = _tpu_vmem_capacity()
    vmem_limit = int(min(max(int(1.25 * vmem_budget), 16 << 20), int(0.85 * vmem_cap)))

    # --- advisory cost estimate; weights are DMA'd once (constant index maps) ---
    flops_per_batch = (8 * S * D * D        # Q, K, V, out projections
                       + 4 * S * S * D      # scores + probs @ V over all heads
                       + 4 * S * D * F)     # FFN
    cost = pl.CostEstimate(
        flops=int(B * flops_per_batch),
        transcendentals=int(B * (n_heads * S * S + 4 * S)),
        bytes_accessed=int(B * 2 * 4 * S * D + weight_bytes + small_bytes),
    )

    def build_and_run(single_buffer_weights):
        pm = pl.Buffered(1) if single_buffer_weights else None

        def const_spec(shape):
            idx = lambda b, qi: (0,) * len(shape)
            if pm is None:
                return pl.BlockSpec(shape, idx)
            return pl.BlockSpec(shape, idx, pipeline_mode=pm)

        grid_spec = pltpu.PrefetchScalarGridSpec(
            num_scalar_prefetch=0,
            grid=(B, n_q),
            in_specs=[
                pl.BlockSpec((1, S, D), lambda b, qi: (b, 0, 0)),   # x: resident across qi
                const_spec((D, D)), const_spec((1, D)),             # w_q, b_q
                const_spec((D, D)), const_spec((1, D)),             # w_k, b_k
                const_spec((D, D)), const_spec((1, D)),             # w_v, b_v
                const_spec((D, D)), const_spec((1, D)),             # w_out, b_out
                const_spec((D, F)), const_spec((1, F)),             # w1, b1
                const_spec((F, D)), const_spec((1, D)),             # w2, b2
                const_spec((1, D)), const_spec((1, D)),             # gamma1, beta1
                const_spec((1, D)), const_spec((1, D)),             # gamma2, beta2
            ],
            out_specs=pl.BlockSpec((1, q_tile, D), lambda b, qi: (b, qi, 0)),
            scratch_shapes=[
                pltpu.VMEM((S, D), bf16),                 # x2_s  (LN1 of full sequence)
                pltpu.VMEM((n_heads, S, Dh), bf16),       # k_s   (head-major K)
                pltpu.VMEM((n_heads, S, Dh), bf16),       # v_s   (head-major V)
                pltpu.VMEM((q_tile, D), bf16),            # ctx_s (concatenated heads)
            ],
        )
        return pl.pallas_call(
            kernel,
            out_shape=jax.ShapeDtypeStruct((B, S, D), x.dtype),
            grid_spec=grid_spec,
            compiler_params=pltpu.CompilerParams(
                # K/V scratch carries across the qi axis -> "arbitrary"; the batch
                # axis stays "parallel" for megacore sharding.
                dimension_semantics=("parallel", "arbitrary"),
                vmem_limit_bytes=vmem_limit,
            ),
            cost_estimate=cost,
        )(
            x,
            w_q, b_q, w_k, b_k, w_v, b_v,
            w_out, params["b_out"],
            w1, params["b1"], w2, params["b2"],
            params["gamma1"], params["beta1"],
            params["gamma2"], params["beta2"],
        )

    try:
        return build_and_run(True)
    except Exception:
        # Fallback for jax versions where pipeline_mode=pl.Buffered(1) is rejected.
        return build_and_run(False)


def init_params(key, d_model, d_ff):
    """Deterministic synthetic parameters matching the module's shapes (f32)."""
    ks = jax.random.split(key, 8)
    s = lambda fan_in: 1.0 / math.sqrt(fan_in)
    return {
        "w_qkv":  jax.random.normal(ks[0], (d_model, 3 * d_model), jnp.float32) * s(d_model),
        "b_qkv":  jax.random.normal(ks[1], (1, 3 * d_model), jnp.float32) * 0.01,
        "w_out":  jax.random.normal(ks[2], (d_model, d_model), jnp.float32) * s(d_model),
        "b_out":  jax.random.normal(ks[3], (1, d_model), jnp.float32) * 0.01,
        "w1":     jax.random.normal(ks[4], (d_model, d_ff), jnp.float32) * s(d_model),
        "b1":     jax.random.normal(ks[5], (1, d_ff), jnp.float32) * 0.01,
        "w2":     jax.random.normal(ks[6], (d_ff, d_model), jnp.float32) * s(d_ff),
        "b2":     jax.random.normal(ks[7], (1, d_model), jnp.float32) * 0.01,
        "gamma1": jnp.ones((1, d_model), jnp.float32),
        "beta1":  jnp.zeros((1, d_model), jnp.float32),
        "gamma2": jnp.ones((1, d_model), jnp.float32),
        "beta2":  jnp.zeros((1, d_model), jnp.float32),
    }


# --------------------------- reference (plain JAX) ------------------------- #

def encoder_layer_ref(x, p, n_heads, matmul_dtype=jnp.bfloat16):
    """Reference forward.  Matmul operands are cast to `matmul_dtype` (f32 accumulation)
    to mirror the kernel's MXU precision; pass jnp.float32 for exact module semantics."""
    bf = lambda t: t.astype(matmul_dtype)

    def ln(t, g, b, eps=1e-5):
        mu = t.mean(-1, keepdims=True)
        var = ((t - mu) ** 2).mean(-1, keepdims=True)
        return (t - mu) * lax.rsqrt(var + eps) * g + b

    B, S, D = x.shape
    Dh = D // n_heads
    x2 = ln(x, p["gamma1"], p["beta1"])
    qkv = jnp.dot(bf(x2), bf(p["w_qkv"]), preferred_element_type=jnp.float32) + p["b_qkv"]
    q, k, v = qkv[..., :D], qkv[..., D:2 * D], qkv[..., 2 * D:]
    split = lambda t: t.reshape(B, S, n_heads, Dh).transpose(0, 2, 1, 3)
    q, k, v = split(q) / math.sqrt(Dh), split(k), split(v)
    sc = jnp.einsum("bhqd,bhkd->bhqk", bf(q), bf(k), preferred_element_type=jnp.float32)
    pr = jax.nn.softmax(sc, axis=-1)
    o = jnp.einsum("bhqk,bhkd->bhqd", bf(pr), bf(v), preferred_element_type=jnp.float32)
    o = o.transpose(0, 2, 1, 3).reshape(B, S, D)
    mha = jnp.dot(bf(o), bf(p["w_out"]), preferred_element_type=jnp.float32) + p["b_out"]
    x = x + mha
    x2 = ln(x, p["gamma2"], p["beta2"])
    h1 = jnp.maximum(jnp.dot(bf(x2), bf(p["w1"]), preferred_element_type=jnp.float32) + p["b1"], 0.0)
    ff = jnp.dot(bf(h1), bf(p["w2"]), preferred_element_type=jnp.float32) + p["b2"]
    return x + ff


# ------------------------------- main --------------------------------------- #

if __name__ == "__main__":
    # Small but lane-dense shapes: D multiple of 128.  q_tile=16 -> grid (B, 2), so
    # both the K/V-build (qi == 0) and the K/V-reuse (qi > 0) paths are exercised.
    B, S, D, H, F = 2, 32, 128, 4, 256
    TQ = 16

    key = jax.random.PRNGKey(0)
    kx, kp = jax.random.split(key)
    x = jax.random.normal(kx, (B, S, D), jnp.float32)
    params = init_params(kp, D, F)

    out = encoder_layer(x, params, n_heads=H, q_tile=TQ)
    out = jax.block_until_ready(out)

    ref = encoder_layer_ref(x, params, n_heads=H)
    assert out.shape == (B, S, D)
    err = float(jnp.max(jnp.abs(out - ref)))
    assert jnp.allclose(out, ref, atol=2e-2, rtol=2e-2), err

    print("KERNEL_OK")
</pallas_src>

<mosaic_0001>
module attributes {stable_mosaic.version = 11 : i64} {
  func.func @encoder_layer_kernel(%arg0: i32, %arg1: i32, %arg2: memref<1x32x128xf32, #tpu.memory_space<vmem>>, %arg3: memref<128x128xbf16, #tpu.memory_space<vmem>>, %arg4: memref<1x128xf32, #tpu.memory_space<vmem>>, %arg5: memref<128x128xbf16, #tpu.memory_space<vmem>>, %arg6: memref<1x128xf32, #tpu.memory_space<vmem>>, %arg7: memref<128x128xbf16, #tpu.memory_space<vmem>>, %arg8: memref<1x128xf32, #tpu.memory_space<vmem>>, %arg9: memref<128x128xbf16, #tpu.memory_space<vmem>>, %arg10: memref<1x128xf32, #tpu.memory_space<vmem>>, %arg11: memref<128x256xbf16, #tpu.memory_space<vmem>>, %arg12: memref<1x256xf32, #tpu.memory_space<vmem>>, %arg13: memref<256x128xbf16, #tpu.memory_space<vmem>>, %arg14: memref<1x128xf32, #tpu.memory_space<vmem>>, %arg15: memref<1x128xf32, #tpu.memory_space<vmem>>, %arg16: memref<1x128xf32, #tpu.memory_space<vmem>>, %arg17: memref<1x128xf32, #tpu.memory_space<vmem>>, %arg18: memref<1x128xf32, #tpu.memory_space<vmem>>, %arg19: memref<1x16x128xf32, #tpu.memory_space<vmem>>, %arg20: memref<32x128xbf16, #tpu.memory_space<vmem>>, %arg21: memref<4x32x32xbf16, #tpu.memory_space<vmem>>, %arg22: memref<4x32x32xbf16, #tpu.memory_space<vmem>>, %arg23: memref<16x128xbf16, #tpu.memory_space<vmem>>) attributes {dimension_semantics = [#tpu.dimension_semantics<parallel>, #tpu.dimension_semantics<arbitrary>], iteration_bounds = array<i64: 2, 2>, scalar_prefetch = 0 : i64, scratch_operands = 4 : i64, tpu.core_type = #tpu.core_type<tc>, window_params = [{transform_indices = @transform_0, window_bounds = array<i64: 1, 32, 128>}, {pipeline_mode = #tpu.pipeline_mode<synchronous>, transform_indices = @transform_1, window_bounds = array<i64: 128, 128>}, {pipeline_mode = #tpu.pipeline_mode<synchronous>, transform_indices = @transform_2, window_bounds = array<i64: 1, 128>}, {pipeline_mode = #tpu.pipeline_mode<synchronous>, transform_indices = @transform_3, window_bounds = array<i64: 128, 128>}, {pipeline_mode = #tpu.pipeline_mode<synchronous>, transform_indices = @transform_4, window_bounds = array<i64: 1, 128>}, {pipeline_mode = #tpu.pipeline_mode<synchronous>, transform_indices = @transform_5, window_bounds = array<i64: 128, 128>}, {pipeline_mode = #tpu.pipeline_mode<synchronous>, transform_indices = @transform_6, window_bounds = array<i64: 1, 128>}, {pipeline_mode = #tpu.pipeline_mode<synchronous>, transform_indices = @transform_7, window_bounds = array<i64: 128, 128>}, {pipeline_mode = #tpu.pipeline_mode<synchronous>, transform_indices = @transform_8, window_bounds = array<i64: 1, 128>}, {pipeline_mode = #tpu.pipeline_mode<synchronous>, transform_indices = @transform_9, window_bounds = array<i64: 128, 256>}, {pipeline_mode = #tpu.pipeline_mode<synchronous>, transform_indices = @transform_10, window_bounds = array<i64: 1, 256>}, {pipeline_mode = #tpu.pipeline_mode<synchronous>, transform_indices = @transform_11, window_bounds = array<i64: 256, 128>}, {pipeline_mode = #tpu.pipeline_mode<synchronous>, transform_indices = @transform_12, window_bounds = array<i64: 1, 128>}, {pipeline_mode = #tpu.pipeline_mode<synchronous>, transform_indices = @transform_13, window_bounds = array<i64: 1, 128>}, {pipeline_mode = #tpu.pipeline_mode<synchronous>, transform_indices = @transform_14, window_bounds = array<i64: 1, 128>}, {pipeline_mode = #tpu.pipeline_mode<synchronous>, transform_indices = @transform_15, window_bounds = array<i64: 1, 128>}, {pipeline_mode = #tpu.pipeline_mode<synchronous>, transform_indices = @transform_16, window_bounds = array<i64: 1, 128>}, {transform_indices = @transform_17, window_bounds = array<i64: 1, 16, 128>}]} {
    %c0 = arith.constant 0 : index
    %c0_0 = arith.constant 0 : index
    %0 = vector.load %arg15[%c0, %c0_0] : memref<1x128xf32, #tpu.memory_space<vmem>>, vector<1x128xf32>
    %1 = vector.shape_cast %0 : vector<1x128xf32> to vector<128xf32>
    %c0_1 = arith.constant 0 : index
    %c0_2 = arith.constant 0 : index
    %2 = vector.load %arg16[%c0_1, %c0_2] : memref<1x128xf32, #tpu.memory_space<vmem>>, vector<1x128xf32>
    %3 = vector.shape_cast %2 : vector<1x128xf32> to vector<128xf32>
    %c0_i32 = arith.constant 0 : i32
    %4 = arith.cmpi eq, %arg1, %c0_i32 : i32
    %5 = arith.extui %4 : i1 to i32
    %c0_i32_3 = arith.constant 0 : i32
    %6 = arith.cmpi ne, %5, %c0_i32_3 : i32
    scf.if %6 {
      %c0_84 = arith.constant 0 : index
      %c0_85 = arith.constant 0 : index
      %c0_86 = arith.constant 0 : index
      %163 = vector.load %arg2[%c0_84, %c0_85, %c0_86] : memref<1x32x128xf32, #tpu.memory_space<vmem>>, vector<1x32x128xf32>
      %164 = vector.shape_cast %163 : vector<1x32x128xf32> to vector<32x128xf32>
      %cst_87 = arith.constant dense<0.000000e+00> : vector<32xf32>
      %165 = vector.multi_reduction <add>, %164, %cst_87 [1] : vector<32x128xf32> to vector<32xf32>
      %166 = vector.shape_cast %165 : vector<32xf32> to vector<32x1xf32>
      %cst_88 = arith.constant 1.280000e+02 : f32
      %167 = vector.broadcast %cst_88 : f32 to vector<32x1xf32>
      %168 = arith.divf %166, %167 : vector<32x1xf32>
      %169 = vector.broadcast %168 : vector<32x1xf32> to vector<32x128xf32>
      %170 = arith.subf %164, %169 : vector<32x128xf32>
      %171 = arith.mulf %170, %170 : vector<32x128xf32>
      %cst_89 = arith.constant dense<0.000000e+00> : vector<32xf32>
      %172 = vector.multi_reduction <add>, %171, %cst_89 [1] : vector<32x128xf32> to vector<32xf32>
      %173 = vector.shape_cast %172 : vector<32xf32> to vector<32x1xf32>
      %cst_90 = arith.constant 1.280000e+02 : f32
      %174 = vector.broadcast %cst_90 : f32 to vector<32x1xf32>
      %175 = arith.divf %173, %174 : vector<32x1xf32>
      %176 = vector.broadcast %168 : vector<32x1xf32> to vector<32x128xf32>
      %177 = arith.subf %164, %176 : vector<32x128xf32>
      %cst_91 = arith.constant 9.99999974E-6 : f32
      %178 = vector.broadcast %cst_91 : f32 to vector<32x1xf32>
      %179 = arith.addf %175, %178 : vector<32x1xf32>
      %180 = math.rsqrt %179 : vector<32x1xf32>
      %181 = vector.broadcast %180 : vector<32x1xf32> to vector<32x128xf32>
      %182 = arith.mulf %177, %181 : vector<32x128xf32>
      %183 = vector.shape_cast %1 : vector<128xf32> to vector<1x128xf32>
      %184 = vector.broadcast %183 : vector<1x128xf32> to vector<32x128xf32>
      %185 = arith.mulf %182, %184 : vector<32x128xf32>
      %186 = vector.shape_cast %3 : vector<128xf32> to vector<1x128xf32>
      %187 = vector.broadcast %186 : vector<1x128xf32> to vector<32x128xf32>
      %188 = arith.addf %185, %187 : vector<32x128xf32>
      %189 = arith.truncf %188 : vector<32x128xf32> to vector<32x128xbf16>
      %c0_92 = arith.constant 0 : index
      %c0_93 = arith.constant 0 : index
      %190 = vector.load %arg20[%c0_92, %c0_93] : memref<32x128xbf16, #tpu.memory_space<vmem>>, vector<32x128xbf16>
      tpu.vector_store %arg20[%c0_92, %c0_93], %189 {strides = array<i32>} : memref<32x128xbf16, #tpu.memory_space<vmem>>, vector<32x128xbf16>,
      %c0_94 = arith.constant 0 : index
      %c0_95 = arith.constant 0 : index
      %191 = vector.load %arg5[%c0_94, %c0_95] : memref<128x128xbf16, #tpu.memory_space<vmem>>, vector<128x128xbf16>
      %cst_96 = arith.constant dense<0.000000e+00> : vector<32x128xf32>
      %192 = tpu.matmul %189, %191, %cst_96 {dimension_numbers = #tpu.dot_dimension_numbers<[1], [0], [0], [1], [0, 0, 1, 1], [], []>} : vector<32x128xbf16>, vector<128x128xbf16>, vector<32x128xf32> -> vector<32x128xf32>
      %c0_97 = arith.constant 0 : index
      %c0_98 = arith.constant 0 : index
      %193 = vector.load %arg6[%c0_97, %c0_98] : memref<1x128xf32, #tpu.memory_space<vmem>>, vector<1x128xf32>
      %194 = vector.shape_cast %193 : vector<1x128xf32> to vector<128xf32>
      %195 = vector.shape_cast %194 : vector<128xf32> to vector<1x128xf32>
      %196 = vector.broadcast %195 : vector<1x128xf32> to vector<32x128xf32>
      %197 = arith.addf %192, %196 : vector<32x128xf32>
      %c0_99 = arith.constant 0 : index
      %c0_100 = arith.constant 0 : index
      %198 = vector.load %arg7[%c0_99, %c0_100] : memref<128x128xbf16, #tpu.memory_space<vmem>>, vector<128x128xbf16>
      %cst_101 = arith.constant dense<0.000000e+00> : vector<32x128xf32>
      %199 = tpu.matmul %189, %198, %cst_101 {dimension_numbers = #tpu.dot_dimension_numbers<[1], [0], [0], [1], [0, 0, 1, 1], [], []>} : vector<32x128xbf16>, vector<128x128xbf16>, vector<32x128xf32> -> vector<32x128xf32>
      %c0_102 = arith.constant 0 : index
      %c0_103 = arith.constant 0 : index
      %200 = vector.load %arg8[%c0_102, %c0_103] : memref<1x128xf32, #tpu.memory_space<vmem>>, vector<1x128xf32>
      %201 = vector.shape_cast %200 : vector<1x128xf32> to vector<128xf32>
      %202 = vector.shape_cast %201 : vector<128xf32> to vector<1x128xf32>
      %203 = vector.broadcast %202 : vector<1x128xf32> to vector<32x128xf32>
      %204 = arith.addf %199, %203 : vector<32x128xf32>
      %205 = vector.extract_strided_slice %197 {offsets = [0, 0], sizes = [32, 32], strides = [1, 1]} : vector<32x128xf32> to vector<32x32xf32>
      %206 = arith.truncf %205 : vector<32x32xf32> to vector<32x32xbf16>
      %c0_104 = arith.constant 0 : index
      %c0_105 = arith.constant 0 : index
      %c0_106 = arith.constant 0 : index
      %207 = vector.load %arg21[%c0_104, %c0_105, %c0_106] : memref<4x32x32xbf16, #tpu.memory_space<vmem>>, vector<1x32x32xbf16>
      %208 = vector.shape_cast %207 : vector<1x32x32xbf16> to vector<32x32xbf16>
      %209 = vector.shape_cast %206 : vector<32x32xbf16> to vector<1x32x32xbf16>
      tpu.vector_store %arg21[%c0_104, %c0_105, %c0_106], %209 {strides = array<i32>} : memref<4x32x32xbf16, #tpu.memory_space<vmem>>, vector<1x32x32xbf16>,
      %210 = vector.extract_strided_slice %204 {offsets = [0, 0], sizes = [32, 32], strides = [1, 1]} : vector<32x128xf32> to vector<32x32xf32>
      %211 = arith.truncf %210 : vector<32x32xf32> to vector<32x32xbf16>
      %c0_107 = arith.constant 0 : index
      %c0_108 = arith.constant 0 : index
      %c0_109 = arith.constant 0 : index
      %212 = vector.load %arg22[%c0_107, %c0_108, %c0_109] : memref<4x32x32xbf16, #tpu.memory_space<vmem>>, vector<1x32x32xbf16>
      %213 = vector.shape_cast %212 : vector<1x32x32xbf16> to vector<32x32xbf16>
      %214 = vector.shape_cast %211 : vector<32x32xbf16> to vector<1x32x32xbf16>
      tpu.vector_store %arg22[%c0_107, %c0_108, %c0_109], %214 {strides = array<i32>} : memref<4x32x32xbf16, #tpu.memory_space<vmem>>, vector<1x32x32xbf16>,
      %215 = vector.extract_strided_slice %197 {offsets = [0, 32], sizes = [32, 32], strides = [1, 1]} : vector<32x128xf32> to vector<32x32xf32>
      %216 = arith.truncf %215 : vector<32x32xf32> to vector<32x32xbf16>
      %c1_110 = arith.constant 1 : index
      %c0_111 = arith.constant 0 : index
      %c0_112 = arith.constant 0 : index
      %217 = vector.load %arg21[%c1_110, %c0_111, %c0_112] : memref<4x32x32xbf16, #tpu.memory_space<vmem>>, vector<1x32x32xbf16>
      %218 = vector.shape_cast %217 : vector<1x32x32xbf16> to vector<32x32xbf16>
      %219 = vector.shape_cast %216 : vector<32x32xbf16> to vector<1x32x32xbf16>
      tpu.vector_store %arg21[%c1_110, %c0_111, %c0_112], %219 {strides = array<i32>} : memref<4x32x32xbf16, #tpu.memory_space<vmem>>, vector<1x32x32xbf16>,
      %220 = vector.extract_strided_slice %204 {offsets = [0, 32], sizes = [32, 32], strides = [1, 1]} : vector<32x128xf32> to vector<32x32xf32>
      %221 = arith.truncf %220 : vector<32x32xf32> to vector<32x32xbf16>
      %c1_113 = arith.constant 1 : index
      %c0_114 = arith.constant 0 : index
      %c0_115 = arith.constant 0 : index
      %222 = vector.load %arg22[%c1_113, %c0_114, %c0_115] : memref<4x32x32xbf16, #tpu.memory_space<vmem>>, vector<1x32x32xbf16>
      %223 = vector.shape_cast %222 : vector<1x32x32xbf16> to vector<32x32xbf16>
      %224 = vector.shape_cast %221 : vector<32x32xbf16> to vector<1x32x32xbf16>
      tpu.vector_store %arg22[%c1_113, %c0_114, %c0_115], %224 {strides = array<i32>} : memref<4x32x32xbf16, #tpu.memory_space<vmem>>, vector<1x32x32xbf16>,
      %225 = vector.extract_strided_slice %197 {offsets = [0, 64], sizes = [32, 32], strides = [1, 1]} : vector<32x128xf32> to vector<32x32xf32>
      %226 = arith.truncf %225 : vector<32x32xf32> to vector<32x32xbf16>
      %c2_116 = arith.constant 2 : index
      %c0_117 = arith.constant 0 : index
      %c0_118 = arith.constant 0 : index
      %227 = vector.load %arg21[%c2_116, %c0_117, %c0_118] : memref<4x32x32xbf16, #tpu.memory_space<vmem>>, vector<1x32x32xbf16>
      %228 = vector.shape_cast %227 : vector<1x32x32xbf16> to vector<32x32xbf16>
      %229 = vector.shape_cast %226 : vector<32x32xbf16> to vector<1x32x32xbf16>
      tpu.vector_store %arg21[%c2_116, %c0_117, %c0_118], %229 {strides = array<i32>} : memref<4x32x32xbf16, #tpu.memory_space<vmem>>, vector<1x32x32xbf16>,
      %230 = vector.extract_strided_slice %204 {offsets = [0, 64], sizes = [32, 32], strides = [1, 1]} : vector<32x128xf32> to vector<32x32xf32>
      %231 = arith.truncf %230 : vector<32x32xf32> to vector<32x32xbf16>
      %c2_119 = arith.constant 2 : index
      %c0_120 = arith.constant 0 : index
      %c0_121 = arith.constant 0 : index
      %232 = vector.load %arg22[%c2_119, %c0_120, %c0_121] : memref<4x32x32xbf16, #tpu.memory_space<vmem>>, vector<1x32x32xbf16>
      %233 = vector.shape_cast %232 : vector<1x32x32xbf16> to vector<32x32xbf16>
      %234 = vector.shape_cast %231 : vector<32x32xbf16> to vector<1x32x32xbf16>
      tpu.vector_store %arg22[%c2_119, %c0_120, %c0_121], %234 {strides = array<i32>} : memref<4x32x32xbf16, #tpu.memory_space<vmem>>, vector<1x32x32xbf16>,
      %235 = vector.extract_strided_slice %197 {offsets = [0, 96], sizes = [32, 32], strides = [1, 1]} : vector<32x128xf32> to vector<32x32xf32>
      %236 = arith.truncf %235 : vector<32x32xf32> to vector<32x32xbf16>
      %c3_122 = arith.constant 3 : index
      %c0_123 = arith.constant 0 : index
      %c0_124 = arith.constant 0 : index
      %237 = vector.load %arg21[%c3_122, %c0_123, %c0_124] : memref<4x32x32xbf16, #tpu.memory_space<vmem>>, vector<1x32x32xbf16>
      %238 = vector.shape_cast %237 : vector<1x32x32xbf16> to vector<32x32xbf16>
      %239 = vector.shape_cast %236 : vector<32x32xbf16> to vector<1x32x32xbf16>
      tpu.vector_store %arg21[%c3_122, %c0_123, %c0_124], %239 {strides = array<i32>} : memref<4x32x32xbf16, #tpu.memory_space<vmem>>, vector<1x32x32xbf16>,
      %240 = vector.extract_strided_slice %204 {offsets = [0, 96], sizes = [32, 32], strides = [1, 1]} : vector<32x128xf32> to vector<32x32xf32>
      %241 = arith.truncf %240 : vector<32x32xf32> to vector<32x32xbf16>
      %c3_125 = arith.constant 3 : index
      %c0_126 = arith.constant 0 : index
      %c0_127 = arith.constant 0 : index
      %242 = vector.load %arg22[%c3_125, %c0_126, %c0_127] : memref<4x32x32xbf16, #tpu.memory_space<vmem>>, vector<1x32x32xbf16>
      %243 = vector.shape_cast %242 : vector<1x32x32xbf16> to vector<32x32xbf16>
      %244 = vector.shape_cast %241 : vector<32x32xbf16> to vector<1x32x32xbf16>
      tpu.vector_store %arg22[%c3_125, %c0_126, %c0_127], %244 {strides = array<i32>} : memref<4x32x32xbf16, #tpu.memory_space<vmem>>, vector<1x32x32xbf16>,
    } else {
    }
    %c16_i32 = arith.constant 16 : i32
    %7 = arith.muli %arg1, %c16_i32 : i32
    %8 = tpu.assume_multiple %7, 16 : i32
    %c0_4 = arith.constant 0 : index
    %9 = arith.index_cast %8 : i32 to index
    %c0_5 = arith.constant 0 : index
    %10 = vector.load %arg2[%c0_4, %9, %c0_5] : memref<1x32x128xf32, #tpu.memory_space<vmem>>, vector<1x16x128xf32>
    %11 = vector.shape_cast %10 : vector<1x16x128xf32> to vector<16x128xf32>
    %12 = arith.index_cast %8 : i32 to index
    %c0_6 = arith.constant 0 : index
    %13 = vector.load %arg20[%12, %c0_6] : memref<32x128xbf16, #tpu.memory_space<vmem>>, vector<16x128xbf16>
    %c0_7 = arith.constant 0 : index
    %c0_8 = arith.constant 0 : index
    %14 = vector.load %arg3[%c0_7, %c0_8] : memref<128x128xbf16, #tpu.memory_space<vmem>>, vector<128x128xbf16>
    %cst = arith.constant dense<0.000000e+00> : vector<16x128xf32>
    %15 = tpu.matmul %13, %14, %cst {dimension_numbers = #tpu.dot_dimension_numbers<[1], [0], [0], [1], [0, 0, 1, 1], [], []>} : vector<16x128xbf16>, vector<128x128xbf16>, vector<16x128xf32> -> vector<16x128xf32>
    %c0_9 = arith.constant 0 : index
    %c0_10 = arith.constant 0 : index
    %16 = vector.load %arg4[%c0_9, %c0_10] : memref<1x128xf32, #tpu.memory_space<vmem>>, vector<1x128xf32>
    %17 = vector.shape_cast %16 : vector<1x128xf32> to vector<128xf32>
    %18 = vector.shape_cast %17 : vector<128xf32> to vector<1x128xf32>
    %19 = vector.broadcast %18 : vector<1x128xf32> to vector<16x128xf32>
    %20 = arith.addf %15, %19 : vector<16x128xf32>
    %cst_11 = arith.constant 0.176776692 : f32
    %21 = vector.broadcast %cst_11 : f32 to vector<16x128xf32>
    %22 = arith.mulf %20, %21 : vector<16x128xf32>
    %23 = arith.truncf %22 : vector<16x128xf32> to vector<16x128xbf16>
    %24 = vector.extract_strided_slice %23 {offsets = [0, 0], sizes = [16, 32], strides = [1, 1]} : vector<16x128xbf16> to vector<16x32xbf16>
    %c0_12 = arith.constant 0 : index
    %c0_13 = arith.constant 0 : index
    %c0_14 = arith.constant 0 : index
    %25 = vector.load %arg21[%c0_12, %c0_13, %c0_14] : memref<4x32x32xbf16, #tpu.memory_space<vmem>>, vector<1x32x32xbf16>
    %26 = vector.shape_cast %25 : vector<1x32x32xbf16> to vector<32x32xbf16>
    %cst_15 = arith.constant dense<0.000000e+00> : vector<16x32xf32>
    %27 = tpu.matmul %24, %26, %cst_15 {dimension_numbers = #tpu.dot_dimension_numbers<[1], [1], [0], [0], [0, 0, 1, 0], [], []>} : vector<16x32xbf16>, vector<32x32xbf16>, vector<16x32xf32> -> vector<16x32xf32>
    %cst_16 = arith.constant dense<0xFF800000> : vector<16xf32>
    %28 = vector.multi_reduction <maximumf>, %27, %cst_16 [1] : vector<16x32xf32> to vector<16xf32>
    %29 = vector.shape_cast %28 : vector<16xf32> to vector<16x1xf32>
    %30 = vector.broadcast %29 : vector<16x1xf32> to vector<16x32xf32>
    %31 = arith.subf %27, %30 : vector<16x32xf32>
    %32 = math.exp %31 : vector<16x32xf32>
    %cst_17 = arith.constant dense<0.000000e+00> : vector<16xf32>
    %33 = vector.multi_reduction <add>, %32, %cst_17 [1] : vector<16x32xf32> to vector<16xf32>
    %34 = vector.shape_cast %33 : vector<16xf32> to vector<16x1xf32>
    %35 = tpu.reciprocal %34 {approx = true} : vector<16x1xf32> -> vector<16x1xf32>
    %36 = vector.broadcast %35 : vector<16x1xf32> to vector<16x32xf32>
    %37 = arith.mulf %32, %36 : vector<16x32xf32>
    %38 = arith.truncf %37 : vector<16x32xf32> to vector<16x32xbf16>
    %c0_18 = arith.constant 0 : index
    %c0_19 = arith.constant 0 : index
    %c0_20 = arith.constant 0 : index
    %39 = vector.load %arg22[%c0_18, %c0_19, %c0_20] : memref<4x32x32xbf16, #tpu.memory_space<vmem>>, vector<1x32x32xbf16>
    %40 = vector.shape_cast %39 : vector<1x32x32xbf16> to vector<32x32xbf16>
    %cst_21 = arith.constant dense<0.000000e+00> : vector<16x32xf32>
    %41 = tpu.matmul %38, %40, %cst_21 {dimension_numbers = #tpu.dot_dimension_numbers<[1], [0], [0], [1], [0, 0, 1, 1], [], []>} : vector<16x32xbf16>, vector<32x32xbf16>, vector<16x32xf32> -> vector<16x32xf32>
    %42 = arith.truncf %41 : vector<16x32xf32> to vector<16x32xbf16>
    %c0_22 = arith.constant 0 : index
    %c0_23 = arith.constant 0 : index
    %43 = vector.load %arg23[%c0_22, %c0_23] : memref<16x128xbf16, #tpu.memory_space<vmem>>, vector<16x32xbf16>
    tpu.vector_store %arg23[%c0_22, %c0_23], %42 {strides = array<i32>} : memref<16x128xbf16, #tpu.memory_space<vmem>>, vector<16x32xbf16>,
    %44 = vector.extract_strided_slice %23 {offsets = [0, 32], sizes = [16, 32], strides = [1, 1]} : vector<16x128xbf16> to vector<16x32xbf16>
    %c1 = arith.constant 1 : index
    %c0_24 = arith.constant 0 : index
    %c0_25 = arith.constant 0 : index
    %45 = vector.load %arg21[%c1, %c0_24, %c0_25] : memref<4x32x32xbf16, #tpu.memory_space<vmem>>, vector<1x32x32xbf16>
    %46 = vector.shape_cast %45 : vector<1x32x32xbf16> to vector<32x32xbf16>
    %cst_26 = arith.constant dense<0.000000e+00> : vector<16x32xf32>
    %47 = tpu.matmul %44, %46, %cst_26 {dimension_numbers = #tpu.dot_dimension_numbers<[1], [1], [0], [0], [0, 0, 1, 0], [], []>} : vector<16x32xbf16>, vector<32x32xbf16>, vector<16x32xf32> -> vector<16x32xf32>
    %cst_27 = arith.constant dense<0xFF800000> : vector<16xf32>
    %48 = vector.multi_reduction <maximumf>, %47, %cst_27 [1] : vector<16x32xf32> to vector<16xf32>
    %49 = vector.shape_cast %48 : vector<16xf32> to vector<16x1xf32>
    %50 = vector.broadcast %49 : vector<16x1xf32> to vector<16x32xf32>
    %51 = arith.subf %47, %50 : vector<16x32xf32>
    %52 = math.exp %51 : vector<16x32xf32>
    %cst_28 = arith.constant dense<0.000000e+00> : vector<16xf32>
    %53 = vector.multi_reduction <add>, %52, %cst_28 [1] : vector<16x32xf32> to vector<16xf32>
    %54 = vector.shape_cast %53 : vector<16xf32> to vector<16x1xf32>
    %55 = tpu.reciprocal %54 {approx = true} : vector<16x1xf32> -> vector<16x1xf32>
    %56 = vector.broadcast %55 : vector<16x1xf32> to vector<16x32xf32>
    %57 = arith.mulf %52, %56 : vector<16x32xf32>
    %58 = arith.truncf %57 : vector<16x32xf32> to vector<16x32xbf16>
    %c1_29 = arith.constant 1 : index
    %c0_30 = arith.constant 0 : index
    %c0_31 = arith.constant 0 : index
    %59 = vector.load %arg22[%c1_29, %c0_30, %c0_31] : memref<4x32x32xbf16, #tpu.memory_space<vmem>>, vector<1x32x32xbf16>
    %60 = vector.shape_cast %59 : vector<1x32x32xbf16> to vector<32x32xbf16>
    %cst_32 = arith.constant dense<0.000000e+00> : vector<16x32xf32>
    %61 = tpu.matmul %58, %60, %cst_32 {dimension_numbers = #tpu.dot_dimension_numbers<[1], [0], [0], [1], [0, 0, 1, 1], [], []>} : vector<16x32xbf16>, vector<32x32xbf16>, vector<16x32xf32> -> vector<16x32xf32>
    %62 = arith.truncf %61 : vector<16x32xf32> to vector<16x32xbf16>
    %c0_33 = arith.constant 0 : index
    %c32 = arith.constant 32 : index
    %63 = vector.load %arg23[%c0_33, %c32] : memref<16x128xbf16, #tpu.memory_space<vmem>>, vector<16x32xbf16>
    tpu.vector_store %arg23[%c0_33, %c32], %62 {strides = array<i32>} : memref<16x128xbf16, #tpu.memory_space<vmem>>, vector<16x32xbf16>,
    %64 = vector.extract_strided_slice %23 {offsets = [0, 64], sizes = [16, 32], strides = [1, 1]} : vector<16x128xbf16> to vector<16x32xbf16>
    %c2 = arith.constant 2 : index
    %c0_34 = arith.constant 0 : index
    %c0_35 = arith.constant 0 : index
    %65 = vector.load %arg21[%c2, %c0_34, %c0_35] : memref<4x32x32xbf16, #tpu.memory_space<vmem>>, vector<1x32x32xbf16>
    %66 = vector.shape_cast %65 : vector<1x32x32xbf16> to vector<32x32xbf16>
    %cst_36 = arith.constant dense<0.000000e+00> : vector<16x32xf32>
    %67 = tpu.matmul %64, %66, %cst_36 {dimension_numbers = #tpu.dot_dimension_numbers<[1], [1], [0], [0], [0, 0, 1, 0], [], []>} : vector<16x32xbf16>, vector<32x32xbf16>, vector<16x32xf32> -> vector<16x32xf32>
    %cst_37 = arith.constant dense<0xFF800000> : vector<16xf32>
    %68 = vector.multi_reduction <maximumf>, %67, %cst_37 [1] : vector<16x32xf32> to vector<16xf32>
    %69 = vector.shape_cast %68 : vector<16xf32> to vector<16x1xf32>
    %70 = vector.broadcast %69 : vector<16x1xf32> to vector<16x32xf32>
    %71 = arith.subf %67, %70 : vector<16x32xf32>
    %72 = math.exp %71 : vector<16x32xf32>
    %cst_38 = arith.constant dense<0.000000e+00> : vector<16xf32>
    %73 = vector.multi_reduction <add>, %72, %cst_38 [1] : vector<16x32xf32> to vector<16xf32>
    %74 = vector.shape_cast %73 : vector<16xf32> to vector<16x1xf32>
    %75 = tpu.reciprocal %74 {approx = true} : vector<16x1xf32> -> vector<16x1xf32>
    %76 = vector.broadcast %75 : vector<16x1xf32> to vector<16x32xf32>
    %77 = arith.mulf %72, %76 : vector<16x32xf32>
    %78 = arith.truncf %77 : vector<16x32xf32> to vector<16x32xbf16>
    %c2_39 = arith.constant 2 : index
    %c0_40 = arith.constant 0 : index
    %c0_41 = arith.constant 0 : index
    %79 = vector.load %arg22[%c2_39, %c0_40, %c0_41] : memref<4x32x32xbf16, #tpu.memory_space<vmem>>, vector<1x32x32xbf16>
    %80 = vector.shape_cast %79 : vector<1x32x32xbf16> to vector<32x32xbf16>
    %cst_42 = arith.constant dense<0.000000e+00> : vector<16x32xf32>
    %81 = tpu.matmul %78, %80, %cst_42 {dimension_numbers = #tpu.dot_dimension_numbers<[1], [0], [0], [1], [0, 0, 1, 1], [], []>} : vector<16x32xbf16>, vector<32x32xbf16>, vector<16x32xf32> -> vector<16x32xf32>
    %82 = arith.truncf %81 : vector<16x32xf32> to vector<16x32xbf16>
    %c0_43 = arith.constant 0 : index
    %c64 = arith.constant 64 : index
    %83 = vector.load %arg23[%c0_43, %c64] : memref<16x128xbf16, #tpu.memory_space<vmem>>, vector<16x32xbf16>
    tpu.vector_store %arg23[%c0_43, %c64], %82 {strides = array<i32>} : memref<16x128xbf16, #tpu.memory_space<vmem>>, vector<16x32xbf16>,
    %84 = vector.extract_strided_slice %23 {offsets = [0, 96], sizes = [16, 32], strides = [1, 1]} : vector<16x128xbf16> to vector<16x32xbf16>
    %c3 = arith.constant 3 : index
    %c0_44 = arith.constant 0 : index
    %c0_45 = arith.constant 0 : index
    %85 = vector.load %arg21[%c3, %c0_44, %c0_45] : memref<4x32x32xbf16, #tpu.memory_space<vmem>>, vector<1x32x32xbf16>
    %86 = vector.shape_cast %85 : vector<1x32x32xbf16> to vector<32x32xbf16>
    %cst_46 = arith.constant dense<0.000000e+00> : vector<16x32xf32>
    %87 = tpu.matmul %84, %86, %cst_46 {dimension_numbers = #tpu.dot_dimension_numbers<[1], [1], [0], [0], [0, 0, 1, 0], [], []>} : vector<16x32xbf16>, vector<32x32xbf16>, vector<16x32xf32> -> vector<16x32xf32>
    %cst_47 = arith.constant dense<0xFF800000> : vector<16xf32>
    %88 = vector.multi_reduction <maximumf>, %87, %cst_47 [1] : vector<16x32xf32> to vector<16xf32>
    %89 = vector.shape_cast %88 : vector<16xf32> to vector<16x1xf32>
    %90 = vector.broadcast %89 : vector<16x1xf32> to vector<16x32xf32>
    %91 = arith.subf %87, %90 : vector<16x32xf32>
    %92 = math.exp %91 : vector<16x32xf32>
    %cst_48 = arith.constant dense<0.000000e+00> : vector<16xf32>
    %93 = vector.multi_reduction <add>, %92, %cst_48 [1] : vector<16x32xf32> to vector<16xf32>
    %94 = vector.shape_cast %93 : vector<16xf32> to vector<16x1xf32>
    %95 = tpu.reciprocal %94 {approx = true} : vector<16x1xf32> -> vector<16x1xf32>
    %96 = vector.broadcast %95 : vector<16x1xf32> to vector<16x32xf32>
    %97 = arith.mulf %92, %96 : vector<16x32xf32>
    %98 = arith.truncf %97 : vector<16x32xf32> to vector<16x32xbf16>
    %c3_49 = arith.constant 3 : index
    %c0_50 = arith.constant 0 : index
    %c0_51 = arith.constant 0 : index
    %99 = vector.load %arg22[%c3_49, %c0_50, %c0_51] : memref<4x32x32xbf16, #tpu.memory_space<vmem>>, vector<1x32x32xbf16>
    %100 = vector.shape_cast %99 : vector<1x32x32xbf16> to vector<32x32xbf16>
    %cst_52 = arith.constant dense<0.000000e+00> : vector<16x32xf32>
    %101 = tpu.matmul %98, %100, %cst_52 {dimension_numbers = #tpu.dot_dimension_numbers<[1], [0], [0], [1], [0, 0, 1, 1], [], []>} : vector<16x32xbf16>, vector<32x32xbf16>, vector<16x32xf32> -> vector<16x32xf32>
    %102 = arith.truncf %101 : vector<16x32xf32> to vector<16x32xbf16>
    %c0_53 = arith.constant 0 : index
    %c96 = arith.constant 96 : index
    %103 = vector.load %arg23[%c0_53, %c96] : memref<16x128xbf16, #tpu.memory_space<vmem>>, vector<16x32xbf16>
    tpu.vector_store %arg23[%c0_53, %c96], %102 {strides = array<i32>} : memref<16x128xbf16, #tpu.memory_space<vmem>>, vector<16x32xbf16>,
    %c0_54 = arith.constant 0 : index
    %c0_55 = arith.constant 0 : index
    %104 = vector.load %arg23[%c0_54, %c0_55] : memref<16x128xbf16, #tpu.memory_space<vmem>>, vector<16x128xbf16>
    %c0_56 = arith.constant 0 : index
    %c0_57 = arith.constant 0 : index
    %105 = vector.load %arg9[%c0_56, %c0_57] : memref<128x128xbf16, #tpu.memory_space<vmem>>, vector<128x128xbf16>
    %cst_58 = arith.constant dense<0.000000e+00> : vector<16x128xf32>
    %106 = tpu.matmul %104, %105, %cst_58 {dimension_numbers = #tpu.dot_dimension_numbers<[1], [0], [0], [1], [0, 0, 1, 1], [], []>} : vector<16x128xbf16>, vector<128x128xbf16>, vector<16x128xf32> -> vector<16x128xf32>
    %c0_59 = arith.constant 0 : index
    %c0_60 = arith.constant 0 : index
    %107 = vector.load %arg10[%c0_59, %c0_60] : memref<1x128xf32, #tpu.memory_space<vmem>>, vector<1x128xf32>
    %108 = vector.shape_cast %107 : vector<1x128xf32> to vector<128xf32>
    %109 = vector.shape_cast %108 : vector<128xf32> to vector<1x128xf32>
    %110 = vector.broadcast %109 : vector<1x128xf32> to vector<16x128xf32>
    %111 = arith.addf %106, %110 : vector<16x128xf32>
    %112 = arith.addf %11, %111 : vector<16x128xf32>
    %c0_61 = arith.constant 0 : index
    %c0_62 = arith.constant 0 : index
    %113 = vector.load %arg17[%c0_61, %c0_62] : memref<1x128xf32, #tpu.memory_space<vmem>>, vector<1x128xf32>
    %114 = vector.shape_cast %113 : vector<1x128xf32> to vector<128xf32>
    %c0_63 = arith.constant 0 : index
    %c0_64 = arith.constant 0 : index
    %115 = vector.load %arg18[%c0_63, %c0_64] : memref<1x128xf32, #tpu.memory_space<vmem>>, vector<1x128xf32>
    %116 = vector.shape_cast %115 : vector<1x128xf32> to vector<128xf32>
    %cst_65 = arith.constant dense<0.000000e+00> : vector<16xf32>
    %117 = vector.multi_reduction <add>, %112, %cst_65 [1] : vector<16x128xf32> to vector<16xf32>
    %118 = vector.shape_cast %117 : vector<16xf32> to vector<16x1xf32>
    %cst_66 = arith.constant 1.280000e+02 : f32
    %119 = vector.broadcast %cst_66 : f32 to vector<16x1xf32>
    %120 = arith.divf %118, %119 : vector<16x1xf32>
    %121 = vector.broadcast %120 : vector<16x1xf32> to vector<16x128xf32>
    %122 = arith.subf %112, %121 : vector<16x128xf32>
    %123 = arith.mulf %122, %122 : vector<16x128xf32>
    %cst_67 = arith.constant dense<0.000000e+00> : vector<16xf32>
    %124 = vector.multi_reduction <add>, %123, %cst_67 [1] : vector<16x128xf32> to vector<16xf32>
    %125 = vector.shape_cast %124 : vector<16xf32> to vector<16x1xf32>
    %cst_68 = arith.constant 1.280000e+02 : f32
    %126 = vector.broadcast %cst_68 : f32 to vector<16x1xf32>
    %127 = arith.divf %125, %126 : vector<16x1xf32>
    %128 = vector.broadcast %120 : vector<16x1xf32> to vector<16x128xf32>
    %129 = arith.subf %112, %128 : vector<16x128xf32>
    %cst_69 = arith.constant 9.99999974E-6 : f32
    %130 = vector.broadcast %cst_69 : f32 to vector<16x1xf32>
    %131 = arith.addf %127, %130 : vector<16x1xf32>
    %132 = math.rsqrt %131 : vector<16x1xf32>
    %133 = vector.broadcast %132 : vector<16x1xf32> to vector<16x128xf32>
    %134 = arith.mulf %129, %133 : vector<16x128xf32>
    %135 = vector.shape_cast %114 : vector<128xf32> to vector<1x128xf32>
    %136 = vector.broadcast %135 : vector<1x128xf32> to vector<16x128xf32>
    %137 = arith.mulf %134, %136 : vector<16x128xf32>
    %138 = vector.shape_cast %116 : vector<128xf32> to vector<1x128xf32>
    %139 = vector.broadcast %138 : vector<1x128xf32> to vector<16x128xf32>
    %140 = arith.addf %137, %139 : vector<16x128xf32>
    %141 = arith.truncf %140 : vector<16x128xf32> to vector<16x128xbf16>
    %c0_70 = arith.constant 0 : index
    %c0_71 = arith.constant 0 : index
    %142 = vector.load %arg11[%c0_70, %c0_71] : memref<128x256xbf16, #tpu.memory_space<vmem>>, vector<128x256xbf16>
    %cst_72 = arith.constant dense<0.000000e+00> : vector<16x256xf32>
    %143 = tpu.matmul %141, %142, %cst_72 {dimension_numbers = #tpu.dot_dimension_numbers<[1], [0], [0], [1], [0, 0, 1, 1], [], []>} : vector<16x128xbf16>, vector<128x256xbf16>, vector<16x256xf32> -> vector<16x256xf32>
    %c0_73 = arith.constant 0 : index
    %c0_74 = arith.constant 0 : index
    %144 = vector.load %arg12[%c0_73, %c0_74] : memref<1x256xf32, #tpu.memory_space<vmem>>, vector<1x256xf32>
    %145 = vector.shape_cast %144 : vector<1x256xf32> to vector<256xf32>
    %146 = vector.shape_cast %145 : vector<256xf32> to vector<1x256xf32>
    %147 = vector.broadcast %146 : vector<1x256xf32> to vector<16x256xf32>
    %148 = arith.addf %143, %147 : vector<16x256xf32>
    %cst_75 = arith.constant 0.000000e+00 : f32
    %149 = vector.broadcast %cst_75 : f32 to vector<16x256xf32>
    %150 = arith.maximumf %148, %149 : vector<16x256xf32>
    %151 = arith.truncf %150 : vector<16x256xf32> to vector<16x256xbf16>
    %c0_76 = arith.constant 0 : index
    %c0_77 = arith.constant 0 : index
    %152 = vector.load %arg13[%c0_76, %c0_77] : memref<256x128xbf16, #tpu.memory_space<vmem>>, vector<256x128xbf16>
    %cst_78 = arith.constant dense<0.000000e+00> : vector<16x128xf32>
    %153 = tpu.matmul %151, %152, %cst_78 {dimension_numbers = #tpu.dot_dimension_numbers<[1], [0], [0], [1], [0, 0, 1, 1], [], []>} : vector<16x256xbf16>, vector<256x128xbf16>, vector<16x128xf32> -> vector<16x128xf32>
    %c0_79 = arith.constant 0 : index
    %c0_80 = arith.constant 0 : index
    %154 = vector.load %arg14[%c0_79, %c0_80] : memref<1x128xf32, #tpu.memory_space<vmem>>, vector<1x128xf32>
    %155 = vector.shape_cast %154 : vector<1x128xf32> to vector<128xf32>
    %156 = vector.shape_cast %155 : vector<128xf32> to vector<1x128xf32>
    %157 = vector.broadcast %156 : vector<1x128xf32> to vector<16x128xf32>
    %158 = arith.addf %153, %157 : vector<16x128xf32>
    %159 = arith.addf %112, %158 : vector<16x128xf32>
    %c0_81 = arith.constant 0 : index
    %c0_82 = arith.constant 0 : index
    %c0_83 = arith.constant 0 : index
    %160 = vector.load %arg19[%c0_81, %c0_82, %c0_83] : memref<1x16x128xf32, #tpu.memory_space<vmem>>, vector<1x16x128xf32>
    %161 = vector.shape_cast %160 : vector<1x16x128xf32> to vector<16x128xf32>
    %162 = vector.shape_cast %159 : vector<16x128xf32> to vector<1x16x128xf32>
    tpu.vector_store %arg19[%c0_81, %c0_82, %c0_83], %162 {strides = array<i32>} : memref<1x16x128xf32, #tpu.memory_space<vmem>>, vector<1x16x128xf32>,
    return
  }
  func.func @transform_0(%arg0: i32, %arg1: i32) -> (i32, i32, i32) {
    %c0_i32 = arith.constant 0 : i32
    %c0_i32_0 = arith.constant 0 : i32
    %c0_i32_1 = arith.constant 0 : i32
    return %arg0, %c0_i32, %c0_i32_0 : i32, i32, i32
  }
  func.func @transform_1(%arg0: i32, %arg1: i32) -> (i32, i32) {
    %c0_i32 = arith.constant 0 : i32
    %c0_i32_0 = arith.constant 0 : i32
    %c0_i32_1 = arith.constant 0 : i32
    return %c0_i32, %c0_i32_0 : i32, i32
  }
  func.func @transform_2(%arg0: i32, %arg1: i32) -> (i32, i32) {
    %c0_i32 = arith.constant 0 : i32
    %c0_i32_0 = arith.constant 0 : i32
    %c0_i32_1 = arith.constant 0 : i32
    return %c0_i32, %c0_i32_0 : i32, i32
  }
  func.func @transform_3(%arg0: i32, %arg1: i32) -> (i32, i32) {
    %c0_i32 = arith.constant 0 : i32
    %c0_i32_0 = arith.constant 0 : i32
    %c0_i32_1 = arith.constant 0 : i32
    return %c0_i32, %c0_i32_0 : i32, i32
  }
  func.func @transform_4(%arg0: i32, %arg1: i32) -> (i32, i32) {
    %c0_i32 = arith.constant 0 : i32
    %c0_i32_0 = arith.constant 0 : i32
    %c0_i32_1 = arith.constant 0 : i32
    return %c0_i32, %c0_i32_0 : i32, i32
  }
  func.func @transform_5(%arg0: i32, %arg1: i32) -> (i32, i32) {
    %c0_i32 = arith.constant 0 : i32
    %c0_i32_0 = arith.constant 0 : i32
    %c0_i32_1 = arith.constant 0 : i32
    return %c0_i32, %c0_i32_0 : i32, i32
  }
  func.func @transform_6(%arg0: i32, %arg1: i32) -> (i32, i32) {
    %c0_i32 = arith.constant 0 : i32
    %c0_i32_0 = arith.constant 0 : i32
    %c0_i32_1 = arith.constant 0 : i32
    return %c0_i32, %c0_i32_0 : i32, i32
  }
  func.func @transform_7(%arg0: i32, %arg1: i32) -> (i32, i32) {
    %c0_i32 = arith.constant 0 : i32
    %c0_i32_0 = arith.constant 0 : i32
    %c0_i32_1 = arith.constant 0 : i32
    return %c0_i32, %c0_i32_0 : i32, i32
  }
  func.func @transform_8(%arg0: i32, %arg1: i32) -> (i32, i32) {
    %c0_i32 = arith.constant 0 : i32
    %c0_i32_0 = arith.constant 0 : i32
    %c0_i32_1 = arith.constant 0 : i32
    return %c0_i32, %c0_i32_0 : i32, i32
  }
  func.func @transform_9(%arg0: i32, %arg1: i32) -> (i32, i32) {
    %c0_i32 = arith.constant 0 : i32
    %c0_i32_0 = arith.constant 0 : i32
    %c0_i32_1 = arith.constant 0 : i32
    return %c0_i32, %c0_i32_0 : i32, i32
  }
  func.func @transform_10(%arg0: i32, %arg1: i32) -> (i32, i32) {
    %c0_i32 = arith.constant 0 : i32
    %c0_i32_0 = arith.constant 0 : i32
    %c0_i32_1 = arith.constant 0 : i32
    return %c0_i32, %c0_i32_0 : i32, i32
  }
  func.func @transform_11(%arg0: i32, %arg1: i32) -> (i32, i32) {
    %c0_i32 = arith.constant 0 : i32
    %c0_i32_0 = arith.constant 0 : i32
    %c0_i32_1 = arith.constant 0 : i32
    return %c0_i32, %c0_i32_0 : i32, i32
  }
  func.func @transform_12(%arg0: i32, %arg1: i32) -> (i32, i32) {
    %c0_i32 = arith.constant 0 : i32
    %c0_i32_0 = arith.constant 0 : i32
    %c0_i32_1 = arith.constant 0 : i32
    return %c0_i32, %c0_i32_0 : i32, i32
  }
  func.func @transform_13(%arg0: i32, %arg1: i32) -> (i32, i32) {
    %c0_i32 = arith.constant 0 : i32
    %c0_i32_0 = arith.constant 0 : i32
    %c0_i32_1 = arith.constant 0 : i32
    return %c0_i32, %c0_i32_0 : i32, i32
  }
  func.func @transform_14(%arg0: i32, %arg1: i32) -> (i32, i32) {
    %c0_i32 = arith.constant 0 : i32
    %c0_i32_0 = arith.constant 0 : i32
    %c0_i32_1 = arith.constant 0 : i32
    return %c0_i32, %c0_i32_0 : i32, i32
  }
  func.func @transform_15(%arg0: i32, %arg1: i32) -> (i32, i32) {
    %c0_i32 = arith.constant 0 : i32
    %c0_i32_0 = arith.constant 0 : i32
    %c0_i32_1 = arith.constant 0 : i32
    return %c0_i32, %c0_i32_0 : i32, i32
  }
  func.func @transform_16(%arg0: i32, %arg1: i32) -> (i32, i32) {
    %c0_i32 = arith.constant 0 : i32
    %c0_i32_0 = arith.constant 0 : i32
    %c0_i32_1 = arith.constant 0 : i32
    return %c0_i32, %c0_i32_0 : i32, i32
  }
  func.func @transform_17(%arg0: i32, %arg1: i32) -> (i32, i32, i32) {
    %c0_i32 = arith.constant 0 : i32
    %c0_i32_0 = arith.constant 0 : i32
    return %arg0, %arg1, %c0_i32 : i32, i32, i32
  }
}

module attributes {stable_mosaic.version = 11 : i64} {
  func.func @encoder_layer_kernel(%arg0: i32, %arg1: i32, %arg2: memref<1x32x128xf32, #tpu.memory_space<vmem>>, %arg3: memref<128x128xbf16, #tpu.memory_space<vmem>>, %arg4: memref<1x128xf32, #tpu.memory_space<vmem>>, %arg5: memref<128x128xbf16, #tpu.memory_space<vmem>>, %arg6: memref<1x128xf32, #tpu.memory_space<vmem>>, %arg7: memref<128x128xbf16, #tpu.memory_space<vmem>>, %arg8: memref<1x128xf32, #tpu.memory_space<vmem>>, %arg9: memref<128x128xbf16, #tpu.memory_space<vmem>>, %arg10: memref<1x128xf32, #tpu.memory_space<vmem>>, %arg11: memref<128x256xbf16, #tpu.memory_space<vmem>>, %arg12: memref<1x256xf32, #tpu.memory_space<vmem>>, %arg13: memref<256x128xbf16, #tpu.memory_space<vmem>>, %arg14: memref<1x128xf32, #tpu.memory_space<vmem>>, %arg15: memref<1x128xf32, #tpu.memory_space<vmem>>, %arg16: memref<1x128xf32, #tpu.memory_space<vmem>>, %arg17: memref<1x128xf32, #tpu.memory_space<vmem>>, %arg18: memref<1x128xf32, #tpu.memory_space<vmem>>, %arg19: memref<1x16x128xf32, #tpu.memory_space<vmem>>, %arg20: memref<32x128xbf16, #tpu.memory_space<vmem>>, %arg21: memref<4x32x32xbf16, #tpu.memory_space<vmem>>, %arg22: memref<4x32x32xbf16, #tpu.memory_space<vmem>>, %arg23: memref<16x128xbf16, #tpu.memory_space<vmem>>) attributes {dimension_semantics = [#tpu.dimension_semantics<parallel>, #tpu.dimension_semantics<arbitrary>], iteration_bounds = array<i64: 2, 2>, scalar_prefetch = 0 : i64, scratch_operands = 4 : i64, tpu.core_type = #tpu.core_type<tc>, window_params = [{transform_indices = @transform_0, window_bounds = array<i64: 1, 32, 128>}, {pipeline_mode = #tpu.pipeline_mode<synchronous>, transform_indices = @transform_1, window_bounds = array<i64: 128, 128>}, {pipeline_mode = #tpu.pipeline_mode<synchronous>, transform_indices = @transform_2, window_bounds = array<i64: 1, 128>}, {pipeline_mode = #tpu.pipeline_mode<synchronous>, transform_indices = @transform_3, window_bounds = array<i64: 128, 128>}, {pipeline_mode = #tpu.pipeline_mode<synchronous>, transform_indices = @transform_4, window_bounds = array<i64: 1, 128>}, {pipeline_mode = #tpu.pipeline_mode<synchronous>, transform_indices = @transform_5, window_bounds = array<i64: 128, 128>}, {pipeline_mode = #tpu.pipeline_mode<synchronous>, transform_indices = @transform_6, window_bounds = array<i64: 1, 128>}, {pipeline_mode = #tpu.pipeline_mode<synchronous>, transform_indices = @transform_7, window_bounds = array<i64: 128, 128>}, {pipeline_mode = #tpu.pipeline_mode<synchronous>, transform_indices = @transform_8, window_bounds = array<i64: 1, 128>}, {pipeline_mode = #tpu.pipeline_mode<synchronous>, transform_indices = @transform_9, window_bounds = array<i64: 128, 256>}, {pipeline_mode = #tpu.pipeline_mode<synchronous>, transform_indices = @transform_10, window_bounds = array<i64: 1, 256>}, {pipeline_mode = #tpu.pipeline_mode<synchronous>, transform_indices = @transform_11, window_bounds = array<i64: 256, 128>}, {pipeline_mode = #tpu.pipeline_mode<synchronous>, transform_indices = @transform_12, window_bounds = array<i64: 1, 128>}, {pipeline_mode = #tpu.pipeline_mode<synchronous>, transform_indices = @transform_13, window_bounds = array<i64: 1, 128>}, {pipeline_mode = #tpu.pipeline_mode<synchronous>, transform_indices = @transform_14, window_bounds = array<i64: 1, 128>}, {pipeline_mode = #tpu.pipeline_mode<synchronous>, transform_indices = @transform_15, window_bounds = array<i64: 1, 128>}, {pipeline_mode = #tpu.pipeline_mode<synchronous>, transform_indices = @transform_16, window_bounds = array<i64: 1, 128>}, {transform_indices = @transform_17, window_bounds = array<i64: 1, 16, 128>}]} {
    %c0 = arith.constant 0 : index
    %c0_0 = arith.constant 0 : index
    %0 = vector.load %arg15[%c0, %c0_0] : memref<1x128xf32, #tpu.memory_space<vmem>>, vector<1x128xf32>
    %1 = vector.shape_cast %0 : vector<1x128xf32> to vector<128xf32>
    %c0_1 = arith.constant 0 : index
    %c0_2 = arith.constant 0 : index
    %2 = vector.load %arg16[%c0_1, %c0_2] : memref<1x128xf32, #tpu.memory_space<vmem>>, vector<1x128xf32>
    %3 = vector.shape_cast %2 : vector<1x128xf32> to vector<128xf32>
    %c0_i32 = arith.constant 0 : i32
    %4 = arith.cmpi eq, %arg1, %c0_i32 : i32
    %5 = arith.extui %4 : i1 to i32
    %c0_i32_3 = arith.constant 0 : i32
    %6 = arith.cmpi ne, %5, %c0_i32_3 : i32
    scf.if %6 {
      %c0_84 = arith.constant 0 : index
      %c0_85 = arith.constant 0 : index
      %c0_86 = arith.constant 0 : index
      %163 = vector.load %arg2[%c0_84, %c0_85, %c0_86] : memref<1x32x128xf32, #tpu.memory_space<vmem>>, vector<1x32x128xf32>
      %164 = vector.shape_cast %163 : vector<1x32x128xf32> to vector<32x128xf32>
      %cst_87 = arith.constant dense<0.000000e+00> : vector<32xf32>
      %165 = vector.multi_reduction <add>, %164, %cst_87 [1] : vector<32x128xf32> to vector<32xf32>
      %166 = vector.shape_cast %165 : vector<32xf32> to vector<32x1xf32>
      %cst_88 = arith.constant 1.280000e+02 : f32
      %167 = vector.broadcast %cst_88 : f32 to vector<32x1xf32>
      %168 = arith.divf %166, %167 : vector<32x1xf32>
      %169 = vector.broadcast %168 : vector<32x1xf32> to vector<32x128xf32>
      %170 = arith.subf %164, %169 : vector<32x128xf32>
      %171 = arith.mulf %170, %170 : vector<32x128xf32>
      %cst_89 = arith.constant dense<0.000000e+00> : vector<32xf32>
      %172 = vector.multi_reduction <add>, %171, %cst_89 [1] : vector<32x128xf32> to vector<32xf32>
      %173 = vector.shape_cast %172 : vector<32xf32> to vector<32x1xf32>
      %cst_90 = arith.constant 1.280000e+02 : f32
      %174 = vector.broadcast %cst_90 : f32 to vector<32x1xf32>
      %175 = arith.divf %173, %174 : vector<32x1xf32>
      %176 = vector.broadcast %168 : vector<32x1xf32> to vector<32x128xf32>
      %177 = arith.subf %164, %176 : vector<32x128xf32>
      %cst_91 = arith.constant 9.99999974E-6 : f32
      %178 = vector.broadcast %cst_91 : f32 to vector<32x1xf32>
      %179 = arith.addf %175, %178 : vector<32x1xf32>
      %180 = math.rsqrt %179 : vector<32x1xf32>
      %181 = vector.broadcast %180 : vector<32x1xf32> to vector<32x128xf32>
      %182 = arith.mulf %177, %181 : vector<32x128xf32>
      %183 = vector.shape_cast %1 : vector<128xf32> to vector<1x128xf32>
      %184 = vector.broadcast %183 : vector<1x128xf32> to vector<32x128xf32>
      %185 = arith.mulf %182, %184 : vector<32x128xf32>
      %186 = vector.shape_cast %3 : vector<128xf32> to vector<1x128xf32>
      %187 = vector.broadcast %186 : vector<1x128xf32> to vector<32x128xf32>
      %188 = arith.addf %185, %187 : vector<32x128xf32>
      %189 = arith.truncf %188 : vector<32x128xf32> to vector<32x128xbf16>
      %c0_92 = arith.constant 0 : index
      %c0_93 = arith.constant 0 : index
      %190 = vector.load %arg20[%c0_92, %c0_93] : memref<32x128xbf16, #tpu.memory_space<vmem>>, vector<32x128xbf16>
      tpu.vector_store %arg20[%c0_92, %c0_93], %189 {strides = array<i32>} : memref<32x128xbf16, #tpu.memory_space<vmem>>, vector<32x128xbf16>,
      %c0_94 = arith.constant 0 : index
      %c0_95 = arith.constant 0 : index
      %191 = vector.load %arg5[%c0_94, %c0_95] : memref<128x128xbf16, #tpu.memory_space<vmem>>, vector<128x128xbf16>
      %cst_96 = arith.constant dense<0.000000e+00> : vector<32x128xf32>
      %192 = tpu.matmul %189, %191, %cst_96 {dimension_numbers = #tpu.dot_dimension_numbers<[1], [0], [0], [1], [0, 0, 1, 1], [], []>} : vector<32x128xbf16>, vector<128x128xbf16>, vector<32x128xf32> -> vector<32x128xf32>
      %c0_97 = arith.constant 0 : index
      %c0_98 = arith.constant 0 : index
      %193 = vector.load %arg6[%c0_97, %c0_98] : memref<1x128xf32, #tpu.memory_space<vmem>>, vector<1x128xf32>
      %194 = vector.shape_cast %193 : vector<1x128xf32> to vector<128xf32>
      %195 = vector.shape_cast %194 : vector<128xf32> to vector<1x128xf32>
      %196 = vector.broadcast %195 : vector<1x128xf32> to vector<32x128xf32>
      %197 = arith.addf %192, %196 : vector<32x128xf32>
      %c0_99 = arith.constant 0 : index
      %c0_100 = arith.constant 0 : index
      %198 = vector.load %arg7[%c0_99, %c0_100] : memref<128x128xbf16, #tpu.memory_space<vmem>>, vector<128x128xbf16>
      %cst_101 = arith.constant dense<0.000000e+00> : vector<32x128xf32>
      %199 = tpu.matmul %189, %198, %cst_101 {dimension_numbers = #tpu.dot_dimension_numbers<[1], [0], [0], [1], [0, 0, 1, 1], [], []>} : vector<32x128xbf16>, vector<128x128xbf16>, vector<32x128xf32> -> vector<32x128xf32>
      %c0_102 = arith.constant 0 : index
      %c0_103 = arith.constant 0 : index
      %200 = vector.load %arg8[%c0_102, %c0_103] : memref<1x128xf32, #tpu.memory_space<vmem>>, vector<1x128xf32>
      %201 = vector.shape_cast %200 : vector<1x128xf32> to vector<128xf32>
      %202 = vector.shape_cast %201 : vector<128xf32> to vector<1x128xf32>
      %203 = vector.broadcast %202 : vector<1x128xf32> to vector<32x128xf32>
      %204 = arith.addf %199, %203 : vector<32x128xf32>
      %205 = vector.extract_strided_slice %197 {offsets = [0, 0], sizes = [32, 32], strides = [1, 1]} : vector<32x128xf32> to vector<32x32xf32>
      %206 = arith.truncf %205 : vector<32x32xf32> to vector<32x32xbf16>
      %c0_104 = arith.constant 0 : index
      %c0_105 = arith.constant 0 : index
      %c0_106 = arith.constant 0 : index
      %207 = vector.load %arg21[%c0_104, %c0_105, %c0_106] : memref<4x32x32xbf16, #tpu.memory_space<vmem>>, vector<1x32x32xbf16>
      %208 = vector.shape_cast %207 : vector<1x32x32xbf16> to vector<32x32xbf16>
      %209 = vector.shape_cast %206 : vector<32x32xbf16> to vector<1x32x32xbf16>
      tpu.vector_store %arg21[%c0_104, %c0_105, %c0_106], %209 {strides = array<i32>} : memref<4x32x32xbf16, #tpu.memory_space<vmem>>, vector<1x32x32xbf16>,
      %210 = vector.extract_strided_slice %204 {offsets = [0, 0], sizes = [32, 32], strides = [1, 1]} : vector<32x128xf32> to vector<32x32xf32>
      %211 = arith.truncf %210 : vector<32x32xf32> to vector<32x32xbf16>
      %c0_107 = arith.constant 0 : index
      %c0_108 = arith.constant 0 : index
      %c0_109 = arith.constant 0 : index
      %212 = vector.load %arg22[%c0_107, %c0_108, %c0_109] : memref<4x32x32xbf16, #tpu.memory_space<vmem>>, vector<1x32x32xbf16>
      %213 = vector.shape_cast %212 : vector<1x32x32xbf16> to vector<32x32xbf16>
      %214 = vector.shape_cast %211 : vector<32x32xbf16> to vector<1x32x32xbf16>
      tpu.vector_store %arg22[%c0_107, %c0_108, %c0_109], %214 {strides = array<i32>} : memref<4x32x32xbf16, #tpu.memory_space<vmem>>, vector<1x32x32xbf16>,
      %215 = vector.extract_strided_slice %197 {offsets = [0, 32], sizes = [32, 32], strides = [1, 1]} : vector<32x128xf32> to vector<32x32xf32>
      %216 = arith.truncf %215 : vector<32x32xf32> to vector<32x32xbf16>
      %c1_110 = arith.constant 1 : index
      %c0_111 = arith.constant 0 : index
      %c0_112 = arith.constant 0 : index
      %217 = vector.load %arg21[%c1_110, %c0_111, %c0_112] : memref<4x32x32xbf16, #tpu.memory_space<vmem>>, vector<1x32x32xbf16>
      %218 = vector.shape_cast %217 : vector<1x32x32xbf16> to vector<32x32xbf16>
      %219 = vector.shape_cast %216 : vector<32x32xbf16> to vector<1x32x32xbf16>
      tpu.vector_store %arg21[%c1_110, %c0_111, %c0_112], %219 {strides = array<i32>} : memref<4x32x32xbf16, #tpu.memory_space<vmem>>, vector<1x32x32xbf16>,
      %220 = vector.extract_strided_slice %204 {offsets = [0, 32], sizes = [32, 32], strides = [1, 1]} : vector<32x128xf32> to vector<32x32xf32>
      %221 = arith.truncf %220 : vector<32x32xf32> to vector<32x32xbf16>
      %c1_113 = arith.constant 1 : index
      %c0_114 = arith.constant 0 : index
      %c0_115 = arith.constant 0 : index
      %222 = vector.load %arg22[%c1_113, %c0_114, %c0_115] : memref<4x32x32xbf16, #tpu.memory_space<vmem>>, vector<1x32x32xbf16>
      %223 = vector.shape_cast %222 : vector<1x32x32xbf16> to vector<32x32xbf16>
      %224 = vector.shape_cast %221 : vector<32x32xbf16> to vector<1x32x32xbf16>
      tpu.vector_store %arg22[%c1_113, %c0_114, %c0_115], %224 {strides = array<i32>} : memref<4x32x32xbf16, #tpu.memory_space<vmem>>, vector<1x32x32xbf16>,
      %225 = vector.extract_strided_slice %197 {offsets = [0, 64], sizes = [32, 32], strides = [1, 1]} : vector<32x128xf32> to vector<32x32xf32>
      %226 = arith.truncf %225 : vector<32x32xf32> to vector<32x32xbf16>
      %c2_116 = arith.constant 2 : index
      %c0_117 = arith.constant 0 : index
      %c0_118 = arith.constant 0 : index
      %227 = vector.load %arg21[%c2_116, %c0_117, %c0_118] : memref<4x32x32xbf16, #tpu.memory_space<vmem>>, vector<1x32x32xbf16>
      %228 = vector.shape_cast %227 : vector<1x32x32xbf16> to vector<32x32xbf16>
      %229 = vector.shape_cast %226 : vector<32x32xbf16> to vector<1x32x32xbf16>
      tpu.vector_store %arg21[%c2_116, %c0_117, %c0_118], %229 {strides = array<i32>} : memref<4x32x32xbf16, #tpu.memory_space<vmem>>, vector<1x32x32xbf16>,
      %230 = vector.extract_strided_slice %204 {offsets = [0, 64], sizes = [32, 32], strides = [1, 1]} : vector<32x128xf32> to vector<32x32xf32>
      %231 = arith.truncf %230 : vector<32x32xf32> to vector<32x32xbf16>
      %c2_119 = arith.constant 2 : index
      %c0_120 = arith.constant 0 : index
      %c0_121 = arith.constant 0 : index
      %232 = vector.load %arg22[%c2_119, %c0_120, %c0_121] : memref<4x32x32xbf16, #tpu.memory_space<vmem>>, vector<1x32x32xbf16>
      %233 = vector.shape_cast %232 : vector<1x32x32xbf16> to vector<32x32xbf16>
      %234 = vector.shape_cast %231 : vector<32x32xbf16> to vector<1x32x32xbf16>
      tpu.vector_store %arg22[%c2_119, %c0_120, %c0_121], %234 {strides = array<i32>} : memref<4x32x32xbf16, #tpu.memory_space<vmem>>, vector<1x32x32xbf16>,
      %235 = vector.extract_strided_slice %197 {offsets = [0, 96], sizes = [32, 32], strides = [1, 1]} : vector<32x128xf32> to vector<32x32xf32>
      %236 = arith.truncf %235 : vector<32x32xf32> to vector<32x32xbf16>
      %c3_122 = arith.constant 3 : index
      %c0_123 = arith.constant 0 : index
      %c0_124 = arith.constant 0 : index
      %237 = vector.load %arg21[%c3_122, %c0_123, %c0_124] : memref<4x32x32xbf16, #tpu.memory_space<vmem>>, vector<1x32x32xbf16>
      %238 = vector.shape_cast %237 : vector<1x32x32xbf16> to vector<32x32xbf16>
      %239 = vector.shape_cast %236 : vector<32x32xbf16> to vector<1x32x32xbf16>
      tpu.vector_store %arg21[%c3_122, %c0_123, %c0_124], %239 {strides = array<i32>} : memref<4x32x32xbf16, #tpu.memory_space<vmem>>, vector<1x32x32xbf16>,
      %240 = vector.extract_strided_slice %204 {offsets = [0, 96], sizes = [32, 32], strides = [1, 1]} : vector<32x128xf32> to vector<32x32xf32>
      %241 = arith.truncf %240 : vector<32x32xf32> to vector<32x32xbf16>
      %c3_125 = arith.constant 3 : index
      %c0_126 = arith.constant 0 : index
      %c0_127 = arith.constant 0 : index
      %242 = vector.load %arg22[%c3_125, %c0_126, %c0_127] : memref<4x32x32xbf16, #tpu.memory_space<vmem>>, vector<1x32x32xbf16>
      %243 = vector.shape_cast %242 : vector<1x32x32xbf16> to vector<32x32xbf16>
      %244 = vector.shape_cast %241 : vector<32x32xbf16> to vector<1x32x32xbf16>
      tpu.vector_store %arg22[%c3_125, %c0_126, %c0_127], %244 {strides = array<i32>} : memref<4x32x32xbf16, #tpu.memory_space<vmem>>, vector<1x32x32xbf16>,
    } else {
    }
    %c16_i32 = arith.constant 16 : i32
    %7 = arith.muli %arg1, %c16_i32 : i32
    %8 = tpu.assume_multiple %7, 16 : i32
    %c0_4 = arith.constant 0 : index
    %9 = arith.index_cast %8 : i32 to index
    %c0_5 = arith.constant 0 : index
    %10 = vector.load %arg2[%c0_4, %9, %c0_5] : memref<1x32x128xf32, #tpu.memory_space<vmem>>, vector<1x16x128xf32>
    %11 = vector.shape_cast %10 : vector<1x16x128xf32> to vector<16x128xf32>
    %12 = arith.index_cast %8 : i32 to index
    %c0_6 = arith.constant 0 : index
    %13 = vector.load %arg20[%12, %c0_6] : memref<32x128xbf16, #tpu.memory_space<vmem>>, vector<16x128xbf16>
    %c0_7 = arith.constant 0 : index
    %c0_8 = arith.constant 0 : index
    %14 = vector.load %arg3[%c0_7, %c0_8] : memref<128x128xbf16, #tpu.memory_space<vmem>>, vector<128x128xbf16>
    %cst = arith.constant dense<0.000000e+00> : vector<16x128xf32>
    %15 = tpu.matmul %13, %14, %cst {dimension_numbers = #tpu.dot_dimension_numbers<[1], [0], [0], [1], [0, 0, 1, 1], [], []>} : vector<16x128xbf16>, vector<128x128xbf16>, vector<16x128xf32> -> vector<16x128xf32>
    %c0_9 = arith.constant 0 : index
    %c0_10 = arith.constant 0 : index
    %16 = vector.load %arg4[%c0_9, %c0_10] : memref<1x128xf32, #tpu.memory_space<vmem>>, vector<1x128xf32>
    %17 = vector.shape_cast %16 : vector<1x128xf32> to vector<128xf32>
    %18 = vector.shape_cast %17 : vector<128xf32> to vector<1x128xf32>
    %19 = vector.broadcast %18 : vector<1x128xf32> to vector<16x128xf32>
    %20 = arith.addf %15, %19 : vector<16x128xf32>
    %cst_11 = arith.constant 0.176776692 : f32
    %21 = vector.broadcast %cst_11 : f32 to vector<16x128xf32>
    %22 = arith.mulf %20, %21 : vector<16x128xf32>
    %23 = arith.truncf %22 : vector<16x128xf32> to vector<16x128xbf16>
    %24 = vector.extract_strided_slice %23 {offsets = [0, 0], sizes = [16, 32], strides = [1, 1]} : vector<16x128xbf16> to vector<16x32xbf16>
    %c0_12 = arith.constant 0 : index
    %c0_13 = arith.constant 0 : index
    %c0_14 = arith.constant 0 : index
    %25 = vector.load %arg21[%c0_12, %c0_13, %c0_14] : memref<4x32x32xbf16, #tpu.memory_space<vmem>>, vector<1x32x32xbf16>
    %26 = vector.shape_cast %25 : vector<1x32x32xbf16> to vector<32x32xbf16>
    %cst_15 = arith.constant dense<0.000000e+00> : vector<16x32xf32>
    %27 = tpu.matmul %24, %26, %cst_15 {dimension_numbers = #tpu.dot_dimension_numbers<[1], [1], [0], [0], [0, 0, 1, 0], [], []>} : vector<16x32xbf16>, vector<32x32xbf16>, vector<16x32xf32> -> vector<16x32xf32>
    %cst_16 = arith.constant dense<0xFF800000> : vector<16xf32>
    %28 = vector.multi_reduction <maximumf>, %27, %cst_16 [1] : vector<16x32xf32> to vector<16xf32>
    %29 = vector.shape_cast %28 : vector<16xf32> to vector<16x1xf32>
    %30 = vector.broadcast %29 : vector<16x1xf32> to vector<16x32xf32>
    %31 = arith.subf %27, %30 : vector<16x32xf32>
    %32 = math.exp %31 : vector<16x32xf32>
    %cst_17 = arith.constant dense<0.000000e+00> : vector<16xf32>
    %33 = vector.multi_reduction <add>, %32, %cst_17 [1] : vector<16x32xf32> to vector<16xf32>
    %34 = vector.shape_cast %33 : vector<16xf32> to vector<16x1xf32>
    %35 = tpu.reciprocal %34 {approx = true} : vector<16x1xf32> -> vector<16x1xf32>
    %36 = vector.broadcast %35 : vector<16x1xf32> to vector<16x32xf32>
    %37 = arith.mulf %32, %36 : vector<16x32xf32>
    %38 = arith.truncf %37 : vector<16x32xf32> to vector<16x32xbf16>
    %c0_18 = arith.constant 0 : index
    %c0_19 = arith.constant 0 : index
    %c0_20 = arith.constant 0 : index
    %39 = vector.load %arg22[%c0_18, %c0_19, %c0_20] : memref<4x32x32xbf16, #tpu.memory_space<vmem>>, vector<1x32x32xbf16>
    %40 = vector.shape_cast %39 : vector<1x32x32xbf16> to vector<32x32xbf16>
    %cst_21 = arith.constant dense<0.000000e+00> : vector<16x32xf32>
    %41 = tpu.matmul %38, %40, %cst_21 {dimension_numbers = #tpu.dot_dimension_numbers<[1], [0], [0], [1], [0, 0, 1, 1], [], []>} : vector<16x32xbf16>, vector<32x32xbf16>, vector<16x32xf32> -> vector<16x32xf32>
    %42 = arith.truncf %41 : vector<16x32xf32> to vector<16x32xbf16>
    %c0_22 = arith.constant 0 : index
    %c0_23 = arith.constant 0 : index
    %43 = vector.load %arg23[%c0_22, %c0_23] : memref<16x128xbf16, #tpu.memory_space<vmem>>, vector<16x32xbf16>
    tpu.vector_store %arg23[%c0_22, %c0_23], %42 {strides = array<i32>} : memref<16x128xbf16, #tpu.memory_space<vmem>>, vector<16x32xbf16>,
    %44 = vector.extract_strided_slice %23 {offsets = [0, 32], sizes = [16, 32], strides = [1, 1]} : vector<16x128xbf16> to vector<16x32xbf16>
    %c1 = arith.constant 1 : index
    %c0_24 = arith.constant 0 : index
    %c0_25 = arith.constant 0 : index
    %45 = vector.load %arg21[%c1, %c0_24, %c0_25] : memref<4x32x32xbf16, #tpu.memory_space<vmem>>, vector<1x32x32xbf16>
    %46 = vector.shape_cast %45 : vector<1x32x32xbf16> to vector<32x32xbf16>
    %cst_26 = arith.constant dense<0.000000e+00> : vector<16x32xf32>
    %47 = tpu.matmul %44, %46, %cst_26 {dimension_numbers = #tpu.dot_dimension_numbers<[1], [1], [0], [0], [0, 0, 1, 0], [], []>} : vector<16x32xbf16>, vector<32x32xbf16>, vector<16x32xf32> -> vector<16x32xf32>
    %cst_27 = arith.constant dense<0xFF800000> : vector<16xf32>
    %48 = vector.multi_reduction <maximumf>, %47, %cst_27 [1] : vector<16x32xf32> to vector<16xf32>
    %49 = vector.shape_cast %48 : vector<16xf32> to vector<16x1xf32>
    %50 = vector.broadcast %49 : vector<16x1xf32> to vector<16x32xf32>
    %51 = arith.subf %47, %50 : vector<16x32xf32>
    %52 = math.exp %51 : vector<16x32xf32>
    %cst_28 = arith.constant dense<0.000000e+00> : vector<16xf32>
    %53 = vector.multi_reduction <add>, %52, %cst_28 [1] : vector<16x32xf32> to vector<16xf32>
    %54 = vector.shape_cast %53 : vector<16xf32> to vector<16x1xf32>
    %55 = tpu.reciprocal %54 {approx = true} : vector<16x1xf32> -> vector<16x1xf32>
    %56 = vector.broadcast %55 : vector<16x1xf32> to vector<16x32xf32>
    %57 = arith.mulf %52, %56 : vector<16x32xf32>
    %58 = arith.truncf %57 : vector<16x32xf32> to vector<16x32xbf16>
    %c1_29 = arith.constant 1 : index
    %c0_30 = arith.constant 0 : index
    %c0_31 = arith.constant 0 : index
    %59 = vector.load %arg22[%c1_29, %c0_30, %c0_31] : memref<4x32x32xbf16, #tpu.memory_space<vmem>>, vector<1x32x32xbf16>
    %60 = vector.shape_cast %59 : vector<1x32x32xbf16> to vector<32x32xbf16>
    %cst_32 = arith.constant dense<0.000000e+00> : vector<16x32xf32>
    %61 = tpu.matmul %58, %60, %cst_32 {dimension_numbers = #tpu.dot_dimension_numbers<[1], [0], [0], [1], [0, 0, 1, 1], [], []>} : vector<16x32xbf16>, vector<32x32xbf16>, vector<16x32xf32> -> vector<16x32xf32>
    %62 = arith.truncf %61 : vector<16x32xf32> to vector<16x32xbf16>
    %c0_33 = arith.constant 0 : index
    %c32 = arith.constant 32 : index
    %63 = vector.load %arg23[%c0_33, %c32] : memref<16x128xbf16, #tpu.memory_space<vmem>>, vector<16x32xbf16>
    tpu.vector_store %arg23[%c0_33, %c32], %62 {strides = array<i32>} : memref<16x128xbf16, #tpu.memory_space<vmem>>, vector<16x32xbf16>,
    %64 = vector.extract_strided_slice %23 {offsets = [0, 64], sizes = [16, 32], strides = [1, 1]} : vector<16x128xbf16> to vector<16x32xbf16>
    %c2 = arith.constant 2 : index
    %c0_34 = arith.constant 0 : index
    %c0_35 = arith.constant 0 : index
    %65 = vector.load %arg21[%c2, %c0_34, %c0_35] : memref<4x32x32xbf16, #tpu.memory_space<vmem>>, vector<1x32x32xbf16>
    %66 = vector.shape_cast %65 : vector<1x32x32xbf16> to vector<32x32xbf16>
    %cst_36 = arith.constant dense<0.000000e+00> : vector<16x32xf32>
    %67 = tpu.matmul %64, %66, %cst_36 {dimension_numbers = #tpu.dot_dimension_numbers<[1], [1], [0], [0], [0, 0, 1, 0], [], []>} : vector<16x32xbf16>, vector<32x32xbf16>, vector<16x32xf32> -> vector<16x32xf32>
    %cst_37 = arith.constant dense<0xFF800000> : vector<16xf32>
    %68 = vector.multi_reduction <maximumf>, %67, %cst_37 [1] : vector<16x32xf32> to vector<16xf32>
    %69 = vector.shape_cast %68 : vector<16xf32> to vector<16x1xf32>
    %70 = vector.broadcast %69 : vector<16x1xf32> to vector<16x32xf32>
    %71 = arith.subf %67, %70 : vector<16x32xf32>
    %72 = math.exp %71 : vector<16x32xf32>
    %cst_38 = arith.constant dense<0.000000e+00> : vector<16xf32>
    %73 = vector.multi_reduction <add>, %72, %cst_38 [1] : vector<16x32xf32> to vector<16xf32>
    %74 = vector.shape_cast %73 : vector<16xf32> to vector<16x1xf32>
    %75 = tpu.reciprocal %74 {approx = true} : vector<16x1xf32> -> vector<16x1xf32>
    %76 = vector.broadcast %75 : vector<16x1xf32> to vector<16x32xf32>
    %77 = arith.mulf %72, %76 : vector<16x32xf32>
    %78 = arith.truncf %77 : vector<16x32xf32> to vector<16x32xbf16>
    %c2_39 = arith.constant 2 : index
    %c0_40 = arith.constant 0 : index
    %c0_41 = arith.constant 0 : index
    %79 = vector.load %arg22[%c2_39, %c0_40, %c0_41] : memref<4x32x32xbf16, #tpu.memory_space<vmem>>, vector<1x32x32xbf16>
    %80 = vector.shape_cast %79 : vector<1x32x32xbf16> to vector<32x32xbf16>
    %cst_42 = arith.constant dense<0.000000e+00> : vector<16x32xf32>
    %81 = tpu.matmul %78, %80, %cst_42 {dimension_numbers = #tpu.dot_dimension_numbers<[1], [0], [0], [1], [0, 0, 1, 1], [], []>} : vector<16x32xbf16>, vector<32x32xbf16>, vector<16x32xf32> -> vector<16x32xf32>
    %82 = arith.truncf %81 : vector<16x32xf32> to vector<16x32xbf16>
    %c0_43 = arith.constant 0 : index
    %c64 = arith.constant 64 : index
    %83 = vector.load %arg23[%c0_43, %c64] : memref<16x128xbf16, #tpu.memory_space<vmem>>, vector<16x32xbf16>
    tpu.vector_store %arg23[%c0_43, %c64], %82 {strides = array<i32>} : memref<16x128xbf16, #tpu.memory_space<vmem>>, vector<16x32xbf16>,
    %84 = vector.extract_strided_slice %23 {offsets = [0, 96], sizes = [16, 32], strides = [1, 1]} : vector<16x128xbf16> to vector<16x32xbf16>
    %c3 = arith.constant 3 : index
    %c0_44 = arith.constant 0 : index
    %c0_45 = arith.constant 0 : index
    %85 = vector.load %arg21[%c3, %c0_44, %c0_45] : memref<4x32x32xbf16, #tpu.memory_space<vmem>>, vector<1x32x32xbf16>
    %86 = vector.shape_cast %85 : vector<1x32x32xbf16> to vector<32x32xbf16>
    %cst_46 = arith.constant dense<0.000000e+00> : vector<16x32xf32>
    %87 = tpu.matmul %84, %86, %cst_46 {dimension_numbers = #tpu.dot_dimension_numbers<[1], [1], [0], [0], [0, 0, 1, 0], [], []>} : vector<16x32xbf16>, vector<32x32xbf16>, vector<16x32xf32> -> vector<16x32xf32>
    %cst_47 = arith.constant dense<0xFF800000> : vector<16xf32>
    %88 = vector.multi_reduction <maximumf>, %87, %cst_47 [1] : vector<16x32xf32> to vector<16xf32>
    %89 = vector.shape_cast %88 : vector<16xf32> to vector<16x1xf32>
    %90 = vector.broadcast %89 : vector<16x1xf32> to vector<16x32xf32>
    %91 = arith.subf %87, %90 : vector<16x32xf32>
    %92 = math.exp %91 : vector<16x32xf32>
    %cst_48 = arith.constant dense<0.000000e+00> : vector<16xf32>
    %93 = vector.multi_reduction <add>, %92, %cst_48 [1] : vector<16x32xf32> to vector<16xf32>
    %94 = vector.shape_cast %93 : vector<16xf32> to vector<16x1xf32>
    %95 = tpu.reciprocal %94 {approx = true} : vector<16x1xf32> -> vector<16x1xf32>
    %96 = vector.broadcast %95 : vector<16x1xf32> to vector<16x32xf32>
    %97 = arith.mulf %92, %96 : vector<16x32xf32>
    %98 = arith.truncf %97 : vector<16x32xf32> to vector<16x32xbf16>
    %c3_49 = arith.constant 3 : index
    %c0_50 = arith.constant 0 : index
    %c0_51 = arith.constant 0 : index
    %99 = vector.load %arg22[%c3_49, %c0_50, %c0_51] : memref<4x32x32xbf16, #tpu.memory_space<vmem>>, vector<1x32x32xbf16>
    %100 = vector.shape_cast %99 : vector<1x32x32xbf16> to vector<32x32xbf16>
    %cst_52 = arith.constant dense<0.000000e+00> : vector<16x32xf32>
    %101 = tpu.matmul %98, %100, %cst_52 {dimension_numbers = #tpu.dot_dimension_numbers<[1], [0], [0], [1], [0, 0, 1, 1], [], []>} : vector<16x32xbf16>, vector<32x32xbf16>, vector<16x32xf32> -> vector<16x32xf32>
    %102 = arith.truncf %101 : vector<16x32xf32> to vector<16x32xbf16>
    %c0_53 = arith.constant 0 : index
    %c96 = arith.constant 96 : index
    %103 = vector.load %arg23[%c0_53, %c96] : memref<16x128xbf16, #tpu.memory_space<vmem>>, vector<16x32xbf16>
    tpu.vector_store %arg23[%c0_53, %c96], %102 {strides = array<i32>} : memref<16x128xbf16, #tpu.memory_space<vmem>>, vector<16x32xbf16>,
    %c0_54 = arith.constant 0 : index
    %c0_55 = arith.constant 0 : index
    %104 = vector.load %arg23[%c0_54, %c0_55] : memref<16x128xbf16, #tpu.memory_space<vmem>>, vector<16x128xbf16>
    %c0_56 = arith.constant 0 : index
    %c0_57 = arith.constant 0 : index
    %105 = vector.load %arg9[%c0_56, %c0_57] : memref<128x128xbf16, #tpu.memory_space<vmem>>, vector<128x128xbf16>
    %cst_58 = arith.constant dense<0.000000e+00> : vector<16x128xf32>
    %106 = tpu.matmul %104, %105, %cst_58 {dimension_numbers = #tpu.dot_dimension_numbers<[1], [0], [0], [1], [0, 0, 1, 1], [], []>} : vector<16x128xbf16>, vector<128x128xbf16>, vector<16x128xf32> -> vector<16x128xf32>
    %c0_59 = arith.constant 0 : index
    %c0_60 = arith.constant 0 : index
    %107 = vector.load %arg10[%c0_59, %c0_60] : memref<1x128xf32, #tpu.memory_space<vmem>>, vector<1x128xf32>
    %108 = vector.shape_cast %107 : vector<1x128xf32> to vector<128xf32>
    %109 = vector.shape_cast %108 : vector<128xf32> to vector<1x128xf32>
    %110 = vector.broadcast %109 : vector<1x128xf32> to vector<16x128xf32>
    %111 = arith.addf %106, %110 : vector<16x128xf32>
    %112 = arith.addf %11, %111 : vector<16x128xf32>
    %c0_61 = arith.constant 0 : index
    %c0_62 = arith.constant 0 : index
    %113 = vector.load %arg17[%c0_61, %c0_62] : memref<1x128xf32, #tpu.memory_space<vmem>>, vector<1x128xf32>
    %114 = vector.shape_cast %113 : vector<1x128xf32> to vector<128xf32>
    %c0_63 = arith.constant 0 : index
    %c0_64 = arith.constant 0 : index
    %115 = vector.load %arg18[%c0_63, %c0_64] : memref<1x128xf32, #tpu.memory_space<vmem>>, vector<1x128xf32>
    %116 = vector.shape_cast %115 : vector<1x128xf32> to vector<128xf32>
    %cst_65 = arith.constant dense<0.000000e+00> : vector<16xf32>
    %117 = vector.multi_reduction <add>, %112, %cst_65 [1] : vector<16x128xf32> to vector<16xf32>
    %118 = vector.shape_cast %117 : vector<16xf32> to vector<16x1xf32>
    %cst_66 = arith.constant 1.280000e+02 : f32
    %119 = vector.broadcast %cst_66 : f32 to vector<16x1xf32>
    %120 = arith.divf %118, %119 : vector<16x1xf32>
    %121 = vector.broadcast %120 : vector<16x1xf32> to vector<16x128xf32>
    %122 = arith.subf %112, %121 : vector<16x128xf32>
    %123 = arith.mulf %122, %122 : vector<16x128xf32>
    %cst_67 = arith.constant dense<0.000000e+00> : vector<16xf32>
    %124 = vector.multi_reduction <add>, %123, %cst_67 [1] : vector<16x128xf32> to vector<16xf32>
    %125 = vector.shape_cast %124 : vector<16xf32> to vector<16x1xf32>
    %cst_68 = arith.constant 1.280000e+02 : f32
    %126 = vector.broadcast %cst_68 : f32 to vector<16x1xf32>
    %127 = arith.divf %125, %126 : vector<16x1xf32>
    %128 = vector.broadcast %120 : vector<16x1xf32> to vector<16x128xf32>
    %129 = arith.subf %112, %128 : vector<16x128xf32>
    %cst_69 = arith.constant 9.99999974E-6 : f32
    %130 = vector.broadcast %cst_69 : f32 to vector<16x1xf32>
    %131 = arith.addf %127, %130 : vector<16x1xf32>
    %132 = math.rsqrt %131 : vector<16x1xf32>
    %133 = vector.broadcast %132 : vector<16x1xf32> to vector<16x128xf32>
    %134 = arith.mulf %129, %133 : vector<16x128xf32>
    %135 = vector.shape_cast %114 : vector<128xf32> to vector<1x128xf32>
    %136 = vector.broadcast %135 : vector<1x128xf32> to vector<16x128xf32>
    %137 = arith.mulf %134, %136 : vector<16x128xf32>
    %138 = vector.shape_cast %116 : vector<128xf32> to vector<1x128xf32>
    %139 = vector.broadcast %138 : vector<1x128xf32> to vector<16x128xf32>
    %140 = arith.addf %137, %139 : vector<16x128xf32>
    %141 = arith.truncf %140 : vector<16x128xf32> to vector<16x128xbf16>
    %c0_70 = arith.constant 0 : index
    %c0_71 = arith.constant 0 : index
    %142 = vector.load %arg11[%c0_70, %c0_71] : memref<128x256xbf16, #tpu.memory_space<vmem>>, vector<128x256xbf16>
    %cst_72 = arith.constant dense<0.000000e+00> : vector<16x256xf32>
    %143 = tpu.matmul %141, %142, %cst_72 {dimension_numbers = #tpu.dot_dimension_numbers<[1], [0], [0], [1], [0, 0, 1, 1], [], []>} : vector<16x128xbf16>, vector<128x256xbf16>, vector<16x256xf32> -> vector<16x256xf32>
    %c0_73 = arith.constant 0 : index
    %c0_74 = arith.constant 0 : index
    %144 = vector.load %arg12[%c0_73, %c0_74] : memref<1x256xf32, #tpu.memory_space<vmem>>, vector<1x256xf32>
    %145 = vector.shape_cast %144 : vector<1x256xf32> to vector<256xf32>
    %146 = vector.shape_cast %145 : vector<256xf32> to vector<1x256xf32>
    %147 = vector.broadcast %146 : vector<1x256xf32> to vector<16x256xf32>
    %148 = arith.addf %143, %147 : vector<16x256xf32>
    %cst_75 = arith.constant 0.000000e+00 : f32
    %149 = vector.broadcast %cst_75 : f32 to vector<16x256xf32>
    %150 = arith.maximumf %148, %149 : vector<16x256xf32>
    %151 = arith.truncf %150 : vector<16x256xf32> to vector<16x256xbf16>
    %c0_76 = arith.constant 0 : index
    %c0_77 = arith.constant 0 : index
    %152 = vector.load %arg13[%c0_76, %c0_77] : memref<256x128xbf16, #tpu.memory_space<vmem>>, vector<256x128xbf16>
    %cst_78 = arith.constant dense<0.000000e+00> : vector<16x128xf32>
    %153 = tpu.matmul %151, %152, %cst_78 {dimension_numbers = #tpu.dot_dimension_numbers<[1], [0], [0], [1], [0, 0, 1, 1], [], []>} : vector<16x256xbf16>, vector<256x128xbf16>, vector<16x128xf32> -> vector<16x128xf32>
    %c0_79 = arith.constant 0 : index
    %c0_80 = arith.constant 0 : index
    %154 = vector.load %arg14[%c0_79, %c0_80] : memref<1x128xf32, #tpu.memory_space<vmem>>, vector<1x128xf32>
    %155 = vector.shape_cast %154 : vector<1x128xf32> to vector<128xf32>
    %156 = vector.shape_cast %155 : vector<128xf32> to vector<1x128xf32>
    %157 = vector.broadcast %156 : vector<1x128xf32> to vector<16x128xf32>
    %158 = arith.addf %153, %157 : vector<16x128xf32>
    %159 = arith.addf %112, %158 : vector<16x128xf32>
    %c0_81 = arith.constant 0 : index
    %c0_82 = arith.constant 0 : index
    %c0_83 = arith.constant 0 : index
    %160 = vector.load %arg19[%c0_81, %c0_82, %c0_83] : memref<1x16x128xf32, #tpu.memory_space<vmem>>, vector<1x16x128xf32>
    %161 = vector.shape_cast %160 : vector<1x16x128xf32> to vector<16x128xf32>
    %162 = vector.shape_cast %159 : vector<16x128xf32> to vector<1x16x128xf32>
    tpu.vector_store %arg19[%c0_81, %c0_82, %c0_83], %162 {strides = array<i32>} : memref<1x16x128xf32, #tpu.memory_space<vmem>>, vector<1x16x128xf32>,
    return
  }
  func.func @transform_0(%arg0: i32, %arg1: i32) -> (i32, i32, i32) {
    %c0_i32 = arith.constant 0 : i32
    %c0_i32_0 = arith.constant 0 : i32
    %c0_i32_1 = arith.constant 0 : i32
    return %arg0, %c0_i32, %c0_i32_0 : i32, i32, i32
  }
  func.func @transform_1(%arg0: i32, %arg1: i32) -> (i32, i32) {
    %c0_i32 = arith.constant 0 : i32
    %c0_i32_0 = arith.constant 0 : i32
    %c0_i32_1 = arith.constant 0 : i32
    return %c0_i32, %c0_i32_0 : i32, i32
  }
  func.func @transform_2(%arg0: i32, %arg1: i32) -> (i32, i32) {
    %c0_i32 = arith.constant 0 : i32
    %c0_i32_0 = arith.constant 0 : i32
    %c0_i32_1 = arith.constant 0 : i32
    return %c0_i32, %c0_i32_0 : i32, i32
  }
  func.func @transform_3(%arg0: i32, %arg1: i32) -> (i32, i32) {
    %c0_i32 = arith.constant 0 : i32
    %c0_i32_0 = arith.constant 0 : i32
    %c0_i32_1 = arith.constant 0 : i32
    return %c0_i32, %c0_i32_0 : i32, i32
  }
  func.func @transform_4(%arg0: i32, %arg1: i32) -> (i32, i32) {
    %c0_i32 = arith.constant 0 : i32
    %c0_i32_0 = arith.constant 0 : i32
    %c0_i32_1 = arith.constant 0 : i32
    return %c0_i32, %c0_i32_0 : i32, i32
  }
  func.func @transform_5(%arg0: i32, %arg1: i32) -> (i32, i32) {
    %c0_i32 = arith.constant 0 : i32
    %c0_i32_0 = arith.constant 0 : i32
    %c0_i32_1 = arith.constant 0 : i32
    return %c0_i32, %c0_i32_0 : i32, i32
  }
  func.func @transform_6(%arg0: i32, %arg1: i32) -> (i32, i32) {
    %c0_i32 = arith.constant 0 : i32
    %c0_i32_0 = arith.constant 0 : i32
    %c0_i32_1 = arith.constant 0 : i32
    return %c0_i32, %c0_i32_0 : i32, i32
  }
  func.func @transform_7(%arg0: i32, %arg1: i32) -> (i32, i32) {
    %c0_i32 = arith.constant 0 : i32
    %c0_i32_0 = arith.constant 0 : i32
    %c0_i32_1 = arith.constant 0 : i32
    return %c0_i32, %c0_i32_0 : i32, i32
  }
  func.func @transform_8(%arg0: i32, %arg1: i32) -> (i32, i32) {
    %c0_i32 = arith.constant 0 : i32
    %c0_i32_0 = arith.constant 0 : i32
    %c0_i32_1 = arith.constant 0 : i32
    return %c0_i32, %c0_i32_0 : i32, i32
  }
  func.func @transform_9(%arg0: i32, %arg1: i32) -> (i32, i32) {
    %c0_i32 = arith.constant 0 : i32
    %c0_i32_0 = arith.constant 0 : i32
    %c0_i32_1 = arith.constant 0 : i32
    return %c0_i32, %c0_i32_0 : i32, i32
  }
  func.func @transform_10(%arg0: i32, %arg1: i32) -> (i32, i32) {
    %c0_i32 = arith.constant 0 : i32
    %c0_i32_0 = arith.constant 0 : i32
    %c0_i32_1 = arith.constant 0 : i32
    return %c0_i32, %c0_i32_0 : i32, i32
  }
  func.func @transform_11(%arg0: i32, %arg1: i32) -> (i32, i32) {
    %c0_i32 = arith.constant 0 : i32
    %c0_i32_0 = arith.constant 0 : i32
    %c0_i32_1 = arith.constant 0 : i32
    return %c0_i32, %c0_i32_0 : i32, i32
  }
  func.func @transform_12(%arg0: i32, %arg1: i32) -> (i32, i32) {
    %c0_i32 = arith.constant 0 : i32
    %c0_i32_0 = arith.constant 0 : i32
    %c0_i32_1 = arith.constant 0 : i32
    return %c0_i32, %c0_i32_0 : i32, i32
  }
  func.func @transform_13(%arg0: i32, %arg1: i32) -> (i32, i32) {
    %c0_i32 = arith.constant 0 : i32
    %c0_i32_0 = arith.constant 0 : i32
    %c0_i32_1 = arith.constant 0 : i32
    return %c0_i32, %c0_i32_0 : i32, i32
  }
  func.func @transform_14(%arg0: i32, %arg1: i32) -> (i32, i32) {
    %c0_i32 = arith.constant 0 : i32
    %c0_i32_0 = arith.constant 0 : i32
    %c0_i32_1 = arith.constant 0 : i32
    return %c0_i32, %c0_i32_0 : i32, i32
  }
  func.func @transform_15(%arg0: i32, %arg1: i32) -> (i32, i32) {
    %c0_i32 = arith.constant 0 : i32
    %c0_i32_0 = arith.constant 0 : i32
    %c0_i32_1 = arith.constant 0 : i32
    return %c0_i32, %c0_i32_0 : i32, i32
  }
  func.func @transform_16(%arg0: i32, %arg1: i32) -> (i32, i32) {
    %c0_i32 = arith.constant 0 : i32
    %c0_i32_0 = arith.constant 0 : i32
    %c0_i32_1 = arith.constant 0 : i32
    return %c0_i32, %c0_i32_0 : i32, i32
  }
  func.func @transform_17(%arg0: i32, %arg1: i32) -> (i32, i32, i32) {
    %c0_i32 = arith.constant 0 : i32
    %c0_i32_0 = arith.constant 0 : i32
    return %arg0, %arg1, %c0_i32 : i32, i32, i32
  }
}

</mosaic_0001>

<bundles_post_ra>
// kernel: tpu_custom_call.1
= control target key start
LH: loop header
LB: loop body
LE: loop exit
PB: predicated region body
PF: predicated region fallthrough
CT: control target
= control target key end

     0   :  { %s4099_s0 = inlined_call_operand.hbm [shape: f32[2,32,128], index: 0, kind: input, shape index: {}]   ;;  %s4100_s1 = inlined_call_operand.hbm [shape: bf16[128,128], index: 1, kind: input, shape index: {}]   ;;  %s4101_s2 = inlined_call_operand.vmem [shape: f32[1,128], index: 2, kind: input, shape index: {}]   ;;  %s4102_s3 = inlined_call_operand.hbm [shape: bf16[128,128], index: 3, kind: input, shape index: {}]   ;;  %s4103_s4 = inlined_call_operand.vmem [shape: f32[1,128], index: 4, kind: input, shape index: {}]   ;;  %s4104_s5 = inlined_call_operand.hbm [shape: bf16[128,128], index: 5, kind: input, shape index: {}]   ;;  %s4105_s6 = inlined_call_operand.vmem [shape: f32[1,128], index: 6, kind: input, shape index: {}]   ;;  %s4106_s7 = inlined_call_operand.hbm [shape: bf16[128,128], index: 7, kind: input, shape index: {}]   ;;  %s4107_s8 = inlined_call_operand.vmem [shape: f32[1,128], index: 8, kind: input, shape index: {}]   ;;  %s4108_s9 = inlined_call_operand.hbm [shape: bf16[128,256], index: 9, kind: input, shape index: {}]   ;;  %s4109_s10 = inlined_call_operand.vmem [shape: f32[1,256], index: 10, kind: input, shape index: {}]   ;;  %s4110_s11 = inlined_call_operand.hbm [shape: bf16[256,128], index: 11, kind: input, shape index: {}]   ;;  %s4111_s12 = inlined_call_operand.vmem [shape: f32[1,128], index: 12, kind: input, shape index: {}]   ;;  %s4112_s13 = inlined_call_operand.vmem [shape: f32[1,128], index: 13, kind: input, shape index: {}]   ;;  %s4113_s14 = inlined_call_operand.vmem [shape: f32[1,128], index: 14, kind: input, shape index: {}]   ;;  %s4114_s15 = inlined_call_operand.vmem [shape: f32[1,128], index: 15, kind: input, shape index: {}]   ;;  %s4115_s16 = inlined_call_operand.vmem [shape: f32[1,128], index: 16, kind: input, shape index: {}]   ;;  %s4116_s17 = inlined_call_operand.hbm [shape: f32[2,32,128], index: 17, kind: output, shape index: {}]  }
   0x1   :  { %4135 = sst [smem:[#allocation29_spill]] %s4099_s0 }
   0x2   :  { %4136 = sst [smem:[#allocation30_spill]] %s4100_s1 }
   0x3   :  { %4137 = sst [smem:[#allocation31_spill]] %s4101_s2 }
   0x4   :  { %4138 = sst [smem:[#allocation32_spill]] %s4102_s3 }
   0x5   :  { %4139 = sst [smem:[#allocation33_spill]] %s4103_s4 }
   0x6   :  { %4140 = sst [smem:[#allocation34_spill]] %s4105_s6 }
   0x7   :  { %4141 = sst [smem:[#allocation35_spill]] %s4107_s8 }
   0x8   :  { %4142 = sst [smem:[#allocation36_spill]] %s4109_s10 }
   0x9   :  { %4143 = sst [smem:[#allocation37_spill]] %s4111_s12 }
   0xa   :  { %4144 = sst [smem:[#allocation38_spill]] %s4112_s13 }
   0xb   :  { %4145 = sst [smem:[#allocation39_spill]] %s4113_s14 }
   0xc   :  { %4146 = sst [smem:[#allocation40_spill]] %s4114_s15 }
   0xd   :  { %4147 = sst [smem:[#allocation41_spill]] %s4115_s16 }
   0xe   :  { %4148 = sst [smem:[#allocation42_spill]] %s4116_s17 }
   0xf   :  { %22 = vsyncpa [#allocation7], 0 }
  0x10   :  { %24 = vsyncpa [#allocation7 + $0x1], 0 }
  0x11   :  { %25 = vsyncpa [#allocation10], 0 }
  0x12   :  { %26 = vsyncpa [#allocation13], 0 }
  0x13   :  { %27 = vsyncpa [#allocation16], 0 }
  0x14   :  { %28 = vsyncpa [#allocation8], 0 }
  0x15   :  { %30 = vsyncpa [#allocation8 + $0x1], 0  ;;  %s3441_s24 = smov 0   ;;  %s3443_s25 = smov 0  }
  0x16   :  { %s3445_s26 = smov 0   ;;  %s3447_s27 = smov 0  }
  0x17   :  { %s3449_s28 = smov 0   ;;  %s3451_s29 = smov 0  }
  0x18   :  { %s3453_s0 = smov 0   ;;  %s3455_s30 = smov 0  }
  0x19   :  { %s3457_s18 = smov 0   ;;  %s3459_s19 = smov 0  }
  0x1a   :  { %s3461_s1 = smov 0  }
  0x1b LB: > { %4149 = sst [smem:[#allocation24_spill]] %s3286_s24  ;;  %s2359_s20 = sadd.s32 4294967295, %s3326_s1   ;;  %s3326_s1 = sphi %s3461_s1, %s36_s1   ;;  %s3322_s19 = sphi %s3459_s19, %s4207_s19   ;;  %s3318_s18 = sphi %s3457_s18, %s4206_s18   ;;  %s3314_s30 = sphi %s3455_s30, %s4205_s30   ;;  %s3310_s0 = sphi %s3453_s0, %s4204_s0   ;;  %s3306_s29 = sphi %s3451_s29, %s4203_s29   ;;  %s3302_s28 = sphi %s3449_s28, %s4202_s28   ;;  %s3298_s27 = sphi %s3447_s27, %s4201_s27   ;;  %s3294_s26 = sphi %s3445_s26, %s4200_s26   ;;  %s3290_s25 = sphi %s3443_s25, %s4199_s25   ;;  %s3286_s24 = sphi %s3441_s24, %s4198_s24  }
  0x1c   : > { %4150 = sst [smem:[#allocation25_spill]] %s3310_s0  ;;  %p2361_p0 = scmp.ge.s32.totalorder %s3326_s1, 1 }
  0x1d   : > { %4151 = sst [smem:[#allocation26_spill]] %s3314_s30  ;;  %p3498_p1 = scmp.eq.s32.totalorder %s2359_s20, 0 }
  0x1e   : > { %p3502_p2 = scmp.eq.s32.totalorder %s2359_s20, 3  ;;  %p443_p3 = scmp.lt.s32.totalorder %s3326_s1, 5 }
  0x1f   : > { %s4152_s21 = scalar_select %p3498_p1, 1, 0 }
  0x20   : > { %s4153_s22 = scalar_select %p3502_p2, 1, 0 }
  0x21   : > { %p3507_p4 = pnand %p2361_p0, %p443_p3  ;;  %s3328_s17 = smov [#allocation9]  }
  0x22   : > { %4154 = sst [smem:[#allocation27_spill]] %s4153_s22  ;;  %s455_s12 = sshll.u32 %s3328_s17, 4  ;;  %s3511_s12 = int_to_ptr.vmem [resolvable:$true] %s455_s12 }
  0x23   : > { %s4155_s23 = scalar_select %p3507_p4, 1, 0 }
  0x24   : > { %p2728_p5 = pneg %p3507_p4  ;;  %s3329_s20 = smov [#allocation12]  }
  0x25   : > { %4156 = sst [smem:[#allocation28_spill]] %s4155_s23  ;;  %s487_s10 = sshll.u32 %s3329_s20, 4  ;;  %s3521_s10 = int_to_ptr.vmem [resolvable:$true] %s487_s10 }
  0x26   : > { %p3517_p6 = pnand %p2728_p5, %p3498_p1  ;;  %s3330_s16 = smov [#allocation15]  }
  0x27   : > { %s519_s15 = sshll.u32 %s3330_s16, 4  ;;  %s4158_s2 = sld [smem:[#allocation30_spill]]  ;;  %s3523_s15 = int_to_ptr.vmem [resolvable:$true] %s519_s15 }
  0x28   : > { %p3533_p8 = pneg %p3517_p6 }
  0x2d   : > { %s2994_s6 = scalar_lea.hbm %s4158_s2, 1024 }
  0x2e   : > { %p2995_p7 = scmp.ne.s32.totalorder %s4158_s2, %s2994_s6  ;;  %p3001_p11 = scmp.lt.u32.totalorder %s2994_s6, %s4158_s2 }
  0x30   : > { %p2997_p9 = pnand %p3533_p8, %p2995_p7 }
  0x32   : > { %p2998_p10 = pneg %p2997_p9 }
  0x34   : > { %p3003_p12 = pnand %p3001_p11, %p2998_p10 }
  0x36   : > { %3006 = shalt.err (!%p3003_p12)
}
  0x37   : > { %s3007_s4 = scalar_lea.vmem %s3511_s12, 1024  ;;  %p3015_p5 = scmp.lt.s32.totalorder %s3511_s12, %s3511_s12 }
  0x38   : > { %p3008_p13 = scmp.ne.s32.totalorder %s3511_s12, %s3007_s4  ;;  %p3016_p4 = scmp.lt.s32.totalorder %s3007_s4, %s3007_s4 }
  0x3a   : > { %p3010_p0 = pnand %p3008_p13, %p3533_p8  ;;  %p3017_p7 = por %p3016_p4, %p3015_p5 }
  0x3c   : > { %p3011_p3 = pneg %p3010_p0 }
  0x3e   : > { %p3018_p9 = pnand %p3017_p7, %p3011_p3 }
  0x40   : > { %3021 = shalt.err (!%p3018_p9)
}
  0x41   : > { %s4124_s8 = smov 64   ;;  %s4126_s6 = smov 4  }
  0x42   : > { %2731 = dma.hbm_to_vmem [thread:$0]  (!%p3517_p6), %s4158_s2, 1024, %s3511_s12, [#allocation10], %s4124_s8, %s4124_s8, %s4126_s6  }
  0x43   : > { %s3022_s4 = scalar_lea.hbm %s4104_s5, 1024 }
  0x44   : > { %p3023_p4 = scmp.ne.s32.totalorder %s4104_s5, %s3022_s4  ;;  %p3029_p12 = scmp.lt.u32.totalorder %s3022_s4, %s4104_s5 }
  0x46   : > { %p3025_p10 = pnand %p3023_p4, %p3533_p8 }
  0x48   : > { %p3026_p11 = pneg %p3025_p10 }
  0x4a   : > { %p3031_p13 = pnand %p3029_p12, %p3026_p11 }
  0x4c   : > { %3034 = shalt.err (!%p3031_p13)
}
  0x4d   : > { %s3035_s12 = scalar_lea.vmem %s3521_s10, 1024  ;;  %p3043_p7 = scmp.lt.s32.totalorder %s3521_s10, %s3521_s10 }
  0x4e   : > { %p3036_p0 = scmp.ne.s32.totalorder %s3521_s10, %s3035_s12  ;;  %p3044_p9 = scmp.lt.s32.totalorder %s3035_s12, %s3035_s12 }
  0x50   : > { %p3038_p3 = pnand %p3036_p0, %p3533_p8  ;;  %p3045_p4 = por %p3044_p9, %p3043_p7 }
  0x52   : > { %p3039_p5 = pneg %p3038_p3 }
  0x54   : > { %p3046_p10 = pnand %p3045_p4, %p3039_p5 }
  0x56   : > { %3049 = shalt.err (!%p3046_p10)
}
  0x57   : > { %2737 = dma.hbm_to_vmem [thread:$0]  (!%p3517_p6), %s4104_s5, 1024, %s3521_s10, [#allocation13], %s4124_s8, %s4124_s8, %s4126_s6  }
  0x58   : > { %s3050_s0 = scalar_lea.hbm %s4108_s9, 2048 }
  0x59   : > { %p3051_p11 = scmp.ne.s32.totalorder %s4108_s9, %s3050_s0  ;;  %p3057_p0 = scmp.lt.u32.totalorder %s3050_s0, %s4108_s9 }
  0x5b   : > { %p3053_p12 = pnand %p3051_p11, %p3533_p8 }
  0x5d   : > { %p3054_p13 = pneg %p3053_p12 }
  0x5f   : > { %p3059_p3 = pnand %p3057_p0, %p3054_p13 }
  0x61   : > { %3062 = shalt.err (!%p3059_p3)
}
  0x62   : > { %s3063_s10 = scalar_lea.vmem %s3523_s15, 2048  ;;  %p3071_p4 = scmp.lt.s32.totalorder %s3523_s15, %s3523_s15 }
  0x63   : > { %p3064_p5 = scmp.ne.s32.totalorder %s3523_s15, %s3063_s10  ;;  %p3072_p10 = scmp.lt.s32.totalorder %s3063_s10, %s3063_s10 }
  0x65   : > { %p3066_p7 = pnand %p3064_p5, %p3533_p8  ;;  %p3073_p11 = por %p3072_p10, %p3071_p4 }
  0x67   : > { %p3067_p9 = pneg %p3066_p7 }
  0x69   : > { %p3074_p12 = pnand %p3073_p11, %p3067_p9 }
  0x6b   : > { %3077 = shalt.err (!%p3074_p12)
}
  0x6c   : > { %s4130_s12 = smov 128   ;;  %s4131_s13 = smov 8  }
  0x6d   : > { %2743 = dma.hbm_to_vmem [thread:$0]  (!%p3517_p6), %s4108_s9, 2048, %s3523_s15, [#allocation16], %s4130_s12, %s4130_s12, %s4131_s13  }
  0x6e   : > { %s3335_s23 = smov [#allocation11]   ;;  %s3336_s17 = smov [#allocation14]  }
  0x6f   : > { %s471_s0 = sshll.u32 %s3335_s23, 4  ;;  %s503_s16 = sshll.u32 %s3336_s17, 4  ;;  %s472_s0 = int_to_ptr.vmem [resolvable:$true] %s471_s0  ;;  %s3609_s16 = int_to_ptr.vmem [resolvable:$true] %s503_s16 }
  0x70   : > { %s4160_s3 = sld [smem:[#allocation32_spill]] }
  0x76   : > { %s3078_s10 = scalar_lea.hbm %s4160_s3, 1024 }
  0x77   : > { %p3079_p13 = scmp.ne.s32.totalorder %s4160_s3, %s3078_s10  ;;  %p3085_p5 = scmp.lt.u32.totalorder %s3078_s10, %s4160_s3 }
  0x79   : > { %p3081_p0 = pnand %p3079_p13, %p3533_p8 }
  0x7b   : > { %p3082_p3 = pneg %p3081_p0 }
  0x7d   : > { %p3087_p7 = pnand %p3085_p5, %p3082_p3 }
  0x7f   : > { %3090 = shalt.err (!%p3087_p7)
}
  0x80   : > { %s3091_s22 = scalar_lea.vmem %s472_s0, 1024  ;;  %p3099_p11 = scmp.lt.s32.totalorder %s472_s0, %s472_s0 }
  0x81   : > { %p3092_p9 = scmp.ne.s32.totalorder %s472_s0, %s3091_s22  ;;  %p3100_p12 = scmp.lt.s32.totalorder %s3091_s22, %s3091_s22 }
  0x83   : > { %p3094_p4 = pnand %p3092_p9, %p3533_p8  ;;  %p3101_p2 = por %p3100_p12, %p3099_p11 }
  0x85   : > { %p3095_p10 = pneg %p3094_p4 }
  0x87   : > { %p3102_p1 = pnand %p3101_p2, %p3095_p10 }
  0x89   : > { %3105 = shalt.err (!%p3102_p1)
}
  0x8a   : > { %s4161_s8 = smov 4   ;;  %s4162_s6 = smov 64  }
  0x8b   : > { %2734 = dma.hbm_to_vmem [thread:$0]  (!%p3517_p6), %s4160_s3, 1024, %s472_s0, [#allocation10], %s4162_s6, %s4162_s6, %s4161_s8  }
  0x8c   : > { %s3106_s10 = scalar_lea.hbm %s4106_s7, 1024 }
  0x8d   : > { %p3107_p13 = scmp.ne.s32.totalorder %s4106_s7, %s3106_s10  ;;  %p3113_p0 = scmp.lt.u32.totalorder %s3106_s10, %s4106_s7 }
  0x8f   : > { %p3109_p1 = pnand %p3107_p13, %p3533_p8 }
  0x91   : > { %p3110_p2 = pneg %p3109_p1 }
  0x93   : > { %p3115_p3 = pnand %p3113_p0, %p3110_p2 }
  0x95   : > { %3118 = shalt.err (!%p3115_p3)
}
  0x96   : > { %s3119_s0 = scalar_lea.vmem %s3609_s16, 1024  ;;  %p3127_p4 = scmp.lt.s32.totalorder %s3609_s16, %s3609_s16 }
  0x97   : > { %p3120_p5 = scmp.ne.s32.totalorder %s3609_s16, %s3119_s0  ;;  %p3128_p10 = scmp.lt.s32.totalorder %s3119_s0, %s3119_s0 }
  0x99   : > { %p3122_p7 = pnand %p3120_p5, %p3533_p8  ;;  %p3129_p11 = por %p3128_p10, %p3127_p4 }
  0x9b   : > { %p3123_p9 = pneg %p3122_p7 }
  0x9d   : > { %p3130_p12 = pnand %p3129_p11, %p3123_p9 }
  0x9f   : > { %3133 = shalt.err (!%p3130_p12)
}
  0xa0   : > { %2740 = dma.hbm_to_vmem [thread:$0]  (!%p3517_p6), %s4106_s7, 1024, %s3609_s16, [#allocation13], %s4162_s6, %s4162_s6, %s4161_s8  }
  0xa1   : > { %s3337_s17 = smov [#allocation17]   ;;  %s3134_s24 = scalar_lea.hbm %s4110_s11, 2048 }
  0xa2   : > { %s535_s20 = sshll.u32 %s3337_s17, 4  ;;  %p3135_p13 = scmp.ne.s32.totalorder %s4110_s11, %s3134_s24  ;;  %s536_s20 = int_to_ptr.vmem [resolvable:$true] %s535_s20 }
  0xa3   : > { %p3141_p0 = scmp.lt.u32.totalorder %s3134_s24, %s4110_s11 }
  0xa4   : > { %p3137_p1 = pnand %p3135_p13, %p3533_p8 }
  0xa6   : > { %p3138_p2 = pneg %p3137_p1 }
  0xa8   : > { %p3143_p3 = pnand %p3141_p0, %p3138_p2 }
  0xaa   : > { %3146 = shalt.err (!%p3143_p3)
}
  0xab   : > { %s3147_s16 = scalar_lea.vmem %s536_s20, 2048  ;;  %p3155_p4 = scmp.lt.s32.totalorder %s536_s20, %s536_s20 }
  0xac   : > { %p3148_p5 = scmp.ne.s32.totalorder %s536_s20, %s3147_s16  ;;  %p3156_p10 = scmp.lt.s32.totalorder %s3147_s16, %s3147_s16 }
  0xae   : > { %p3150_p7 = pnand %p3148_p5, %p3533_p8  ;;  %p3157_p11 = por %p3156_p10, %p3155_p4 }
  0xb0   : > { %p3151_p9 = pneg %p3150_p7 }
  0xb2   : > { %p3158_p12 = pnand %p3157_p11, %p3151_p9 }
  0xb4   : > { %3161 = shalt.err (!%p3158_p12)
}
  0xb5   : > { %2746 = dma.hbm_to_vmem [thread:$0]  (!%p3517_p6), %s4110_s11, 2048, %s536_s20, [#allocation16], %s4162_s6, %s4162_s6, %s4161_s8  }
  0xb6   : > { %s2360_s14 = sadd.s32 4294967294, %s3326_s1   ;;  %s45_s30 = sadd.s32 1, %s3318_s18 }
  0xb7   : > { %s4163_s23 = sld [smem:[#allocation24_spill]]  ;;  %s48_s17 = sadd.s32 1, %s3322_s19 }
  0xb8   : > { %p46_p8 = scmp.ge.s32.totalorder %s45_s30, 2  ;;  %s55_s4 = sadd.s32 1, %s3306_s29 }
  0xb9   : > { %p62_p13 = scmp.ne.s32.totalorder %s3306_s29, %s3302_s28  ;;  %p63_p1 = scmp.eq.s32.totalorder %s3326_s1, 0 }
  0xba   : > { %s4209_s30 = smov (%p46_p8, %s45_s30), 0  ;;  %s4164_s10 = sld [smem:[#allocation27_spill]] }
  0xbb   : > { %s4211_s17 = smov (!%p46_p8, %s48_s17), %s3322_s19  ;;  %p3689_p2 = por %p63_p1, %p62_p13 }
  0xbc   : > { %p68_p6 = scmp.ne.s32.totalorder %s3302_s28, %s3298_s27  ;;  %p50_p0 = scmp.ge.s32.totalorder %s4211_s17, 2 }
  0xbd   : > { %s415_s6 = ssub.s32 %s3318_s18, %s4209_s30  ;;  %p4166_p3 = scmp.ne.s32.totalorder %s4152_s21, 0 }
  0xbe   : > { %s419_s24 = sadd.s32 1, %s3294_s26  ;;  %s4213_s17 = smov (%p50_p0, %s4211_s17), 0 }
  0xbf   : > { %p3699_p5 = por %p4166_p3, %p68_p6  ;;  %p429_p7 = scmp.ne.s32.totalorder %s3294_s26, %s3290_s25 }
  0xc0   : > { %p435_p9 = scmp.ne.s32.totalorder %s3290_s25, %s4163_s23  ;;  %s52_s15 = ssub.s32 %s3322_s19, %s4213_s17 }
  0xc1   : > { %p436_p4 = scmp.eq.s32.totalorder %s2360_s14, 3  ;;  %p53_p10 = scmp.eq.s32.totalorder %s52_s15, 0 }
  0xc2   : > { %s416_s27 = sor.u32 %s415_s6, %s52_s15  ;;  %p4168_p12 = scmp.ne.s32.totalorder %s4164_s10, 0 }
  0xc3   : > { %p417_p11 = scmp.eq.s32.totalorder %s416_s27, 0  ;;  %p3724_p13 = por %p436_p4, %p435_p9 }
  0xc4   : > { %p3714_p8 = por %p4168_p12, %p429_p7  ;;  %p2761_p1 = scmp.lt.s32.totalorder %s3326_s1, 4 }
  0xc5   : > { %s3719_s0 = scalar_select %p53_p10, %s3306_s29, %s55_s4  }
  0xc6   : > { %s4169_s22 = scalar_select %p3714_p8, 1, 0 }
  0xc7   : > { %s3722_s16 = scalar_select %p417_p11, %s3294_s26, %s419_s24  }
  0xc8   : > { %s4170_s13 = scalar_select %p3724_p13, 1, 0 }
  0xc9   : > { %s564_s12 = sand.u32 1, %s3306_s29   ;;  %s2471_s23 = sshll.u32 %s3322_s19, 9 }
  0xca   : > { %s2369_s14 = sshll.u32 %s564_s12, 5  ;;  %s4171_s15 = sld [smem:[#allocation29_spill]] }
  0xcb   : > { %s568_s4 = scalar_lea.vmem [#allocation6], %s2369_s14  ;;  %p3738_p6 = pnand %p2761_p1, %p3689_p2 }
  0xcc   : > { %s575_s24 = sshll.u32 %s568_s4, 4  ;;  %s3744_s3 = scalar_lea.sflag [#allocation7], %s564_s12  ;;  %s3742_s24 = int_to_ptr.vmem [resolvable:$true] %s575_s24 }
  0xcd   : > { %p3164_p3 = pneg %p3738_p6 }
  0xd0   : > { %s3734_s10 = scalar_lea.hbm %s4171_s15, %s2471_s23  ;;  %s3167_s14 = scalar_lea.hbm %s4171_s15, 1024 }
  0xd1   : > { %s3162_s2 = scalar_lea.hbm %s3734_s10, 512  ;;  %p3168_p2 = scmp.lt.u32.totalorder %s3734_s10, %s4171_s15 }
  0xd2   : > { %p3163_p0 = scmp.ne.s32.totalorder %s3734_s10, %s3162_s2  ;;  %p3169_p4 = scmp.lt.u32.totalorder %s3167_s14, %s3162_s2 }
  0xd3   : > { %p3171_p11 = scmp.lt.u32.totalorder %s3162_s2, %s3734_s10 }
  0xd4   : > { %p3165_p7 = pnand %p3164_p3, %p3163_p0  ;;  %p3170_p10 = por %p3169_p4, %p3168_p2 }
  0xd6   : > { %p3166_p9 = pneg %p3165_p7  ;;  %p3172_p12 = por %p3171_p11, %p3170_p10 }
  0xd8   : > { %p3173_p1 = pnand %p3172_p12, %p3166_p9 }
  0xda   : > { %3176 = shalt.err (!%p3173_p1)
}
  0xdb   : > { %s3177_s12 = scalar_lea.vmem %s3742_s24, 512  ;;  %s3338_s23 = smov [#allocation6]  }
  0xdc   : > { %p3178_p0 = scmp.ne.s32.totalorder %s3742_s24, %s3177_s12  ;;  %s3182_s8 = sshll.u32 %s3338_s23, 4  ;;  %s3183_s8 = int_to_ptr.vmem [resolvable:$false] %s3182_s8 }
  0xdd   : > { %s3184_s6 = scalar_lea.vmem %s3183_s8, 1024  ;;  %p3185_p8 = scmp.lt.s32.totalorder %s3742_s24, %s3183_s8 }
  0xde   : > { %p3180_p7 = pnand %p3178_p0, %p3164_p3  ;;  %p3186_p2 = scmp.lt.s32.totalorder %s3184_s6, %s3177_s12 }
  0xe0   : > { %p3181_p13 = pneg %p3180_p7  ;;  %p3187_p4 = por %p3186_p2, %p3185_p8 }
  0xe2   : > { %p3188_p10 = pnand %p3187_p4, %p3181_p13 }
  0xe4   : > { %3191 = shalt.err (!%p3188_p10)
}
  0xe5   : > { %s4173_s2 = smov 8   ;;  %s4174_s14 = smov 128  }
  0xe6   : > { %2750 = dma.hbm_to_vmem [thread:$0]  (!%p3738_p6), %s3734_s10, 512, %s3742_s24, %s3744_s3, %s4174_s14, %s4174_s14, %s4173_s2  }
  0xe7   : > { %s4175_s4 = sld [smem:[#allocation28_spill]] }
  0xed   : > { %p4176_p3 = scmp.ne.s32.totalorder %s4175_s4, 0 }
  0xee   : > { %s589_s23 = sand.u32 (!%p4176_p3), 1, %s3302_s28  }
  0xef   : > { %587 = sbr.rel (%p4176_p3) target bundleno = 4168 (0x1048), region = 88  ;;  %s2373_s8 = sshll.u32 (!%p4176_p3), %s589_s23, 5 }
  0xf0   : > { %s590_s12 = scalar_lea.sflag (!%p4176_p3), [#allocation7], %s589_s23  ;;  %s3778_s6 = scalar_lea.vmem (!%p4176_p3), [#allocation6], %s2373_s8 }
  0xf6   : > { %3265 = dma.done.wait (%p3699_p5), %s590_s12, 512  }
  0xf7   : > { %3267 = vsyncadd (%p3699_p5), %s590_s12, 4294966784  ;;  %p4177_p8 = scmp.ne.s32.totalorder %s4152_s21, 0 }
  0xf9   : > { %3269 = dma.done.wait (%p4177_p8), [#allocation10], 2048  }
  0xfa   : > { %3271 = vsyncadd (%p4177_p8), [#allocation10], 4294965248 }
  0xfb   : > { %3273 = dma.done.wait (%p4177_p8), [#allocation13], 2048  }
  0xfc   : > { %3275 = vsyncadd (%p4177_p8), [#allocation13], 4294965248 }
  0xfd   : > { %3277 = dma.done.wait (%p4177_p8), [#allocation16], 4096  }
  0xfe   : > { %3279 = vsyncadd (%p4177_p8), [#allocation16], 4294963200  ;;  %s4134_s3 = sand.u32 1, %s3290_s25   ;;  %s4178_s27 = sld [smem:[#allocation38_spill]] }
  0xff   : > { %s2380_s20 = sshll.u32 %s4134_s3, 4  ;;  %s4179_s4 = sld [smem:[#allocation39_spill]] }
 0x100   : > { %s3809_s23 = scalar_lea.vmem [#allocation18], %s2380_s20  ;;  %s4180_s8 = sld [smem:[#allocation25_spill]] }
 0x104   : > { %v3802_v0 = vld [vmem:[%s4178_s27] ss:$0 sm:$0xff] }
 0x105   : > { %v3807_v1 = vld [vmem:[%s4179_s4] ss:$0 sm:$0xff] }
 0x106   : > { %p2381_p5 = scmp.ne.s32.totalorder %s4180_s8, 0 }
 0x107   : > { %v676_v2 = vld [vmem:[%s3778_s6] sm:$0xff] (!%p2381_p5)  ;;  %v678_v3 = vld [vmem:[%s3778_s6 + $0x10] sm:$0xff] (!%p2381_p5)  ;;  %v677_v4 = vld [vmem:[%s3778_s6 + $0x8] sm:$0xff] (!%p2381_p5)  ;;  %s4181_s20 = sld [smem:[#allocation33_spill]] (!%p2381_p5)  ;;  %s4182_s27 = sld [smem:[#allocation34_spill]] (!%p2381_p5)  ;;  %vm991_vm0 = vcmask (!%p2381_p5), 261120  }
 0x108   : > { %675 = sbr.rel (%p2381_p5) target bundleno = 943 (0x3af), region = 120  ;;  %680 = vadd.xlane.f32.xlu0 (!%p2381_p5), %v676_v2  ;;  %684 = vadd.xlane.f32.xlu1 (!%p2381_p5), %v678_v3  ;;  %v679_v5 = vld [vmem:[%s3778_s6 + $0x18] sm:$0xff] (!%p2381_p5)  ;;  %v2878_v6 = vld [vmem:[#allocation11] sm:$0xff] (!%p2381_p5)   ;;  %v2880_v24 = vld [vmem:[#allocation11 + $0x8] sm:$0xff] (!%p2381_p5)   ;;  %s3339_s2 = smov (!%p2381_p5), 96  }
 0x109   : > { %v2879_v7 = vld [vmem:[#allocation12] sm:$0xff] (!%p2381_p5)   ;;  %2556 = vmatprep.subr.bf16.mxu0 (!%p2381_p5), %v2878_v6  ;;  %v2881_v25 = vld [vmem:[#allocation12 + $0x8] sm:$0xff] (!%p2381_p5)   ;;  %v2882_v26 = vld [vmem:[#allocation11 + $0x10] sm:$0xff] (!%p2381_p5)   ;;  %s3340_s14 = smov (!%p2381_p5), 64   ;;  %s3341_s4 = smov (!%p2381_p5), 32  }
 0x10a   : > { %2576 = vmatprep.subr.bf16.mxu1 (!%p2381_p5), %v2879_v7  ;;  %2557 = vmatpush3.bf16.msra.mxu0 (!%p2381_p5), %v2878_v6  ;;  %v2883_v27 = vld [vmem:[#allocation12 + $0x10] sm:$0xff] (!%p2381_p5)   ;;  %v2884_v28 = vld [vmem:[#allocation11 + $0x18] sm:$0xff] (!%p2381_p5)   ;;  %v2886_v30 = vld [vmem:[#allocation11 + $0x20] sm:$0xff] (!%p2381_p5)  }
 0x10b   : > { %2577 = vmatpush3.bf16.msra.mxu1 (!%p2381_p5), %v2879_v7  ;;  %2558 = vmatprep.subr.bf16.mxu0 (!%p2381_p5), %v2880_v24  ;;  %v2885_v29 = vld [vmem:[#allocation12 + $0x18] sm:$0xff] (!%p2381_p5)   ;;  %v2887_v31 = vld [vmem:[#allocation12 + $0x20] sm:$0xff] (!%p2381_p5)   ;;  %v2888_v32 = vld [vmem:[#allocation11 + $0x28] sm:$0xff] (!%p2381_p5)  }
 0x10c   : > { %682 = vadd.xlane.f32.xlu0 (!%p2381_p5), %v677_v4  ;;  %686 = vadd.xlane.f32.xlu1 (!%p2381_p5), %v679_v5  ;;  %v2889_v33 = vld [vmem:[#allocation12 + $0x28] sm:$0xff] (!%p2381_p5)   ;;  %v2890_v34 = vld [vmem:[#allocation11 + $0x30] sm:$0xff] (!%p2381_p5)   ;;  %v2892_v36 = vld [vmem:[#allocation11 + $0x38] sm:$0xff] (!%p2381_p5)  }
 0x10d   : > { %2578 = vmatprep.subr.bf16.mxu1 (!%p2381_p5), %v2881_v25  ;;  %v2891_v35 = vld [vmem:[#allocation12 + $0x30] sm:$0xff] (!%p2381_p5)   ;;  %v2893_v37 = vld [vmem:[#allocation12 + $0x38] sm:$0xff] (!%p2381_p5)   ;;  %v2384_v7 = vld [vmem:[%s4181_s20] ss:$0 sm:$0xff] (!%p2381_p5) }
 0x10e   : > { %2559 = vmatpush3.bf16.msra.mxu0 (!%p2381_p5), %v2880_v24 }
 0x10f   : > { %2579 = vmatpush3.bf16.msra.mxu1 %v2881_v25  ;;  %2560 = vmatprep.subr.bf16.mxu0 %v2882_v26 }
 0x110   : > { %2580 = vmatprep.subr.bf16.mxu1 %v2883_v27 }
 0x112   : > { %2561 = vmatpush3.bf16.msra.mxu0 %v2882_v26 }
 0x113   : > { %2581 = vmatpush3.bf16.msra.mxu1 %v2883_v27  ;;  %2562 = vmatprep.subr.bf16.mxu0 %v2884_v28 }
 0x114   : > { %2582 = vmatprep.subr.bf16.mxu1 %v2885_v29 }
 0x116   : > { %2563 = vmatpush3.bf16.msra.mxu0 %v2884_v28 }
 0x117   : > { %2583 = vmatpush3.bf16.msra.mxu1 %v2885_v29  ;;  %2564 = vmatprep.subr.bf16.mxu0 %v2886_v30 }
 0x118   : > { %2584 = vmatprep.subr.bf16.mxu1 %v2887_v31 }
 0x11a   : > { %2565 = vmatpush3.bf16.msra.mxu0 %v2886_v30 }
 0x11b   : > { %2585 = vmatpush3.bf16.msra.mxu1 %v2887_v31  ;;  %2566 = vmatprep.subr.bf16.mxu0 %v2888_v32 }
 0x11c   : > { %2586 = vmatprep.subr.bf16.mxu1 %v2889_v33 }
 0x11e   : > { %2567 = vmatpush3.bf16.msra.mxu0 %v2888_v32 }
 0x11f   : > { %2587 = vmatpush3.bf16.msra.mxu1 %v2889_v33  ;;  %2568 = vmatprep.subr.bf16.mxu0 %v2890_v34 }
 0x120   : > { %2588 = vmatprep.subr.bf16.mxu1 %v2891_v35 }
 0x122   : > { %2569 = vmatpush3.bf16.msra.mxu0 %v2890_v34 }
 0x123   : > { %2589 = vmatpush3.bf16.msra.mxu1 %v2891_v35  ;;  %2570 = vmatprep.subr.bf16.mxu0 %v2892_v36 }
 0x124   : > { %2590 = vmatprep.subr.bf16.mxu1 %v2893_v37 }
 0x126   : > { %2571 = vmatpush3.bf16.msra.mxu0 %v2892_v36 }
 0x127   : > { %2591 = vmatpush3.bf16.msra.mxu1 %v2893_v37 }
 0x195   : > { %v681_v8 = vpop.xlane.xlu0 %680  ;;  %v685_v9 = vpop.xlane.xlu1 %684 }
 0x196   : > { %v689_v10 = vmul.f32 0.0078125, %v681_v8  ;;  %v691_v11 = vmul.f32 0.0078125, %v685_v9 }
 0x198   : > { %v3816_v12 = vsub.f32 %v676_v2, %v689_v10  ;;  %v3818_v13 = vsub.f32 %v678_v3, %v691_v11 }
 0x199   : > { %v683_v14 = vpop.xlane.xlu0 %682  ;;  %v687_v15 = vpop.xlane.xlu1 %686 }
 0x19a   : > { %v690_v16 = vmul.f32 0.0078125, %v683_v14  ;;  %v697_v17 = vmul.f32 %v3816_v12, %v3816_v12  ;;  %v692_v18 = vmul.f32 0.0078125, %v687_v15  ;;  %v699_v21 = vmul.f32 %v3818_v13, %v3818_v13 }
 0x19c   : > { %v3822_v19 = vsub.f32 %v677_v4, %v690_v16  ;;  %701 = vadd.xlane.f32.xlu0 %v697_v17  ;;  %v3824_v20 = vsub.f32 %v679_v5, %v692_v18 }
 0x19e   : > { %v698_v22 = vmul.f32 %v3822_v19, %v3822_v19  ;;  %v700_v23 = vmul.f32 %v3824_v20, %v3824_v20 }
 0x1a0   : > { %705 = vadd.xlane.f32.xlu0 %v699_v21  ;;  %703 = vadd.xlane.f32.xlu1 %v698_v22 }
 0x1a4   : > { %707 = vadd.xlane.f32.xlu1 %v700_v23 }
 0x229   : > { %v702_v38 = vpop.xlane.xlu0 %701 }
 0x22a   : > { %v709_v39 = vmul.f32 0.0078125, %v702_v38 }
 0x22c   : > { %v713_v40 = vadd.f32 1e-05, %v709_v39 }
 0x22d   : > { %v704_v41 = vpop.xlane.xlu1 %703  ;;  %v706_v42 = vpop.xlane.xlu0 %705 }
 0x22e   : > { %2894 = vrsqrt.f32 %v713_v40  ;;  %v710_v43 = vmul.f32 0.0078125, %v704_v41  ;;  %v711_v44 = vmul.f32 0.0078125, %v706_v42 }
 0x230   : > { %v714_v45 = vadd.f32 1e-05, %v710_v43  ;;  %v715_v46 = vadd.f32 1e-05, %v711_v44 }
 0x231   : > { %v708_v47 = vpop.xlane.xlu1 %707 }
 0x232   : > { %2896 = vrsqrt.f32 %v714_v45  ;;  %v712_v48 = vmul.f32 0.0078125, %v708_v47 }
 0x233   : > { %2898 = vrsqrt.f32 %v715_v46 }
 0x234   : > { %v716_v49 = vadd.f32 1e-05, %v712_v48 }
 0x236   : > { %2900 = vrsqrt.f32 %v716_v49 }
 0x238   : > { %v2895_v50 = vpop.eup %2894 }
 0x239   : > { %v721_v51 = vmul.f32 %v2895_v50, %v3816_v12 }
 0x23b   : > { %v731_v55 = vmul.f32 %v3802_v0, %v721_v51 }
 0x23c   : > { %v2897_v52 = vpop.eup %2896 }
 0x23d   : > { %v2899_v53 = vpop.eup %2898  ;;  %v722_v54 = vmul.f32 %v2897_v52, %v3822_v19  ;;  %v741_v59 = vadd.f32 %v3807_v1, %v731_v55 }
 0x23e   : > { %v723_v56 = vmul.f32 %v2899_v53, %v3818_v13 }
 0x23f   : > { %v732_v57 = vmul.f32 %v3802_v0, %v722_v54 }
 0x240   : > { %v2901_v58 = vpop.eup %2900  ;;  %v733_v62 = vmul.f32 %v3802_v0, %v723_v56 }
 0x241   : > { %v742_v60 = vadd.f32 %v3807_v1, %v732_v57  ;;  %v724_v61 = vmul.f32 %v2901_v58, %v3824_v20 }
 0x242   : > { %v743_v3 = vadd.f32 %v3807_v1, %v733_v62 }
 0x243   : > { %v745_v63 = vpack.c.bf16 %v742_v60, %v741_v59  ;;  %v734_v2 = vmul.f32 %v3802_v0, %v724_v61  ;;  %v2393_v0 = vld [vmem:[%s4182_s27] ss:$0 sm:$0xff] }
 0x245   : > { %747 = vst [vmem:[#allocation2] sm:$0xff] %v745_v63  ;;  %2572 = vmatprep.mubr.bf16.mxu0 %v745_v63  ;;  %2592 = vmatprep.mubr.bf16.mxu1 %v745_v63  ;;  %v744_v4 = vadd.f32 %v3807_v1, %v734_v2 }
 0x247   : > { %v746_v5 = vpack.c.bf16 %v744_v4, %v743_v3 }
 0x249   : > { %748 = vst [vmem:[#allocation2 + $0x8] sm:$0xff] %v746_v5  ;;  %2573 = vmatmul.mubr.bf16.vlgmr.msra.gmra.mrb[0].mxu0 %v746_v5  ;;  %2593 = vmatmul.mubr.bf16.vlgmr.msra.gmra.mrb[0].mxu1 %v746_v5 }
 0x31c   : > { %v2574_v6 = vpop.f32.mrb[0].mxu0  ;;  %v2594_v8 = vpop.f32.mrb[0].mxu1 }
 0x31d   : > { %v854_v9 = vpop.f32.mrb[1].mxu0  ;;  %v974_v10 = vpop.f32.mrb[1].mxu1  ;;  %v863_v1 = vadd.f32 %v2574_v6, %v2384_v7  ;;  %v983_v13 = vadd.f32 %v2594_v8, %v2393_v0 }
 0x31e   : > { %v2575_v11 = vpop.f32.mrb[2].mxu0  ;;  %v2595_v12 = vpop.f32.mrb[2].mxu1  ;;  %v855_v18 = vadd.f32 %v2384_v7, %v854_v9  ;;  %v975_v19 = vadd.f32 %v2393_v0, %v974_v10 }
 0x31f   : > { %v866_v14 = vadd.f32 %v2575_v11, %v2384_v7  ;;  %v986_v15 = vadd.f32 %v2595_v12, %v2393_v0  ;;  %v857_v16 = vpop.f32.mrb[3].mxu0  ;;  %v977_v17 = vpop.f32.mrb[3].mxu1 }
 0x320   : > { %v858_v20 = vadd.f32 %v2384_v7, %v857_v16  ;;  %v978_v21 = vadd.f32 %v2393_v0, %v977_v17 }
 0x321   : > { %v990_v22 = vpack.c.bf16 %v866_v14, %v863_v1  ;;  %v995_v23 = vpack.c.bf16 %v986_v15, %v983_v13 }
 0x322   : > { %v989_v24 = vpack.c.bf16 %v858_v20, %v855_v18  ;;  %v994_v25 = vpack.c.bf16 %v978_v21, %v975_v19 }
 0x323   : > { %993 = vst.msk [vmem:[#allocation3 + $0x8] sm:$0xff] %vm991_vm0, %v990_v22  ;;  %997 = vst.msk [vmem:[#allocation4 + $0x8] sm:$0xff] %vm991_vm0, %v995_v23  ;;  %1002 = vrot.lane.b32.xlu1 %v990_v22, %s3339_s2 }
 0x324   : > { %992 = vst.msk [vmem:[#allocation3] sm:$0xff] %vm991_vm0, %v989_v24  ;;  %996 = vst.msk [vmem:[#allocation4] sm:$0xff] %vm991_vm0, %v994_v25  ;;  %1000 = vrot.lane.b32.xlu0 %v989_v24, %s3339_s2 }
 0x327   : > { %1013 = vrot.lane.b32.xlu1 %v995_v23, %s3339_s2 }
 0x328   : > { %1020 = vrot.lane.b32.xlu0 %v989_v24, %s3340_s14 }
 0x32b   : > { %1022 = vrot.lane.b32.xlu1 %v990_v22, %s3340_s14 }
 0x32c   : > { %1029 = vrot.lane.b32.xlu0 %v994_v25, %s3340_s14 }
 0x32f   : > { %1031 = vrot.lane.b32.xlu1 %v995_v23, %s3340_s14 }
 0x330   : > { %1038 = vrot.lane.b32.xlu0 %v989_v24, %s3341_s4 }
 0x333   : > { %1040 = vrot.lane.b32.xlu1 %v990_v22, %s3341_s4 }
 0x334   : > { %1047 = vrot.lane.b32.xlu0 %v994_v25, %s3341_s4 }
 0x337   : > { %1011 = vrot.lane.b32.xlu1 %v994_v25, %s3339_s2 }
 0x33b   : > { %1049 = vrot.lane.b32.xlu1 %v995_v23, %s3341_s4 }
 0x395   : > { %v1003_v26 = vpop.permute.xlu1 %1002 }
 0x396   : > { %1008 = vst.msk [vmem:[#allocation3 + $0x18] sm:$0xff] %vm991_vm0, %v1003_v26  ;;  %v1001_v27 = vpop.permute.xlu0 %1000 }
 0x397   : > { %1007 = vst.msk [vmem:[#allocation3 + $0x10] sm:$0xff] %vm991_vm0, %v1001_v27 }
 0x399   : > { %v1014_v28 = vpop.permute.xlu1 %1013 }
 0x39a   : > { %1019 = vst.msk [vmem:[#allocation4 + $0x18] sm:$0xff] %vm991_vm0, %v1014_v28  ;;  %v1021_v29 = vpop.permute.xlu0 %1020 }
 0x39b   : > { %1027 = vst.msk [vmem:[#allocation3 + $0x20] sm:$0xff] %vm991_vm0, %v1021_v29 }
 0x39d   : > { %v1023_v30 = vpop.permute.xlu1 %1022 }
 0x39e   : > { %1028 = vst.msk [vmem:[#allocation3 + $0x28] sm:$0xff] %vm991_vm0, %v1023_v30  ;;  %v1030_v31 = vpop.permute.xlu0 %1029 }
 0x39f   : > { %1036 = vst.msk [vmem:[#allocation4 + $0x20] sm:$0xff] %vm991_vm0, %v1030_v31 }
 0x3a1   : > { %v1032_v32 = vpop.permute.xlu1 %1031 }
 0x3a2   : > { %1037 = vst.msk [vmem:[#allocation4 + $0x28] sm:$0xff] %vm991_vm0, %v1032_v32  ;;  %v1039_v33 = vpop.permute.xlu0 %1038 }
 0x3a3   : > { %1045 = vst.msk [vmem:[#allocation3 + $0x30] sm:$0xff] %vm991_vm0, %v1039_v33 }
 0x3a5   : > { %v1041_v34 = vpop.permute.xlu1 %1040 }
 0x3a6   : > { %1046 = vst.msk [vmem:[#allocation3 + $0x38] sm:$0xff] %vm991_vm0, %v1041_v34  ;;  %v1048_v35 = vpop.permute.xlu0 %1047 }
 0x3a7   : > { %1054 = vst.msk [vmem:[#allocation4 + $0x30] sm:$0xff] %vm991_vm0, %v1048_v35 }
 0x3a9   : > { %v1012_v36 = vpop.permute.xlu1 %1011 }
 0x3aa   : > { %1018 = vst.msk [vmem:[#allocation4 + $0x10] sm:$0xff] %vm991_vm0, %v1012_v36 }
 0x3ad   : > { %v1050_v37 = vpop.permute.xlu1 %1049 }
 0x3ae   : > { %1055 = vst.msk [vmem:[#allocation4 + $0x38] sm:$0xff] %vm991_vm0, %v1050_v37 }
 0x3af PF: > { %v2902_v38 = vld [vmem:[#allocation9] sm:$0xff]   ;;  %s4183_s8 = sld [smem:[#allocation25_spill]]  ;;  %v3342_v39 = vmov 0.0   ;;  %v2903_v40 = vld [vmem:[#allocation9 + $0x8] sm:$0xff]   ;;  %vm3343_vm1 = vmmov 0   ;;  %v2904_v41 = vld [vmem:[#allocation9 + $0x10] sm:$0xff]  }
 0x3b0   : > { %2596 = vmatprep.subr.bf16.mxu0 %v3342_v39  ;;  %2616 = vmatprep.subr.bf16.mxu1 %v3342_v39  ;;  %vm1182_vm2 = vcmask 261120   ;;  %v2905_v42 = vld [vmem:[#allocation9 + $0x18] sm:$0xff]   ;;  %v2906_v45 = vld [vmem:[#allocation9 + $0x20] sm:$0xff]   ;;  %v2907_v46 = vld [vmem:[#allocation9 + $0x28] sm:$0xff]   ;;  %s4184_s2 = sld [smem:[#allocation31_spill]]  ;;  %s3344_s14 = smov 96  }
 0x3b1   : > { %2597 = vmatpush3.bf16.msra.mxu0 %v2902_v38  ;;  %2612 = vmatprep.mubr.msk.bf16.mxu0 %vm3343_vm1, %v3342_v39  ;;  %v1180_v43 = vld [vmem:[#allocation3] sm:$0xff]  ;;  %v2908_v47 = vld [vmem:[#allocation9 + $0x30] sm:$0xff]   ;;  %v1181_v50 = vld [vmem:[#allocation3 + $0x8] sm:$0xff]  ;;  %s3345_s4 = smov 64   ;;  %vm1435_vm3 = vcmask 523520   ;;  %vm1567_vm4 = vcmask 785920  }
 0x3b2   : > { %2598 = vmatprep.subr.bf16.mxu0 %v3342_v39  ;;  %2620 = vmatprep.mubr.msk.bf16.mxu1 %vm3343_vm1, %v3342_v39  ;;  %v1187_v44 = vsel %vm1182_vm2, %v1180_v43, 0  ;;  %v2909_v48 = vld [vmem:[#allocation9 + $0x38] sm:$0xff]   ;;  %v1190_v51 = vsel %vm1182_vm2, %v1181_v50, 0  ;;  %v1257_v15 = vld [vmem:[#allocation4 + $0x8] sm:$0xff]  ;;  %v1305_v20 = vld [vmem:[#allocation3 + $0x10] sm:$0xff]  ;;  %vm1699_vm5 = vcmask 1048320  }
 0x3b3   : > { %2617 = vmatpush3.bf16.xpose.msra.mxu1 %v1187_v44  ;;  %v1256_v14 = vld [vmem:[#allocation4] sm:$0xff]  ;;  %v1314_v24 = vsel %vm1182_vm2, %v1305_v20, 0  ;;  %v1306_v25 = vld [vmem:[#allocation3 + $0x18] sm:$0xff]  ;;  %v1439_v30 = vld [vmem:[#allocation3 + $0x28] sm:$0xff]  ;;  %s4185_s27 = sld [smem:[#allocation35_spill]]  ;;  %s4188_s24 = sld [smem:[#allocation36_spill]] }
 0x3b4   : > { %2618 = vmatprep.subr.bf16.mxu1 %v3342_v39  ;;  %v1317_v26 = vsel %vm1182_vm2, %v1306_v25, 0  ;;  %v1438_v27 = vld [vmem:[#allocation3 + $0x20] sm:$0xff]  ;;  %v1449_v31 = vsel %vm1182_vm2, %v1439_v30, 0  ;;  %p4194_p6 = scmp.ne.s32.totalorder %s4169_s22, 0 }
 0x3b5   : > { %s2402_s21 = sshll.u32 %s4183_s8, 4  ;;  %2599 = vmatpush3.bf16.msra.mxu0 %v2903_v40  ;;  %v1446_v28 = vsel %vm1182_vm2, %v1438_v27, 0 }
 0x3b6   : > { %2600 = vmatprep.subr.bf16.mxu0 %v3342_v39  ;;  %s1060_s12 = sshra.s32 %s2402_s21, 4  ;;  %v2404_v52 = vld [vmem:[%s4184_s2] ss:$0 sm:$0xff]  ;;  %s4186_s2 = sld [smem:[#allocation40_spill]] }
 0x3b7   : > { %s2403_s20 = sshll.u32 %s1060_s12, 3  ;;  %s3346_s12 = smov 32  }
 0x3b8   : > { %s1063_s10 = scalar_lea.vmem [#allocation2], %s2403_s20  ;;  %s1057_s20 = scalar_lea.vmem %s3778_s6, %s2402_s21 [#allocation6] }
 0x3b9   : > { %2601 = vmatpush3.bf16.msra.mxu0 %v2904_v41  ;;  %v1064_v49 = vld [vmem:[%s1063_s10] sm:$0xff]  ;;  %s2466_s6 = sshll.u32 %s4183_s8, 1  ;;  %s2211_s10 = sshll.u32 %s3809_s23, 4  ;;  %s4031_s10 = int_to_ptr.vmem [resolvable:$true] %s2211_s10 }
 0x3ba   : > { %2602 = vmatprep.subr.bf16.mxu0 %v3342_v39 }
 0x3bb   : > { %2619 = vmatpush3.bf16.xpose.msra.mxu1 %v1190_v51 }
 0x3bc   : > { %2624 = vmatprep.subr.bf16.mxu1 %v3342_v39 }
 0x3bd   : > { %2603 = vmatpush3.bf16.msra.mxu0 %v2905_v42 }
 0x3be   : > { %2604 = vmatprep.subr.bf16.mxu0 %v3342_v39 }
 0x3c1   : > { %2605 = vmatpush3.bf16.msra.mxu0 %v2906_v45 }
 0x3c2   : > { %2606 = vmatprep.subr.bf16.mxu0 %v3342_v39 }
 0x3c5   : > { %2607 = vmatpush3.bf16.msra.mxu0 %v2907_v46 }
 0x3c6   : > { %2608 = vmatprep.subr.bf16.mxu0 %v3342_v39 }
 0x3c9   : > { %2609 = vmatpush3.bf16.msra.mxu0 %v2908_v47 }
 0x3ca   : > { %2610 = vmatprep.subr.bf16.mxu0 %v3342_v39 }
 0x3cd   : > { %2611 = vmatpush3.bf16.msra.mxu0 %v2909_v48 }
 0x3ce   : > { %2640 = vmatprep.subr.bf16.mxu0 %v3342_v39 }
 0x3d0   : > { %2613 = vmatmul.mubr.bf16.vlgmr.msra.gmra.mrb[0].mxu0 %v1064_v49 }
 0x3d1   : > { %2644 = vmatprep.mubr.msk.bf16.mxu0 %vm3343_vm1, %v3342_v39 }
 0x4a3   : > { %v1170_v53 = vpop.f32.mrb[0].mxu0 }
 0x4a4   : > { %v1171_v54 = vadd.f32 %v2404_v52, %v1170_v53  ;;  %v2614_v55 = vpop.f32.mrb[1].mxu0 }
 0x4a5   : > { %v1173_v56 = vpop.f32.mrb[2].mxu0 }
 0x4a6   : > { %v1174_v57 = vadd.f32 %v2404_v52, %v1173_v56  ;;  %v2615_v58 = vpop.f32.mrb[3].mxu0  ;;  %v1177_v59 = vmul.f32 0.17677669, %v1171_v54 }
 0x4a8   : > { %v1178_v60 = vmul.f32 0.17677669, %v1174_v57 }
 0x4aa   : > { %v3892_v61 = vpack.c.bf16 %v1178_v60, %v1177_v59 }
 0x4ac   : > { %2621 = vmatmul.mubr.msk.bf16.vlgmr.msra.gmra.mrb[0].mxu1 %vm1182_vm2, %v3892_v61 }
 0x4ad   : > { %2628 = vmatprep.mubr.msk.bf16.mxu1 %vm3343_vm1, %v3342_v39  ;;  %2625 = vmatpush3.bf16.msra.mxu1 %v1256_v14 }
 0x4ae   : > { %2626 = vmatprep.subr.bf16.mxu1 %v3342_v39 }
 0x4b1   : > { %2627 = vmatpush3.bf16.msra.mxu1 %v1257_v15 }
 0x4b2   : > { %2632 = vmatprep.subr.bf16.mxu1 %v3342_v39 }
 0x57f   : > { %v1226_v62 = vpop.f32.mrb[0].mxu1 }
 0x580   : > { %v2622_v63 = vpop.f32.mrb[1].mxu1  ;;  %v1233_v2 = vsel %vm1182_vm2, %v1226_v62, -inf }
 0x581   : > { %1234 = vmax.xlane.f32.xlu0 %v1233_v2  ;;  %v1229_v3 = vpop.f32.mrb[2].mxu1  ;;  %v1517_v63 = vld [vmem:[#allocation4 + $0x28] sm:$0xff] }
 0x582   : > { %v2623_v4 = vpop.f32.mrb[3].mxu1  ;;  %v1236_v5 = vsel %vm1182_vm2, %v1229_v3, -inf }
 0x585   : > { %1237 = vmax.xlane.f32.xlu0 %v1236_v5 }
 0x59b   : > { %1308 = vrot.lane.b32.xlu0 %v3892_v61, %s3344_s14 }
 0x60e   : > { %v1235_v6 = vpop.xlane.xlu0 %1234 }
 0x60f   : > { %v1239_v7 = vsub.f32 %v1226_v62, %v1235_v6  ;;  %v1516_v62 = vld [vmem:[#allocation4 + $0x20] sm:$0xff]  ;;  %v1570_v6 = vld [vmem:[#allocation3 + $0x30] sm:$0xff] }
 0x611   : > { %v1241_v8 = vmul.f32 1.442695, %v1239_v7 }
 0x612   : > { %v1238_v0 = vpop.xlane.xlu0 %1237 }
 0x613   : > { %2958 = vpow2.f32 %v1241_v8  ;;  %v1240_v9 = vsub.f32 %v1229_v3, %v1238_v0 }
 0x615   : > { %v1243_v10 = vmul.f32 1.442695, %v1240_v9  ;;  %v1578_v9 = vsel %vm1182_vm2, %v1570_v6, 0  ;;  %v2911_v6 = vld [vmem:[#allocation14 + $0x8] sm:$0xff]  }
 0x616   : > { %v1309_v29 = vpop.permute.xlu0 %1308 }
 0x617   : > { %2960 = vpow2.f32 %v1243_v10 }
 0x61d   : > { %v2959_v11 = vpop.eup %2958 }
 0x61e   : > { %v1245_v12 = vsel %vm1182_vm2, %v2959_v11, 0.0 }
 0x61f   : > { %1246 = vadd.xlane.f32.xlu1 %v1245_v12 }
 0x621   : > { %v2961_v1 = vpop.eup %2960 }
 0x622   : > { %v1248_v13 = vsel %vm1182_vm2, %v2961_v1, 0.0 }
 0x623   : > { %1249 = vadd.xlane.f32.xlu1 %v1248_v13 }
 0x634   : > { %1440 = vrot.lane.b32.xlu1 %v3892_v61, %s3345_s4 }
 0x6ac   : > { %v1247_v16 = vpop.xlane.xlu1 %1246 }
 0x6ad   : > { %2962 = vrcp.f32 %v1247_v16 }
 0x6b0   : > { %v1250_v17 = vpop.xlane.xlu1 %1249 }
 0x6b1   : > { %2964 = vrcp.f32 %v1250_v17 }
 0x6b4   : > { %v1441_v32 = vpop.permute.xlu1 %1440 }
 0x6b7   : > { %v2963_v18 = vpop.eup %2962 }
 0x6b8   : > { %v1253_v21 = vmul.f32 %v2963_v18, %v2959_v11 }
 0x6bb   : > { %v2965_v19 = vpop.eup %2964 }
 0x6bc   : > { %v1254_v22 = vmul.f32 %v2965_v19, %v2961_v1 }
 0x6be   : > { %v1255_v23 = vpack.c.bf16 %v1254_v22, %v1253_v21 }
 0x6c0   : > { %2629 = vmatmul.mubr.msk.bf16.vlgmr.msra.gmra.mrb[4].mxu1 %vm1182_vm2, %v1255_v23 }
 0x6c1   : > { %2633 = vmatpush3.bf16.xpose.msra.mxu1 %v1314_v24  ;;  %2636 = vmatprep.mubr.msk.bf16.mxu1 %vm3343_vm1, %v3342_v39 }
 0x6c2   : > { %2634 = vmatprep.subr.bf16.mxu1 %v3342_v39 }
 0x6c9   : > { %2635 = vmatpush3.bf16.xpose.msra.mxu1 %v1317_v26 }
 0x6ca   : > { %2648 = vmatprep.subr.bf16.mxu1 %v3342_v39 }
 0x6d0   : > { %2637 = vmatmul.mubr.msk.bf16.vlgmr.msra.gmra.mrb[8].mxu1 %vm1182_vm2, %v1309_v29 }
 0x6d1   : > { %2649 = vmatpush3.bf16.xpose.msra.mxu1 %v1446_v28  ;;  %2652 = vmatprep.mubr.msk.bf16.mxu1 %vm3343_vm1, %v3342_v39 }
 0x6d2   : > { %2650 = vmatprep.subr.bf16.mxu1 %v3342_v39 }
 0x6d9   : > { %2651 = vmatpush3.bf16.xpose.msra.mxu1 %v1449_v31 }
 0x6da   : > { %2656 = vmatprep.subr.bf16.mxu1 %v3342_v39 }
 0x6e0   : > { %2653 = vmatmul.mubr.msk.bf16.vlgmr.msra.gmra.mrb[12].mxu1 %vm1182_vm2, %v1441_v32  ;;  %v1384_v32 = vld [vmem:[#allocation4 + $0x10] sm:$0xff] }
 0x6e1   : > { %2660 = vmatprep.mubr.msk.bf16.mxu1 %vm3343_vm1, %v3342_v39  ;;  %2657 = vmatpush3.bf16.msra.mxu1 %v1516_v62 }
 0x6e2   : > { %2658 = vmatprep.subr.bf16.mxu1 %v3342_v39  ;;  %2641 = vmatpush3.bf16.msra.mxu0 %v1384_v32  ;;  %v2921_v32 = vld [vmem:[#allocation15 + $0x10] ss:$8 sps:$4 sm:$0xff]  }
 0x6e3   : > { %2642 = vmatprep.subr.bf16.mxu0 %v3342_v39 }
 0x6e5   : > { %2659 = vmatpush3.bf16.msra.mxu1 %v1517_v63 }
 0x6e6   : > { %2664 = vmatprep.subr.bf16.mxu1 %v3342_v39 }
 0x793   : > { %v1295_v33 = vpop.f32.mrb[4].mxu1 }
 0x794   : > { %v2630_v34 = vpop.f32.mrb[5].mxu1 }
 0x795   : > { %v1298_v35 = vpop.f32.mrb[6].mxu1 }
 0x796   : > { %v1302_v36 = vpack.c.bf16 %v1298_v35, %v1295_v33  ;;  %v2631_v37 = vpop.f32.mrb[7].mxu1  ;;  %v1385_v33 = vld [vmem:[#allocation4 + $0x18] sm:$0xff] }
 0x797   : > { %2643 = vmatpush3.bf16.msra.mxu0 %v1385_v33 }
 0x798   : > { %1303 = vst.msk [vmem:[#allocation5] sm:$0xff] %vm1182_vm2, %v1302_v36  ;;  %2672 = vmatprep.subr.bf16.mxu0 %v3342_v39 }
 0x7a3   : > { %v3926_v38 = vpop.f32.mrb[8].mxu1 }
 0x7a4   : > { %v2638_v40 = vpop.f32.mrb[9].mxu1  ;;  %v1360_v59 = vsel %vm1182_vm2, %v3926_v38, -inf }
 0x7a5   : > { %v3928_v41 = vpop.f32.mrb[10].mxu1 }
 0x7a6   : > { %v2639_v42 = vpop.f32.mrb[11].mxu1  ;;  %v1363_v60 = vsel %vm1182_vm2, %v3928_v41, -inf }
 0x7b3   : > { %v1485_v43 = vpop.f32.mrb[12].mxu1 }
 0x7b4   : > { %v2654_v44 = vpop.f32.mrb[13].mxu1  ;;  %v1492_v45 = vsel %vm1182_vm2, %v1485_v43, -inf }
 0x7b5   : > { %1493 = vmax.xlane.f32.xlu1 %v1492_v45  ;;  %v1488_v46 = vpop.f32.mrb[14].mxu1 }
 0x7b6   : > { %v2655_v47 = vpop.f32.mrb[15].mxu1  ;;  %v1495_v48 = vsel %vm1182_vm2, %v1488_v46, -inf }
 0x7b7   : > { %1496 = vmax.xlane.f32.xlu0 %v1495_v48 }
 0x842   : > { %v1494_v49 = vpop.xlane.xlu1 %1493 }
 0x843   : > { %v1498_v50 = vsub.f32 %v1485_v43, %v1494_v49 }
 0x844   : > { %v1497_v51 = vpop.xlane.xlu0 %1496 }
 0x845   : > { %v1500_v52 = vmul.f32 1.442695, %v1498_v50  ;;  %v1499_v53 = vsub.f32 %v1488_v46, %v1497_v51 }
 0x847   : > { %2966 = vpow2.f32 %v1500_v52  ;;  %v1502_v54 = vmul.f32 1.442695, %v1499_v53  ;;  %v1648_v52 = vld [vmem:[#allocation4 + $0x30] sm:$0xff]  ;;  %v1649_v53 = vld [vmem:[#allocation4 + $0x38] sm:$0xff] }
 0x849   : > { %2968 = vpow2.f32 %v1502_v54 }
 0x851   : > { %v2967_v55 = vpop.eup %2966 }
 0x852   : > { %v1504_v56 = vsel %vm1182_vm2, %v2967_v55, 0.0 }
 0x853   : > { %v2969_v57 = vpop.eup %2968  ;;  %1505 = vadd.xlane.f32.xlu0 %v1504_v56 }
 0x854   : > { %v1507_v58 = vsel %vm1182_vm2, %v2969_v57, 0.0 }
 0x855   : > { %1508 = vadd.xlane.f32.xlu1 %v1507_v58 }
 0x859   : > { %1361 = vmax.xlane.f32.xlu1 %v1360_v59 }
 0x85d   : > { %1364 = vmax.xlane.f32.xlu1 %v1363_v60 }
 0x869   : > { %1572 = vrot.lane.b32.xlu0 %v3892_v61, %s3346_s12  ;;  %v1571_v61 = vld [vmem:[#allocation3 + $0x38] sm:$0xff] }
 0x86a   : > { %v1581_v10 = vsel %vm1182_vm2, %v1571_v61, 0 }
 0x8e0   : > { %v1506_v2 = vpop.xlane.xlu0 %1505 }
 0x8e1   : > { %2970 = vrcp.f32 %v1506_v2 }
 0x8e2   : > { %v1509_v3 = vpop.xlane.xlu1 %1508 }
 0x8e3   : > { %2972 = vrcp.f32 %v1509_v3 }
 0x8e4   : > { %v1573_v11 = vpop.permute.xlu0 %1572 }
 0x8e6   : > { %v1362_v12 = vpop.xlane.xlu1 %1361 }
 0x8e7   : > { %v1366_v17 = vsub.f32 %v3926_v38, %v1362_v12  ;;  %v2917_v12 = vld [vmem:[#allocation14 + $0x38] sm:$0xff]  }
 0x8e9   : > { %v1368_v19 = vmul.f32 1.442695, %v1366_v17 }
 0x8ea   : > { %v1365_v18 = vpop.xlane.xlu1 %1364 }
 0x8eb   : > { %v2971_v4 = vpop.eup %2970  ;;  %v1367_v20 = vsub.f32 %v3928_v41, %v1365_v18  ;;  %2974 = vpow2.f32 %v1368_v19  ;;  %v2421_v19 = vld [vmem:[%s4185_s27] ss:$0 sm:$0xff]  ;;  %s4189_s27 = sld [smem:[#allocation26_spill]] }
 0x8ec   : > { %v1512_v7 = vmul.f32 %v2971_v4, %v2967_v55 }
 0x8ed   : > { %v2973_v5 = vpop.eup %2972  ;;  %v1370_v21 = vmul.f32 1.442695, %v1367_v20 }
 0x8ee   : > { %v1513_v8 = vmul.f32 %v2973_v5, %v2969_v57  ;;  %v2910_v5 = vld [vmem:[#allocation14] sm:$0xff]  }
 0x8ef   : > { %2976 = vpow2.f32 %v1370_v21 }
 0x8f0   : > { %v1514_v0 = vpack.c.bf16 %v1513_v8, %v1512_v7  ;;  %v2912_v7 = vld [vmem:[#allocation14 + $0x10] sm:$0xff]   ;;  %v2913_v8 = vld [vmem:[#allocation14 + $0x18] sm:$0xff]  }
 0x8f1   : > { %s2467_s21 = sshll.u32 %s4189_s27, 2  ;;  %s4191_s27 = sld [smem:[#allocation42_spill]] }
 0x8f2   : > { %2661 = vmatmul.mubr.msk.bf16.vlgmr.msra.gmra.mrb[16].mxu1 %vm1182_vm2, %v1514_v0  ;;  %v2914_v0 = vld [vmem:[#allocation14 + $0x20] sm:$0xff]  }
 0x8f3   : > { %2665 = vmatpush3.bf16.xpose.msra.mxu1 %v1578_v9  ;;  %2668 = vmatprep.mubr.msk.bf16.mxu1 %vm3343_vm1, %v3342_v39  ;;  %v2915_v9 = vld [vmem:[#allocation14 + $0x28] sm:$0xff]  }
 0x8f4   : > { %2666 = vmatprep.subr.bf16.mxu1 %v3342_v39 }
 0x8f5   : > { %v2975_v28 = vpop.eup %2974 }
 0x8f6   : > { %v1372_v29 = vsel %vm1182_vm2, %v2975_v28, 0.0 }
 0x8f7   : > { %s4192_s3 = smov %s4191_s27 }
 0x8f9   : > { %v2977_v30 = vpop.eup %2976 }
 0x8fa   : > { %v1375_v31 = vsel %vm1182_vm2, %v2977_v30, 0.0 }
 0x8fb   : > { %2667 = vmatpush3.bf16.xpose.msra.mxu1 %v1581_v10 }
 0x902   : > { %2669 = vmatmul.mubr.msk.bf16.vlgmr.msra.gmra.mrb[20].mxu1 %vm1182_vm2, %v1573_v11  ;;  %v2916_v11 = vld [vmem:[#allocation14 + $0x30] sm:$0xff]  }
 0x9c5   : > { %v3949_v1 = vpop.f32.mrb[16].mxu1 }
 0x9c6   : > { %v2662_v13 = vpop.f32.mrb[17].mxu1 }
 0x9c7   : > { %v3951_v14 = vpop.f32.mrb[18].mxu1 }
 0x9c8   : > { %v1562_v15 = vpack.c.bf16 %v3951_v14, %v3949_v1  ;;  %v2663_v16 = vpop.f32.mrb[19].mxu1 }
 0x9d5   : > { %v1617_v22 = vpop.f32.mrb[20].mxu1 }
 0x9d6   : > { %v2670_v23 = vpop.f32.mrb[21].mxu1  ;;  %v1624_v24 = vsel %vm1182_vm2, %v1617_v22, -inf }
 0x9d7   : > { %1625 = vmax.xlane.f32.xlu1 %v1624_v24  ;;  %v1620_v25 = vpop.f32.mrb[22].mxu1  ;;  %v1059_v23 = vld [vmem:[%s1057_s20 + $0x8] sm:$0xff] }
 0x9d8   : > { %v2671_v26 = vpop.f32.mrb[23].mxu1  ;;  %v1627_v27 = vsel %vm1182_vm2, %v1620_v25, -inf }
 0x9db   : > { %1628 = vmax.xlane.f32.xlu1 %v1627_v27 }
 0x9df   : > { %1373 = vadd.xlane.f32.xlu1 %v1372_v29  ;;  %v2918_v29 = vld [vmem:[#allocation15] ss:$8 sps:$4 sm:$0xff]  }
 0x9e3   : > { %1376 = vadd.xlane.f32.xlu1 %v1375_v31  ;;  %v2923_v31 = vld [vmem:[#allocation15 + $0x14] ss:$8 sps:$4 sm:$0xff]  }
 0xa64   : > { %v1626_v34 = vpop.xlane.xlu1 %1625 }
 0xa65   : > { %v1630_v35 = vsub.f32 %v1617_v22, %v1626_v34 }
 0xa67   : > { %v1632_v36 = vmul.f32 1.442695, %v1630_v35 }
 0xa68   : > { %v1629_v37 = vpop.xlane.xlu1 %1628 }
 0xa69   : > { %2978 = vpow2.f32 %v1632_v36  ;;  %v1631_v38 = vsub.f32 %v1620_v25, %v1629_v37 }
 0xa6b   : > { %v1634_v40 = vmul.f32 1.442695, %v1631_v38 }
 0xa6c   : > { %v1374_v41 = vpop.xlane.xlu1 %1373 }
 0xa6d   : > { %2980 = vpow2.f32 %v1634_v40 }
 0xa6e   : > { %2982 = vrcp.f32 %v1374_v41 }
 0xa70   : > { %v1377_v42 = vpop.xlane.xlu1 %1376 }
 0xa71   : > { %2984 = vrcp.f32 %v1377_v42  ;;  %v2926_v42 = vld [vmem:[#allocation15 + $0x24] ss:$8 sps:$4 sm:$0xff]  }
 0xa73   : > { %v2979_v43 = vpop.eup %2978 }
 0xa74   : > { %v1636_v44 = vsel %vm1182_vm2, %v2979_v43, 0.0 }
 0xa75   : > { %1637 = vadd.xlane.f32.xlu0 %v1636_v44  ;;  %v2929_v44 = vld [vmem:[#allocation15 + $0x34] ss:$8 sps:$4 sm:$0xff]  }
 0xa77   : > { %v2981_v45 = vpop.eup %2980 }
 0xa78   : > { %v1639_v46 = vsel %vm1182_vm2, %v2981_v45, 0.0  ;;  %v2983_v47 = vpop.eup %2982 }
 0xa79   : > { %1640 = vadd.xlane.f32.xlu1 %v1639_v46  ;;  %v1380_v49 = vmul.f32 %v2983_v47, %v2975_v28  ;;  %v2932_v46 = vld [vmem:[#allocation15 + $0x44] ss:$8 sps:$4 sm:$0xff]   ;;  %v2930_v47 = vld [vmem:[#allocation15 + $0x40] ss:$8 sps:$4 sm:$0xff]  }
 0xa7b   : > { %v2985_v48 = vpop.eup %2984 }
 0xa7c   : > { %v1381_v50 = vmul.f32 %v2985_v48, %v2977_v30  ;;  %v2920_v30 = vld [vmem:[#allocation15 + $0x4] ss:$8 sps:$4 sm:$0xff]   ;;  %v2935_v48 = vld [vmem:[#allocation15 + $0x54] ss:$8 sps:$4 sm:$0xff]  }
 0xa7d   : > { %1966 = vmatprep.subr.bf16.mxu1 %v2920_v30 }
 0xa7e   : > { %v1382_v51 = vpack.c.bf16 %v1381_v50, %v1380_v49  ;;  %1967 = vmatpush1.bf16.msra.mxu1 %v2918_v29  ;;  %v2933_v49 = vld [vmem:[#allocation15 + $0x50] ss:$8 sps:$4 sm:$0xff]   ;;  %v2938_v50 = vld [vmem:[#allocation15 + $0x64] ss:$8 sps:$4 sm:$0xff]  }
 0xa7f   : > { %1968 = vmatprep.subr.bf16.mxu1 %v2923_v31 }
 0xa80   : > { %2645 = vmatmul.mubr.msk.bf16.vlgmr.msra.gmra.mrb[4].mxu0 %vm1182_vm2, %v1382_v51  ;;  %v2936_v51 = vld [vmem:[#allocation15 + $0x60] ss:$8 sps:$4 sm:$0xff]  }
 0xa81   : > { %2676 = vmatprep.mubr.msk.bf16.mxu0 %vm3343_vm1, %v3342_v39  ;;  %2673 = vmatpush3.bf16.msra.mxu0 %v1648_v52  ;;  %v2941_v52 = vld [vmem:[#allocation15 + $0x74] ss:$8 sps:$4 sm:$0xff]  }
 0xa82   : > { %2674 = vmatprep.subr.bf16.mxu0 %v3342_v39  ;;  %1969 = vmatpush1.bf16.msra.mxu1 %v2921_v32 }
 0xa83   : > { %1970 = vmatprep.subr.bf16.mxu1 %v2926_v42 }
 0xa85   : > { %2675 = vmatpush3.bf16.msra.mxu0 %v1649_v53  ;;  %v2939_v53 = vld [vmem:[#allocation15 + $0x70] ss:$8 sps:$4 sm:$0xff]  }
 0xa86   : > { %2680 = vmatprep.subr.bf16.mxu0 %v3342_v39 }
 0xb02   : > { %v1638_v54 = vpop.xlane.xlu0 %1637 }
 0xb03   : > { %2986 = vrcp.f32 %v1638_v54  ;;  %v3347_v54 = vmov 0  }
 0xb04   : > { %1998 = vmatprep.mubr.bf16.mxu1 %v3347_v54 }
 0xb06   : > { %v1641_v55 = vpop.xlane.xlu1 %1640 }
 0xb07   : > { %2988 = vrcp.f32 %v1641_v55  ;;  %v2942_v55 = vld [vmem:[#allocation17 + $0x40] sm:$0xff]  }
 0xb0d   : > { %v2987_v56 = vpop.eup %2986 }
 0xb0e   : > { %v1644_v58 = vmul.f32 %v2987_v56, %v2979_v43  ;;  %v2924_v43 = vld [vmem:[#allocation15 + $0x20] ss:$8 sps:$4 sm:$0xff]  }
 0xb0f   : > { %1971 = vmatpush1.bf16.msra.mxu1 %v2924_v43  ;;  %v2943_v56 = vld [vmem:[#allocation17] sm:$0xff]  }
 0xb10   : > { %1972 = vmatprep.subr.bf16.mxu1 %v2929_v44 }
 0xb11   : > { %v2989_v57 = vpop.eup %2988 }
 0xb12   : > { %v1645_v59 = vmul.f32 %v2989_v57, %v2981_v45  ;;  %v2927_v45 = vld [vmem:[#allocation15 + $0x30] ss:$8 sps:$4 sm:$0xff]   ;;  %v2944_v57 = vld [vmem:[#allocation17 + $0x48] sm:$0xff]  }
 0xb13   : > { %1973 = vmatpush1.bf16.msra.mxu1 %v2927_v45 }
 0xb14   : > { %v1646_v60 = vpack.c.bf16 %v1645_v59, %v1644_v58  ;;  %1974 = vmatprep.subr.bf16.mxu1 %v2932_v46  ;;  %v2945_v58 = vld [vmem:[#allocation17 + $0x8] sm:$0xff]   ;;  %v2946_v59 = vld [vmem:[#allocation17 + $0x50] sm:$0xff]  }
 0xb16   : > { %2677 = vmatmul.mubr.msk.bf16.vlgmr.msra.gmra.mrb[8].mxu0 %vm1182_vm2, %v1646_v60  ;;  %v2947_v60 = vld [vmem:[#allocation17 + $0x10] sm:$0xff]  }
 0xb17   : > { %2696 = vmatprep.mubr.msk.bf16.mxu0 %vm3343_vm1, %v3342_v39  ;;  %2681 = vmatpush3.bf16.msra.mxu0 %v2910_v5 }
 0xb18   : > { %2682 = vmatprep.subr.bf16.mxu0 %v3342_v39  ;;  %1975 = vmatpush1.bf16.msra.mxu1 %v2930_v47 }
 0xb19   : > { %1976 = vmatprep.subr.bf16.mxu1 %v2935_v48 }
 0xb1b   : > { %2683 = vmatpush3.bf16.msra.mxu0 %v2911_v6 }
 0xb1c   : > { %2684 = vmatprep.subr.bf16.mxu0 %v3342_v39  ;;  %1977 = vmatpush1.bf16.msra.mxu1 %v2933_v49 }
 0xb1d   : > { %1978 = vmatprep.subr.bf16.mxu1 %v2938_v50 }
 0xb1f   : > { %2685 = vmatpush3.bf16.msra.mxu0 %v2912_v7 }
 0xb20   : > { %2686 = vmatprep.subr.bf16.mxu0 %v3342_v39  ;;  %1979 = vmatpush1.bf16.msra.mxu1 %v2936_v51 }
 0xb21   : > { %1980 = vmatprep.subr.bf16.mxu1 %v2941_v52 }
 0xb23   : > { %2687 = vmatpush3.bf16.msra.mxu0 %v2913_v8 }
 0xb24   : > { %2688 = vmatprep.subr.bf16.mxu0 %v3342_v39  ;;  %1981 = vmatpush1.bf16.msra.mxu1 %v2939_v53 }
 0xb27   : > { %2689 = vmatpush3.bf16.msra.mxu0 %v2914_v0 }
 0xb28   : > { %2690 = vmatprep.subr.bf16.mxu0 %v3342_v39 }
 0xb2b   : > { %2691 = vmatpush3.bf16.msra.mxu0 %v2915_v9 }
 0xb2c   : > { %2692 = vmatprep.subr.bf16.mxu0 %v3342_v39 }
 0xb2f   : > { %2693 = vmatpush3.bf16.msra.mxu0 %v2916_v11  ;;  %v2430_v11 = vld [vmem:[%s4186_s2] ss:$0 sm:$0xff] }
 0xb30   : > { %2694 = vmatprep.subr.bf16.mxu0 %v3342_v39  ;;  %v1058_v39 = vld [vmem:[%s1057_s20] sm:$0xff] }
 0xb33   : > { %2695 = vmatpush3.bf16.msra.mxu0 %v2917_v12 }
 0xb34   : > { %2534 = vmatprep.subr.bf16.mxu0 %v2942_v55 }
 0xb53   : > { %v1423_v62 = vpop.f32.mrb[4].mxu0 }
 0xb54   : > { %v2646_v63 = vpop.f32.mrb[5].mxu0 }
 0xb55   : > { %v1426_v2 = vpop.f32.mrb[6].mxu0  ;;  %v2949_v63 = vld [vmem:[#allocation17 + $0x18] sm:$0xff]  }
 0xb56   : > { %v1430_v3 = vpack.c.bf16 %v1426_v2, %v1423_v62  ;;  %v2647_v4 = vpop.f32.mrb[7].mxu0  ;;  %v2948_v62 = vld [vmem:[#allocation17 + $0x58] sm:$0xff]   ;;  %v2950_v2 = vld [vmem:[#allocation17 + $0x60] sm:$0xff]  }
 0xb57   : > { %v2952_v4 = vld [vmem:[#allocation17 + $0x68] sm:$0xff]  }
 0xb58   : > { %1432 = vrot.lane.b32.xlu1 %v1430_v3, %s3346_s12  ;;  %v2951_v3 = vld [vmem:[#allocation17 + $0x20] sm:$0xff]   ;;  %s4187_s12 = sld [smem:[#allocation41_spill]] }
 0xb5c   : > { %1564 = vrot.lane.b32.xlu1 %v1562_v15, %s3345_s4  ;;  %s4190_s4 = sld [smem:[#allocation37_spill]] }
 0xb62   : > { %v2448_v48 = vld [vmem:[%s4190_s4] ss:$0 sm:$0xff]  ;;  %s3348_s4 = smov [#allocation18]  }
 0xbca   : > { %v1433_v61 = vpop.permute.xlu1 %1432 }
 0xbcb   : > { %1436 = vst.msk [vmem:[#allocation5] sm:$0xff] %vm1435_vm3, %v1433_v61 }
 0xbce   : > { %v1565_v10 = vpop.permute.xlu1 %1564 }
 0xbcf   : > { %1568 = vst.msk [vmem:[#allocation5] sm:$0xff] %vm1567_vm4, %v1565_v10 }
 0xbe9   : > { %v1687_v1 = vpop.f32.mrb[8].mxu0 }
 0xbea   : > { %v2678_v13 = vpop.f32.mrb[9].mxu0 }
 0xbeb   : > { %v1690_v14 = vpop.f32.mrb[10].mxu0 }
 0xbec   : > { %v1694_v15 = vpack.c.bf16 %v1690_v14, %v1687_v1  ;;  %v2679_v16 = vpop.f32.mrb[11].mxu0  ;;  %v2431_v14 = vld [vmem:[%s4187_s12] ss:$0 sm:$0xff]  ;;  %s2208_s12 = sadd.s32 %s2467_s21, %s2466_s6  ;;  %s4193_s6 = sand.u32 1, %s3290_s25  }
 0xbed   : > { %s2468_s20 = sshll.u32 %s2208_s12, 7  ;;  %s4038_s21 = scalar_lea.sflag [#allocation8], %s4193_s6 }
 0xbee   : > { %1696 = vrot.lane.b32.xlu1 %v1694_v15, %s3344_s14  ;;  %s4029_s2 = scalar_lea.hbm %s4191_s27, %s2468_s20  ;;  %s3192_s14 = scalar_lea.vmem %s4031_s10, 256 }
 0xbef   : > { %p3193_p13 = scmp.ne.s32.totalorder %s4031_s10, %s3192_s14  ;;  %s3196_s12 = sshll.u32 %s3348_s4, 4  ;;  %s3197_s12 = int_to_ptr.vmem [resolvable:$false] %s3196_s12 }
 0xbf0   : > { %s3198_s20 = scalar_lea.vmem %s3197_s12, 512  ;;  %p3199_p12 = scmp.lt.s32.totalorder %s4031_s10, %s3197_s12 }
 0xbf1   : > { %p3194_p9 = pnand %p3193_p13, %p4194_p6  ;;  %p3200_p1 = scmp.lt.s32.totalorder %s3198_s20, %s3192_s14 }
 0xbf3   : > { %p3195_p11 = pneg %p3194_p9  ;;  %p3201_p0 = por %p3200_p1, %p3199_p12 }
 0xbf5   : > { %p3202_p7 = pnand %p3201_p0, %p3195_p11 }
 0xc60   : > { %v1697_v17 = vpop.permute.xlu1 %1696 }
 0xc61   : > { %1700 = vst.msk [vmem:[#allocation5] sm:$0xff] %vm1699_vm5, %v1697_v17 }
 0xc68   : > { %v1701_v18 = vld [vmem:[#allocation5] sm:$0xff] }
 0xc69   : > { %2697 = vmatmul.mubr.bf16.vlgmr.msra.gmra.mrb[12].mxu0 %v1701_v18 }
 0xc6a   : > { %2535 = vmatpush3.bf16.msra.mxu0 %v2943_v56 }
 0xc6b   : > { %2536 = vmatprep.subr.bf16.mxu0 %v2944_v57 }
 0xc6e   : > { %2537 = vmatpush3.bf16.msra.mxu0 %v2945_v58 }
 0xc6f   : > { %2538 = vmatprep.subr.bf16.mxu0 %v2946_v59 }
 0xc72   : > { %2539 = vmatpush3.bf16.msra.mxu0 %v2947_v60 }
 0xc73   : > { %2540 = vmatprep.subr.bf16.mxu0 %v2948_v62 }
 0xc76   : > { %2541 = vmatpush3.bf16.msra.mxu0 %v2949_v63 }
 0xc77   : > { %2542 = vmatprep.subr.bf16.mxu0 %v2950_v2 }
 0xc7a   : > { %2543 = vmatpush3.bf16.msra.mxu0 %v2951_v3 }
 0xc7b   : > { %2544 = vmatprep.subr.bf16.mxu0 %v2952_v4 }
 0xd3c   : > { %v1807_v20 = vpop.f32.mrb[12].mxu0 }
 0xd3d   : > { %v1808_v21 = vadd.f32 %v2421_v19, %v1807_v20  ;;  %v2698_v22 = vpop.f32.mrb[13].mxu0  ;;  %v2955_v20 = vld [vmem:[#allocation17 + $0x30] sm:$0xff]  }
 0xd3e   : > { %v1810_v24 = vpop.f32.mrb[14].mxu0  ;;  %v2957_v22 = vld [vmem:[#allocation17 + $0x38] sm:$0xff]  }
 0xd3f   : > { %v3992_v25 = vadd.f32 %v1808_v21, %v1058_v39  ;;  %v1811_v26 = vadd.f32 %v2421_v19, %v1810_v24  ;;  %v2699_v27 = vpop.f32.mrb[15].mxu0  ;;  %v2953_v19 = vld [vmem:[#allocation17 + $0x28] sm:$0xff]   ;;  %v2954_v39 = vld [vmem:[#allocation17 + $0x70] sm:$0xff]   ;;  %v2956_v21 = vld [vmem:[#allocation17 + $0x78] sm:$0xff]  }
 0xd40   : > { %2545 = vmatpush3.bf16.msra.mxu0 %v2953_v19  ;;  %v1874_v27 = vld [vmem:[%s4188_s24] sm:$0x3] }
 0xd41   : > { %v3994_v28 = vadd.f32 %v1811_v26, %v1059_v23  ;;  %1818 = vadd.xlane.f32.xlu0 %v3992_v25  ;;  %2546 = vmatprep.subr.bf16.mxu0 %v2954_v39  ;;  %v1876_v23 = vlaneseq }
 0xd43   : > { %1820 = vadd.xlane.f32.xlu1 %v3994_v28  ;;  %v1877_v24 = vshrl.u32 %v1876_v23, 7 }
 0xd44   : > { %2547 = vmatpush3.bf16.msra.mxu0 %v2955_v20 }
 0xd45   : > { %2548 = vmatprep.subr.bf16.mxu0 %v2956_v21  ;;  %v1878_v26 = vsub.s32 0, %v1877_v24  ;;  %v1882_v29 = vsub.s32 1, %v1877_v24 }
 0xd47   : > { %v1879_v30 = vrot.slane %v1874_v27, %v1878_v26  ;;  %v1883_v31 = vrot.slane %v1874_v27, %v1882_v29 }
 0xd48   : > { %2549 = vmatpush3.bf16.msra.mxu0 %v2957_v22 }
 0xdce   : > { %v1819_v33 = vpop.xlane.xlu0 %1818 }
 0xdcf   : > { %v1823_v34 = vmul.f32 0.0078125, %v1819_v33 }
 0xdd0   : > { %v1821_v35 = vpop.xlane.xlu1 %1820 }
 0xdd1   : > { %v3999_v36 = vsub.f32 %v3992_v25, %v1823_v34  ;;  %v1824_v37 = vmul.f32 0.0078125, %v1821_v35 }
 0xdd3   : > { %v4002_v38 = vsub.f32 %v3994_v28, %v1824_v37  ;;  %v1827_v40 = vmul.f32 %v3999_v36, %v3999_v36 }
 0xdd5   : > { %1829 = vadd.xlane.f32.xlu0 %v1827_v40  ;;  %v1828_v41 = vmul.f32 %v4002_v38, %v4002_v38 }
 0xdd9   : > { %1831 = vadd.xlane.f32.xlu0 %v1828_v41 }
 0xe62   : > { %v1830_v5 = vpop.xlane.xlu0 %1829 }
 0xe63   : > { %v1833_v6 = vmul.f32 0.0078125, %v1830_v5 }
 0xe65   : > { %v1835_v7 = vadd.f32 1e-05, %v1833_v6 }
 0xe66   : > { %v1832_v8 = vpop.xlane.xlu0 %1831 }
 0xe67   : > { %2990 = vrsqrt.f32 %v1835_v7  ;;  %v1834_v0 = vmul.f32 0.0078125, %v1832_v8 }
 0xe69   : > { %v1836_v9 = vadd.f32 1e-05, %v1834_v0 }
 0xe6b   : > { %2992 = vrsqrt.f32 %v1836_v9 }
 0xe71   : > { %v2991_v61 = vpop.eup %2990 }
 0xe72   : > { %v1839_v10 = vmul.f32 %v2991_v61, %v3999_v36 }
 0xe74   : > { %v1847_v13 = vmul.f32 %v2430_v11, %v1839_v10 }
 0xe75   : > { %v2993_v12 = vpop.eup %2992 }
 0xe76   : > { %v1840_v1 = vmul.f32 %v2993_v12, %v4002_v38  ;;  %v1855_v16 = vadd.f32 %v2431_v14, %v1847_v13 }
 0xe78   : > { %v1848_v15 = vmul.f32 %v2430_v11, %v1840_v1 }
 0xe7a   : > { %v1856_v17 = vadd.f32 %v2431_v14, %v1848_v15 }
 0xe7c   : > { %v1857_v18 = vpack.c.bf16 %v1856_v17, %v1855_v16 }
 0xe7e   : > { %1999 = vmatmul.mubr.bf16.vlgmr.msra.gmra.mrb[24].mxu1 %v1857_v18 }
 0xf51   : > { %v2000_v32 = vpop.f32.mrb[24].mxu1 }
 0xf52   : > { %v2001_v33 = vadd.f32 %v2000_v32, %v1879_v30  ;;  %v2002_v34 = vpop.f32.mrb[25].mxu1 }
 0xf53   : > { %v2003_v35 = vadd.f32 %v2002_v34, %v1883_v31  ;;  %v2004_v36 = vpop.f32.mrb[26].mxu1 }
 0xf54   : > { %v2005_v37 = vadd.f32 %v2004_v36, %v1879_v30  ;;  %v2006_v38 = vpop.f32.mrb[27].mxu1  ;;  %v2009_v41 = vmax.f32 %v2001_v33, 0.0 }
 0xf55   : > { %v2007_v40 = vadd.f32 %v2006_v38, %v1883_v31  ;;  %v2010_v43 = vmax.f32 %v2003_v35, 0.0 }
 0xf56   : > { %v2011_v42 = vmax.f32 %v2005_v37, 0.0 }
 0xf57   : > { %v2012_v44 = vmax.f32 %v2007_v40, 0.0 }
 0xf58   : > { %v2013_v45 = vpack.c.bf16 %v2011_v42, %v2009_v41 }
 0xf59   : > { %v2014_v46 = vpack.c.bf16 %v2012_v44, %v2010_v43 }
 0xf5b   : > { %2182 = vmatprep.mubr.bf16.mxu0 %v2014_v46 }
 0xf5c   : > { %2183 = vmatmul.mubr.bf16.vlgmr.msra.gmra.mrb[16].mxu0 %v2013_v45 }
0x102f   : > { %v2550_v47 = vpop.f32.mrb[16].mxu0 }
0x1030   : > { %v2551_v49 = vpop.f32.mrb[17].mxu0 }
0x1031   : > { %v2552_v50 = vadd.f32 %v2551_v49, %v2550_v47  ;;  %v2553_v51 = vpop.f32.mrb[18].mxu0 }
0x1032   : > { %v2554_v52 = vpop.f32.mrb[19].mxu0 }
0x1033   : > { %v2185_v53 = vadd.f32 %v2552_v50, %v2448_v48  ;;  %v2555_v54 = vadd.f32 %v2554_v52, %v2553_v51 }
0x1035   : > { %v2191_v55 = vadd.f32 %v2185_v53, %v3992_v25  ;;  %v2188_v56 = vadd.f32 %v2555_v54, %v2448_v48 }
0x1037   : > { %2193 = vst [vmem:[%s3809_s23] sm:$0xff] %v2191_v55  ;;  %v2192_v57 = vadd.f32 %v2188_v56, %v3994_v28 }
0x1039   : > { %2194 = vst [vmem:[%s3809_s23 + $0x8] sm:$0xff] %v2192_v57 }
0x103a   : > { %3205 = shalt.err (!%p3202_p7)
}
0x103b   : > { %s3206_s23 = scalar_lea.hbm %s4029_s2, 256  ;;  %s3210_s27 = scalar_lea.hbm %s4192_s3, 1024 }
0x103c   : > { %p3207_p2 = scmp.ne.s32.totalorder %s4029_s2, %s3206_s23  ;;  %p3211_p3 = scmp.lt.u32.totalorder %s4029_s2, %s4192_s3 }
0x103d   : > { %p3212_p8 = scmp.lt.u32.totalorder %s3210_s27, %s3206_s23  ;;  %p3214_p13 = scmp.lt.u32.totalorder %s3206_s23, %s4029_s2 }
0x103e   : > { %p3208_p4 = pnand %p3207_p2, %p4194_p6 }
0x103f   : > { %p3213_p5 = por %p3212_p8, %p3211_p3 }
0x1040   : > { %p3209_p10 = pneg %p3208_p4 }
0x1041   : > { %p3215_p9 = por %p3214_p13, %p3213_p5 }
0x1043   : > { %p3216_p11 = pnand %p3215_p9, %p3209_p10 }
0x1045   : > { %3219 = shalt.err (!%p3216_p11)
}
0x1046   : > { %s3349_s14 = smov 128   ;;  %s3350_s12 = smov 8  }
0x1047   : > { %2726 = dma.vmem_to_hbm [thread:$0]  (%p4194_p6), %s4031_s10, 256, %s4029_s2, %s4038_s21, %s3349_s14, %s3349_s14, %s3350_s12  }
0x1048 PF: > { %s4195_s20 = sld [smem:[#allocation24_spill]]  ;;  %p2768_p12 = scmp.ge.s32.totalorder %s3326_s1, 2 }
0x1049   : > { %p4196_p1 = scmp.ne.s32.totalorder %s4170_s13, 0 }
0x104b   : > { %p2752_p0 = pnand %p2768_p12, %p4196_p1 }
0x104e   : > { %s2226_s8 = sand.u32 1, %s4195_s20  }
0x104f   : > { %s2227_s23 = scalar_lea.sflag [#allocation8], %s2226_s8 }
0x1050   : > { %3281 = dma.done.wait (!%p2752_p0), %s2227_s23, 256  }
0x1051   : > { %3283 = vsyncadd (!%p2752_p0), %s2227_s23, 4294967040  ;;  %s36_s1 = sadd.s32 1, %s3326_s1   ;;  %s4197_s22 = smov %s4209_s30 }
0x1052   : > { %p33_p7 = scmp.ge.s32.totalorder %s36_s1, 6   ;;  %s4198_s24 = smov %s3290_s25 }
0x1053   : > { %s4199_s25 = smov %s3294_s26  ;;  %s4200_s26 = smov %s3722_s16 }
0x1054   : > { %s4201_s27 = smov %s3302_s28  ;;  %s4202_s28 = smov %s3306_s29 }
0x1055   : > { %s4203_s29 = smov %s3719_s0  ;;  %s4204_s0 = smov %s3318_s18 }
0x1056   : > { %s4205_s30 = smov %s3322_s19  ;;  %s4206_s18 = smov %s4197_s22 }
0x1057   : > { %s4207_s19 = smov %s4213_s17  ;;  %35 = sbr.rel (!%p33_p7) target bundleno = 27 (0x1b), region = 175 }
0x105e   :  { %2232 = vsyncpa [#allocation7], 1 }
0x105f   :  { %2234 = vsyncpa [#allocation7 + $0x1], 1 }
0x1060   :  { %2235 = vsyncpa [#allocation10], 1 }
0x1061   :  { %2236 = vsyncpa [#allocation13], 1 }
0x1062   :  { %2237 = vsyncpa [#allocation16], 1 }
0x1063   :  { %2238 = vsyncpa [#allocation8], 1 }
0x1064   :  { %2240 = vsyncpa [#allocation8 + $0x1], 1 }

// kernel: tpu_custom_call.1
= control target key start
LH: loop header
LB: loop body
LE: loop exit
PB: predicated region body
PF: predicated region fallthrough
CT: control target
= control target key end

     0   :  { %s4099_s0 = inlined_call_operand.hbm [shape: f32[2,32,128], index: 0, kind: input, shape index: {}]   ;;  %s4100_s1 = inlined_call_operand.hbm [shape: bf16[128,128], index: 1, kind: input, shape index: {}]   ;;  %s4101_s2 = inlined_call_operand.vmem [shape: f32[1,128], index: 2, kind: input, shape index: {}]   ;;  %s4102_s3 = inlined_call_operand.hbm [shape: bf16[128,128], index: 3, kind: input, shape index: {}]   ;;  %s4103_s4 = inlined_call_operand.vmem [shape: f32[1,128], index: 4, kind: input, shape index: {}]   ;;  %s4104_s5 = inlined_call_operand.hbm [shape: bf16[128,128], index: 5, kind: input, shape index: {}]   ;;  %s4105_s6 = inlined_call_operand.vmem [shape: f32[1,128], index: 6, kind: input, shape index: {}]   ;;  %s4106_s7 = inlined_call_operand.hbm [shape: bf16[128,128], index: 7, kind: input, shape index: {}]   ;;  %s4107_s8 = inlined_call_operand.vmem [shape: f32[1,128], index: 8, kind: input, shape index: {}]   ;;  %s4108_s9 = inlined_call_operand.hbm [shape: bf16[128,256], index: 9, kind: input, shape index: {}]   ;;  %s4109_s10 = inlined_call_operand.vmem [shape: f32[1,256], index: 10, kind: input, shape index: {}]   ;;  %s4110_s11 = inlined_call_operand.hbm [shape: bf16[256,128], index: 11, kind: input, shape index: {}]   ;;  %s4111_s12 = inlined_call_operand.vmem [shape: f32[1,128], index: 12, kind: input, shape index: {}]   ;;  %s4112_s13 = inlined_call_operand.vmem [shape: f32[1,128], index: 13, kind: input, shape index: {}]   ;;  %s4113_s14 = inlined_call_operand.vmem [shape: f32[1,128], index: 14, kind: input, shape index: {}]   ;;  %s4114_s15 = inlined_call_operand.vmem [shape: f32[1,128], index: 15, kind: input, shape index: {}]   ;;  %s4115_s16 = inlined_call_operand.vmem [shape: f32[1,128], index: 16, kind: input, shape index: {}]   ;;  %s4116_s17 = inlined_call_operand.hbm [shape: f32[2,32,128], index: 17, kind: output, shape index: {}]  }
   0x1   :  { %4135 = sst [smem:[#allocation29_spill]] %s4099_s0 }
   0x2   :  { %4136 = sst [smem:[#allocation30_spill]] %s4100_s1 }
   0x3   :  { %4137 = sst [smem:[#allocation31_spill]] %s4101_s2 }
   0x4   :  { %4138 = sst [smem:[#allocation32_spill]] %s4102_s3 }
   0x5   :  { %4139 = sst [smem:[#allocation33_spill]] %s4103_s4 }
   0x6   :  { %4140 = sst [smem:[#allocation34_spill]] %s4105_s6 }
   0x7   :  { %4141 = sst [smem:[#allocation35_spill]] %s4107_s8 }
   0x8   :  { %4142 = sst [smem:[#allocation36_spill]] %s4109_s10 }
   0x9   :  { %4143 = sst [smem:[#allocation37_spill]] %s4111_s12 }
   0xa   :  { %4144 = sst [smem:[#allocation38_spill]] %s4112_s13 }
   0xb   :  { %4145 = sst [smem:[#allocation39_spill]] %s4113_s14 }
   0xc   :  { %4146 = sst [smem:[#allocation40_spill]] %s4114_s15 }
   0xd   :  { %4147 = sst [smem:[#allocation41_spill]] %s4115_s16 }
   0xe   :  { %4148 = sst [smem:[#allocation42_spill]] %s4116_s17 }
   0xf   :  { %22 = vsyncpa [#allocation7], 0 }
  0x10   :  { %24 = vsyncpa [#allocation7 + $0x1], 0 }
  0x11   :  { %25 = vsyncpa [#allocation10], 0 }
  0x12   :  { %26 = vsyncpa [#allocation13], 0 }
  0x13   :  { %27 = vsyncpa [#allocation16], 0 }
  0x14   :  { %28 = vsyncpa [#allocation8], 0 }
  0x15   :  { %30 = vsyncpa [#allocation8 + $0x1], 0  ;;  %s3441_s24 = smov 0   ;;  %s3443_s25 = smov 0  }
  0x16   :  { %s3445_s26 = smov 0   ;;  %s3447_s27 = smov 0  }
  0x17   :  { %s3449_s28 = smov 0   ;;  %s3451_s29 = smov 0  }
  0x18   :  { %s3453_s0 = smov 0   ;;  %s3455_s30 = smov 0  }
  0x19   :  { %s3457_s18 = smov 0   ;;  %s3459_s19 = smov 0  }
  0x1a   :  { %s3461_s1 = smov 0  }
  0x1b LB: > { %4149 = sst [smem:[#allocation24_spill]] %s3286_s24  ;;  %s2359_s20 = sadd.s32 4294967295, %s3326_s1   ;;  %s3326_s1 = sphi %s3461_s1, %s36_s1   ;;  %s3322_s19 = sphi %s3459_s19, %s4207_s19   ;;  %s3318_s18 = sphi %s3457_s18, %s4206_s18   ;;  %s3314_s30 = sphi %s3455_s30, %s4205_s30   ;;  %s3310_s0 = sphi %s3453_s0, %s4204_s0   ;;  %s3306_s29 = sphi %s3451_s29, %s4203_s29   ;;  %s3302_s28 = sphi %s3449_s28, %s4202_s28   ;;  %s3298_s27 = sphi %s3447_s27, %s4201_s27   ;;  %s3294_s26 = sphi %s3445_s26, %s4200_s26   ;;  %s3290_s25 = sphi %s3443_s25, %s4199_s25   ;;  %s3286_s24 = sphi %s3441_s24, %s4198_s24  }
  0x1c   : > { %4150 = sst [smem:[#allocation25_spill]] %s3310_s0  ;;  %p2361_p0 = scmp.ge.s32.totalorder %s3326_s1, 1 }
  0x1d   : > { %4151 = sst [smem:[#allocation26_spill]] %s3314_s30  ;;  %p3498_p1 = scmp.eq.s32.totalorder %s2359_s20, 0 }
  0x1e   : > { %p3502_p2 = scmp.eq.s32.totalorder %s2359_s20, 3  ;;  %p443_p3 = scmp.lt.s32.totalorder %s3326_s1, 5 }
  0x1f   : > { %s4152_s21 = scalar_select %p3498_p1, 1, 0 }
  0x20   : > { %s4153_s22 = scalar_select %p3502_p2, 1, 0 }
  0x21   : > { %p3507_p4 = pnand %p2361_p0, %p443_p3  ;;  %s3328_s17 = smov [#allocation9]  }
  0x22   : > { %4154 = sst [smem:[#allocation27_spill]] %s4153_s22  ;;  %s455_s12 = sshll.u32 %s3328_s17, 4  ;;  %s3511_s12 = int_to_ptr.vmem [resolvable:$true] %s455_s12 }
  0x23   : > { %s4155_s23 = scalar_select %p3507_p4, 1, 0 }
  0x24   : > { %p2728_p5 = pneg %p3507_p4  ;;  %s3329_s20 = smov [#allocation12]  }
  0x25   : > { %4156 = sst [smem:[#allocation28_spill]] %s4155_s23  ;;  %s487_s10 = sshll.u32 %s3329_s20, 4  ;;  %s3521_s10 = int_to_ptr.vmem [resolvable:$true] %s487_s10 }
  0x26   : > { %p3517_p6 = pnand %p2728_p5, %p3498_p1  ;;  %s3330_s16 = smov [#allocation15]  }
  0x27   : > { %s519_s15 = sshll.u32 %s3330_s16, 4  ;;  %s4158_s2 = sld [smem:[#allocation30_spill]]  ;;  %s3523_s15 = int_to_ptr.vmem [resolvable:$true] %s519_s15 }
  0x28   : > { %p3533_p8 = pneg %p3517_p6 }
  0x2d   : > { %s2994_s6 = scalar_lea.hbm %s4158_s2, 1024 }
  0x2e   : > { %p2995_p7 = scmp.ne.s32.totalorder %s4158_s2, %s2994_s6  ;;  %p3001_p11 = scmp.lt.u32.totalorder %s2994_s6, %s4158_s2 }
  0x30   : > { %p2997_p9 = pnand %p3533_p8, %p2995_p7 }
  0x32   : > { %p2998_p10 = pneg %p2997_p9 }
  0x34   : > { %p3003_p12 = pnand %p3001_p11, %p2998_p10 }
  0x36   : > { %3006 = shalt.err (!%p3003_p12)
}
  0x37   : > { %s3007_s4 = scalar_lea.vmem %s3511_s12, 1024  ;;  %p3015_p5 = scmp.lt.s32.totalorder %s3511_s12, %s3511_s12 }
  0x38   : > { %p3008_p13 = scmp.ne.s32.totalorder %s3511_s12, %s3007_s4  ;;  %p3016_p4 = scmp.lt.s32.totalorder %s3007_s4, %s3007_s4 }
  0x3a   : > { %p3010_p0 = pnand %p3008_p13, %p3533_p8  ;;  %p3017_p7 = por %p3016_p4, %p3015_p5 }
  0x3c   : > { %p3011_p3 = pneg %p3010_p0 }
  0x3e   : > { %p3018_p9 = pnand %p3017_p7, %p3011_p3 }
  0x40   : > { %3021 = shalt.err (!%p3018_p9)
}
  0x41   : > { %s4124_s8 = smov 64   ;;  %s4126_s6 = smov 4  }
  0x42   : > { %2731 = dma.hbm_to_vmem [thread:$0]  (!%p3517_p6), %s4158_s2, 1024, %s3511_s12, [#allocation10], %s4124_s8, %s4124_s8, %s4126_s6  }
  0x43   : > { %s3022_s4 = scalar_lea.hbm %s4104_s5, 1024 }
  0x44   : > { %p3023_p4 = scmp.ne.s32.totalorder %s4104_s5, %s3022_s4  ;;  %p3029_p12 = scmp.lt.u32.totalorder %s3022_s4, %s4104_s5 }
  0x46   : > { %p3025_p10 = pnand %p3023_p4, %p3533_p8 }
  0x48   : > { %p3026_p11 = pneg %p3025_p10 }
  0x4a   : > { %p3031_p13 = pnand %p3029_p12, %p3026_p11 }
  0x4c   : > { %3034 = shalt.err (!%p3031_p13)
}
  0x4d   : > { %s3035_s12 = scalar_lea.vmem %s3521_s10, 1024  ;;  %p3043_p7 = scmp.lt.s32.totalorder %s3521_s10, %s3521_s10 }
  0x4e   : > { %p3036_p0 = scmp.ne.s32.totalorder %s3521_s10, %s3035_s12  ;;  %p3044_p9 = scmp.lt.s32.totalorder %s3035_s12, %s3035_s12 }
  0x50   : > { %p3038_p3 = pnand %p3036_p0, %p3533_p8  ;;  %p3045_p4 = por %p3044_p9, %p3043_p7 }
  0x52   : > { %p3039_p5 = pneg %p3038_p3 }
  0x54   : > { %p3046_p10 = pnand %p3045_p4, %p3039_p5 }
  0x56   : > { %3049 = shalt.err (!%p3046_p10)
}
  0x57   : > { %2737 = dma.hbm_to_vmem [thread:$0]  (!%p3517_p6), %s4104_s5, 1024, %s3521_s10, [#allocation13], %s4124_s8, %s4124_s8, %s4126_s6  }
  0x58   : > { %s3050_s0 = scalar_lea.hbm %s4108_s9, 2048 }
  0x59   : > { %p3051_p11 = scmp.ne.s32.totalorder %s4108_s9, %s3050_s0  ;;  %p3057_p0 = scmp.lt.u32.totalorder %s3050_s0, %s4108_s9 }
  0x5b   : > { %p3053_p12 = pnand %p3051_p11, %p3533_p8 }
  0x5d   : > { %p3054_p13 = pneg %p3053_p12 }
  0x5f   : > { %p3059_p3 = pnand %p3057_p0, %p3054_p13 }
  0x61   : > { %3062 = shalt.err (!%p3059_p3)
}
  0x62   : > { %s3063_s10 = scalar_lea.vmem %s3523_s15, 2048  ;;  %p3071_p4 = scmp.lt.s32.totalorder %s3523_s15, %s3523_s15 }
  0x63   : > { %p3064_p5 = scmp.ne.s32.totalorder %s3523_s15, %s3063_s10  ;;  %p3072_p10 = scmp.lt.s32.totalorder %s3063_s10, %s3063_s10 }
  0x65   : > { %p3066_p7 = pnand %p3064_p5, %p3533_p8  ;;  %p3073_p11 = por %p3072_p10, %p3071_p4 }
  0x67   : > { %p3067_p9 = pneg %p3066_p7 }
  0x69   : > { %p3074_p12 = pnand %p3073_p11, %p3067_p9 }
  0x6b   : > { %3077 = shalt.err (!%p3074_p12)
}
  0x6c   : > { %s4130_s12 = smov 128   ;;  %s4131_s13 = smov 8  }
  0x6d   : > { %2743 = dma.hbm_to_vmem [thread:$0]  (!%p3517_p6), %s4108_s9, 2048, %s3523_s15, [#allocation16], %s4130_s12, %s4130_s12, %s4131_s13  }
  0x6e   : > { %s3335_s23 = smov [#allocation11]   ;;  %s3336_s17 = smov [#allocation14]  }
  0x6f   : > { %s471_s0 = sshll.u32 %s3335_s23, 4  ;;  %s503_s16 = sshll.u32 %s3336_s17, 4  ;;  %s472_s0 = int_to_ptr.vmem [resolvable:$true] %s471_s0  ;;  %s3609_s16 = int_to_ptr.vmem [resolvable:$true] %s503_s16 }
  0x70   : > { %s4160_s3 = sld [smem:[#allocation32_spill]] }
  0x76   : > { %s3078_s10 = scalar_lea.hbm %s4160_s3, 1024 }
  0x77   : > { %p3079_p13 = scmp.ne.s32.totalorder %s4160_s3, %s3078_s10  ;;  %p3085_p5 = scmp.lt.u32.totalorder %s3078_s10, %s4160_s3 }
  0x79   : > { %p3081_p0 = pnand %p3079_p13, %p3533_p8 }
  0x7b   : > { %p3082_p3 = pneg %p3081_p0 }
  0x7d   : > { %p3087_p7 = pnand %p3085_p5, %p3082_p3 }
  0x7f   : > { %3090 = shalt.err (!%p3087_p7)
}
  0x80   : > { %s3091_s22 = scalar_lea.vmem %s472_s0, 1024  ;;  %p3099_p11 = scmp.lt.s32.totalorder %s472_s0, %s472_s0 }
  0x81   : > { %p3092_p9 = scmp.ne.s32.totalorder %s472_s0, %s3091_s22  ;;  %p3100_p12 = scmp.lt.s32.totalorder %s3091_s22, %s3091_s22 }
  0x83   : > { %p3094_p4 = pnand %p3092_p9, %p3533_p8  ;;  %p3101_p2 = por %p3100_p12, %p3099_p11 }
  0x85   : > { %p3095_p10 = pneg %p3094_p4 }
  0x87   : > { %p3102_p1 = pnand %p3101_p2, %p3095_p10 }
  0x89   : > { %3105 = shalt.err (!%p3102_p1)
}
  0x8a   : > { %s4161_s8 = smov 4   ;;  %s4162_s6 = smov 64  }
  0x8b   : > { %2734 = dma.hbm_to_vmem [thread:$0]  (!%p3517_p6), %s4160_s3, 1024, %s472_s0, [#allocation10], %s4162_s6, %s4162_s6, %s4161_s8  }
  0x8c   : > { %s3106_s10 = scalar_lea.hbm %s4106_s7, 1024 }
  0x8d   : > { %p3107_p13 = scmp.ne.s32.totalorder %s4106_s7, %s3106_s10  ;;  %p3113_p0 = scmp.lt.u32.totalorder %s3106_s10, %s4106_s7 }
  0x8f   : > { %p3109_p1 = pnand %p3107_p13, %p3533_p8 }
  0x91   : > { %p3110_p2 = pneg %p3109_p1 }
  0x93   : > { %p3115_p3 = pnand %p3113_p0, %p3110_p2 }
  0x95   : > { %3118 = shalt.err (!%p3115_p3)
}
  0x96   : > { %s3119_s0 = scalar_lea.vmem %s3609_s16, 1024  ;;  %p3127_p4 = scmp.lt.s32.totalorder %s3609_s16, %s3609_s16 }
  0x97   : > { %p3120_p5 = scmp.ne.s32.totalorder %s3609_s16, %s3119_s0  ;;  %p3128_p10 = scmp.lt.s32.totalorder %s3119_s0, %s3119_s0 }
  0x99   : > { %p3122_p7 = pnand %p3120_p5, %p3533_p8  ;;  %p3129_p11 = por %p3128_p10, %p3127_p4 }
  0x9b   : > { %p3123_p9 = pneg %p3122_p7 }
  0x9d   : > { %p3130_p12 = pnand %p3129_p11, %p3123_p9 }
  0x9f   : > { %3133 = shalt.err (!%p3130_p12)
}
  0xa0   : > { %2740 = dma.hbm_to_vmem [thread:$0]  (!%p3517_p6), %s4106_s7, 1024, %s3609_s16, [#allocation13], %s4162_s6, %s4162_s6, %s4161_s8  }
  0xa1   : > { %s3337_s17 = smov [#allocation17]   ;;  %s3134_s24 = scalar_lea.hbm %s4110_s11, 2048 }
  0xa2   : > { %s535_s20 = sshll.u32 %s3337_s17, 4  ;;  %p3135_p13 = scmp.ne.s32.totalorder %s4110_s11, %s3134_s24  ;;  %s536_s20 = int_to_ptr.vmem [resolvable:$true] %s535_s20 }
  0xa3   : > { %p3141_p0 = scmp.lt.u32.totalorder %s3134_s24, %s4110_s11 }
  0xa4   : > { %p3137_p1 = pnand %p3135_p13, %p3533_p8 }
  0xa6   : > { %p3138_p2 = pneg %p3137_p1 }
  0xa8   : > { %p3143_p3 = pnand %p3141_p0, %p3138_p2 }
  0xaa   : > { %3146 = shalt.err (!%p3143_p3)
}
  0xab   : > { %s3147_s16 = scalar_lea.vmem %s536_s20, 2048  ;;  %p3155_p4 = scmp.lt.s32.totalorder %s536_s20, %s536_s20 }
  0xac   : > { %p3148_p5 = scmp.ne.s32.totalorder %s536_s20, %s3147_s16  ;;  %p3156_p10 = scmp.lt.s32.totalorder %s3147_s16, %s3147_s16 }
  0xae   : > { %p3150_p7 = pnand %p3148_p5, %p3533_p8  ;;  %p3157_p11 = por %p3156_p10, %p3155_p4 }
  0xb0   : > { %p3151_p9 = pneg %p3150_p7 }
  0xb2   : > { %p3158_p12 = pnand %p3157_p11, %p3151_p9 }
  0xb4   : > { %3161 = shalt.err (!%p3158_p12)
}
  0xb5   : > { %2746 = dma.hbm_to_vmem [thread:$0]  (!%p3517_p6), %s4110_s11, 2048, %s536_s20, [#allocation16], %s4162_s6, %s4162_s6, %s4161_s8  }
  0xb6   : > { %s2360_s14 = sadd.s32 4294967294, %s3326_s1   ;;  %s45_s30 = sadd.s32 1, %s3318_s18 }
  0xb7   : > { %s4163_s23 = sld [smem:[#allocation24_spill]]  ;;  %s48_s17 = sadd.s32 1, %s3322_s19 }
  0xb8   : > { %p46_p8 = scmp.ge.s32.totalorder %s45_s30, 2  ;;  %s55_s4 = sadd.s32 1, %s3306_s29 }
  0xb9   : > { %p62_p13 = scmp.ne.s32.totalorder %s3306_s29, %s3302_s28  ;;  %p63_p1 = scmp.eq.s32.totalorder %s3326_s1, 0 }
  0xba   : > { %s4209_s30 = smov (%p46_p8, %s45_s30), 0  ;;  %s4164_s10 = sld [smem:[#allocation27_spill]] }
  0xbb   : > { %s4211_s17 = smov (!%p46_p8, %s48_s17), %s3322_s19  ;;  %p3689_p2 = por %p63_p1, %p62_p13 }
  0xbc   : > { %p68_p6 = scmp.ne.s32.totalorder %s3302_s28, %s3298_s27  ;;  %p50_p0 = scmp.ge.s32.totalorder %s4211_s17, 2 }
  0xbd   : > { %s415_s6 = ssub.s32 %s3318_s18, %s4209_s30  ;;  %p4166_p3 = scmp.ne.s32.totalorder %s4152_s21, 0 }
  0xbe   : > { %s419_s24 = sadd.s32 1, %s3294_s26  ;;  %s4213_s17 = smov (%p50_p0, %s4211_s17), 0 }
  0xbf   : > { %p3699_p5 = por %p4166_p3, %p68_p6  ;;  %p429_p7 = scmp.ne.s32.totalorder %s3294_s26, %s3290_s25 }
  0xc0   : > { %p435_p9 = scmp.ne.s32.totalorder %s3290_s25, %s4163_s23  ;;  %s52_s15 = ssub.s32 %s3322_s19, %s4213_s17 }
  0xc1   : > { %p436_p4 = scmp.eq.s32.totalorder %s2360_s14, 3  ;;  %p53_p10 = scmp.eq.s32.totalorder %s52_s15, 0 }
  0xc2   : > { %s416_s27 = sor.u32 %s415_s6, %s52_s15  ;;  %p4168_p12 = scmp.ne.s32.totalorder %s4164_s10, 0 }
  0xc3   : > { %p417_p11 = scmp.eq.s32.totalorder %s416_s27, 0  ;;  %p3724_p13 = por %p436_p4, %p435_p9 }
  0xc4   : > { %p3714_p8 = por %p4168_p12, %p429_p7  ;;  %p2761_p1 = scmp.lt.s32.totalorder %s3326_s1, 4 }
  0xc5   : > { %s3719_s0 = scalar_select %p53_p10, %s3306_s29, %s55_s4  }
  0xc6   : > { %s4169_s22 = scalar_select %p3714_p8, 1, 0 }
  0xc7   : > { %s3722_s16 = scalar_select %p417_p11, %s3294_s26, %s419_s24  }
  0xc8   : > { %s4170_s13 = scalar_select %p3724_p13, 1, 0 }
  0xc9   : > { %s564_s12 = sand.u32 1, %s3306_s29   ;;  %s2471_s23 = sshll.u32 %s3322_s19, 9 }
  0xca   : > { %s2369_s14 = sshll.u32 %s564_s12, 5  ;;  %s4171_s15 = sld [smem:[#allocation29_spill]] }
  0xcb   : > { %s568_s4 = scalar_lea.vmem [#allocation6], %s2369_s14  ;;  %p3738_p6 = pnand %p2761_p1, %p3689_p2 }
  0xcc   : > { %s575_s24 = sshll.u32 %s568_s4, 4  ;;  %s3744_s3 = scalar_lea.sflag [#allocation7], %s564_s12  ;;  %s3742_s24 = int_to_ptr.vmem [resolvable:$true] %s575_s24 }
  0xcd   : > { %p3164_p3 = pneg %p3738_p6 }
  0xd0   : > { %s3734_s10 = scalar_lea.hbm %s4171_s15, %s2471_s23  ;;  %s3167_s14 = scalar_lea.hbm %s4171_s15, 1024 }
  0xd1   : > { %s3162_s2 = scalar_lea.hbm %s3734_s10, 512  ;;  %p3168_p2 = scmp.lt.u32.totalorder %s3734_s10, %s4171_s15 }
  0xd2   : > { %p3163_p0 = scmp.ne.s32.totalorder %s3734_s10, %s3162_s2  ;;  %p3169_p4 = scmp.lt.u32.totalorder %s3167_s14, %s3162_s2 }
  0xd3   : > { %p3171_p11 = scmp.lt.u32.totalorder %s3162_s2, %s3734_s10 }
  0xd4   : > { %p3165_p7 = pnand %p3164_p3, %p3163_p0  ;;  %p3170_p10 = por %p3169_p4, %p3168_p2 }
  0xd6   : > { %p3166_p9 = pneg %p3165_p7  ;;  %p3172_p12 = por %p3171_p11, %p3170_p10 }
  0xd8   : > { %p3173_p1 = pnand %p3172_p12, %p3166_p9 }
  0xda   : > { %3176 = shalt.err (!%p3173_p1)
}
  0xdb   : > { %s3177_s12 = scalar_lea.vmem %s3742_s24, 512  ;;  %s3338_s23 = smov [#allocation6]  }
  0xdc   : > { %p3178_p0 = scmp.ne.s32.totalorder %s3742_s24, %s3177_s12  ;;  %s3182_s8 = sshll.u32 %s3338_s23, 4  ;;  %s3183_s8 = int_to_ptr.vmem [resolvable:$false] %s3182_s8 }
  0xdd   : > { %s3184_s6 = scalar_lea.vmem %s3183_s8, 1024  ;;  %p3185_p8 = scmp.lt.s32.totalorder %s3742_s24, %s3183_s8 }
  0xde   : > { %p3180_p7 = pnand %p3178_p0, %p3164_p3  ;;  %p3186_p2 = scmp.lt.s32.totalorder %s3184_s6, %s3177_s12 }
  0xe0   : > { %p3181_p13 = pneg %p3180_p7  ;;  %p3187_p4 = por %p3186_p2, %p3185_p8 }
  0xe2   : > { %p3188_p10 = pnand %p3187_p4, %p3181_p13 }
  0xe4   : > { %3191 = shalt.err (!%p3188_p10)
}
  0xe5   : > { %s4173_s2 = smov 8   ;;  %s4174_s14 = smov 128  }
  0xe6   : > { %2750 = dma.hbm_to_vmem [thread:$0]  (!%p3738_p6), %s3734_s10, 512, %s3742_s24, %s3744_s3, %s4174_s14, %s4174_s14, %s4173_s2  }
  0xe7   : > { %s4175_s4 = sld [smem:[#allocation28_spill]] }
  0xed   : > { %p4176_p3 = scmp.ne.s32.totalorder %s4175_s4, 0 }
  0xee   : > { %s589_s23 = sand.u32 (!%p4176_p3), 1, %s3302_s28  }
  0xef   : > { %587 = sbr.rel (%p4176_p3) target bundleno = 4168 (0x1048), region = 88  ;;  %s2373_s8 = sshll.u32 (!%p4176_p3), %s589_s23, 5 }
  0xf0   : > { %s590_s12 = scalar_lea.sflag (!%p4176_p3), [#allocation7], %s589_s23  ;;  %s3778_s6 = scalar_lea.vmem (!%p4176_p3), [#allocation6], %s2373_s8 }
  0xf6   : > { %3265 = dma.done.wait (%p3699_p5), %s590_s12, 512  }
  0xf7   : > { %3267 = vsyncadd (%p3699_p5), %s590_s12, 4294966784  ;;  %p4177_p8 = scmp.ne.s32.totalorder %s4152_s21, 0 }
  0xf9   : > { %3269 = dma.done.wait (%p4177_p8), [#allocation10], 2048  }
  0xfa   : > { %3271 = vsyncadd (%p4177_p8), [#allocation10], 4294965248 }
  0xfb   : > { %3273 = dma.done.wait (%p4177_p8), [#allocation13], 2048  }
  0xfc   : > { %3275 = vsyncadd (%p4177_p8), [#allocation13], 4294965248 }
  0xfd   : > { %3277 = dma.done.wait (%p4177_p8), [#allocation16], 4096  }
  0xfe   : > { %3279 = vsyncadd (%p4177_p8), [#allocation16], 4294963200  ;;  %s4134_s3 = sand.u32 1, %s3290_s25   ;;  %s4178_s27 = sld [smem:[#allocation38_spill]] }
  0xff   : > { %s2380_s20 = sshll.u32 %s4134_s3, 4  ;;  %s4179_s4 = sld [smem:[#allocation39_spill]] }
 0x100   : > { %s3809_s23 = scalar_lea.vmem [#allocation18], %s2380_s20  ;;  %s4180_s8 = sld [smem:[#allocation25_spill]] }
 0x104   : > { %v3802_v0 = vld [vmem:[%s4178_s27] ss:$0 sm:$0xff] }
 0x105   : > { %v3807_v1 = vld [vmem:[%s4179_s4] ss:$0 sm:$0xff] }
 0x106   : > { %p2381_p5 = scmp.ne.s32.totalorder %s4180_s8, 0 }
 0x107   : > { %v676_v2 = vld [vmem:[%s3778_s6] sm:$0xff] (!%p2381_p5)  ;;  %v678_v3 = vld [vmem:[%s3778_s6 + $0x10] sm:$0xff] (!%p2381_p5)  ;;  %v677_v4 = vld [vmem:[%s3778_s6 + $0x8] sm:$0xff] (!%p2381_p5)  ;;  %s4181_s20 = sld [smem:[#allocation33_spill]] (!%p2381_p5)  ;;  %s4182_s27 = sld [smem:[#allocation34_spill]] (!%p2381_p5)  ;;  %vm991_vm0 = vcmask (!%p2381_p5), 261120  }
 0x108   : > { %675 = sbr.rel (%p2381_p5) target bundleno = 943 (0x3af), region = 120  ;;  %680 = vadd.xlane.f32.xlu0 (!%p2381_p5), %v676_v2  ;;  %684 = vadd.xlane.f32.xlu1 (!%p2381_p5), %v678_v3  ;;  %v679_v5 = vld [vmem:[%s3778_s6 + $0x18] sm:$0xff] (!%p2381_p5)  ;;  %v2878_v6 = vld [vmem:[#allocation11] sm:$0xff] (!%p2381_p5)   ;;  %v2880_v24 = vld [vmem:[#allocation11 + $0x8] sm:$0xff] (!%p2381_p5)   ;;  %s3339_s2 = smov (!%p2381_p5), 96  }
 0x109   : > { %v2879_v7 = vld [vmem:[#allocation12] sm:$0xff] (!%p2381_p5)   ;;  %2556 = vmatprep.subr.bf16.mxu0 (!%p2381_p5), %v2878_v6  ;;  %v2881_v25 = vld [vmem:[#allocation12 + $0x8] sm:$0xff] (!%p2381_p5)   ;;  %v2882_v26 = vld [vmem:[#allocation11 + $0x10] sm:$0xff] (!%p2381_p5)   ;;  %s3340_s14 = smov (!%p2381_p5), 64   ;;  %s3341_s4 = smov (!%p2381_p5), 32  }
 0x10a   : > { %2576 = vmatprep.subr.bf16.mxu1 (!%p2381_p5), %v2879_v7  ;;  %2557 = vmatpush3.bf16.msra.mxu0 (!%p2381_p5), %v2878_v6  ;;  %v2883_v27 = vld [vmem:[#allocation12 + $0x10] sm:$0xff] (!%p2381_p5)   ;;  %v2884_v28 = vld [vmem:[#allocation11 + $0x18] sm:$0xff] (!%p2381_p5)   ;;  %v2886_v30 = vld [vmem:[#allocation11 + $0x20] sm:$0xff] (!%p2381_p5)  }
 0x10b   : > { %2577 = vmatpush3.bf16.msra.mxu1 (!%p2381_p5), %v2879_v7  ;;  %2558 = vmatprep.subr.bf16.mxu0 (!%p2381_p5), %v2880_v24  ;;  %v2885_v29 = vld [vmem:[#allocation12 + $0x18] sm:$0xff] (!%p2381_p5)   ;;  %v2887_v31 = vld [vmem:[#allocation12 + $0x20] sm:$0xff] (!%p2381_p5)   ;;  %v2888_v32 = vld [vmem:[#allocation11 + $0x28] sm:$0xff] (!%p2381_p5)  }
 0x10c   : > { %682 = vadd.xlane.f32.xlu0 (!%p2381_p5), %v677_v4  ;;  %686 = vadd.xlane.f32.xlu1 (!%p2381_p5), %v679_v5  ;;  %v2889_v33 = vld [vmem:[#allocation12 + $0x28] sm:$0xff] (!%p2381_p5)   ;;  %v2890_v34 = vld [vmem:[#allocation11 + $0x30] sm:$0xff] (!%p2381_p5)   ;;  %v2892_v36 = vld [vmem:[#allocation11 + $0x38] sm:$0xff] (!%p2381_p5)  }
 0x10d   : > { %2578 = vmatprep.subr.bf16.mxu1 (!%p2381_p5), %v2881_v25  ;;  %v2891_v35 = vld [vmem:[#allocation12 + $0x30] sm:$0xff] (!%p2381_p5)   ;;  %v2893_v37 = vld [vmem:[#allocation12 + $0x38] sm:$0xff] (!%p2381_p5)   ;;  %v2384_v7 = vld [vmem:[%s4181_s20] ss:$0 sm:$0xff] (!%p2381_p5) }
 0x10e   : > { %2559 = vmatpush3.bf16.msra.mxu0 (!%p2381_p5), %v2880_v24 }
 0x10f   : > { %2579 = vmatpush3.bf16.msra.mxu1 %v2881_v25  ;;  %2560 = vmatprep.subr.bf16.mxu0 %v2882_v26 }
 0x110   : > { %2580 = vmatprep.subr.bf16.mxu1 %v2883_v27 }
 0x112   : > { %2561 = vmatpush3.bf16.msra.mxu0 %v2882_v26 }
 0x113   : > { %2581 = vmatpush3.bf16.msra.mxu1 %v2883_v27  ;;  %2562 = vmatprep.subr.bf16.mxu0 %v2884_v28 }
 0x114   : > { %2582 = vmatprep.subr.bf16.mxu1 %v2885_v29 }
 0x116   : > { %2563 = vmatpush3.bf16.msra.mxu0 %v2884_v28 }
 0x117   : > { %2583 = vmatpush3.bf16.msra.mxu1 %v2885_v29  ;;  %2564 = vmatprep.subr.bf16.mxu0 %v2886_v30 }
 0x118   : > { %2584 = vmatprep.subr.bf16.mxu1 %v2887_v31 }
 0x11a   : > { %2565 = vmatpush3.bf16.msra.mxu0 %v2886_v30 }
 0x11b   : > { %2585 = vmatpush3.bf16.msra.mxu1 %v2887_v31  ;;  %2566 = vmatprep.subr.bf16.mxu0 %v2888_v32 }
 0x11c   : > { %2586 = vmatprep.subr.bf16.mxu1 %v2889_v33 }
 0x11e   : > { %2567 = vmatpush3.bf16.msra.mxu0 %v2888_v32 }
 0x11f   : > { %2587 = vmatpush3.bf16.msra.mxu1 %v2889_v33  ;;  %2568 = vmatprep.subr.bf16.mxu0 %v2890_v34 }
 0x120   : > { %2588 = vmatprep.subr.bf16.mxu1 %v2891_v35 }
 0x122   : > { %2569 = vmatpush3.bf16.msra.mxu0 %v2890_v34 }
 0x123   : > { %2589 = vmatpush3.bf16.msra.mxu1 %v2891_v35  ;;  %2570 = vmatprep.subr.bf16.mxu0 %v2892_v36 }
 0x124   : > { %2590 = vmatprep.subr.bf16.mxu1 %v2893_v37 }
 0x126   : > { %2571 = vmatpush3.bf16.msra.mxu0 %v2892_v36 }
 0x127   : > { %2591 = vmatpush3.bf16.msra.mxu1 %v2893_v37 }
 0x195   : > { %v681_v8 = vpop.xlane.xlu0 %680  ;;  %v685_v9 = vpop.xlane.xlu1 %684 }
 0x196   : > { %v689_v10 = vmul.f32 0.0078125, %v681_v8  ;;  %v691_v11 = vmul.f32 0.0078125, %v685_v9 }
 0x198   : > { %v3816_v12 = vsub.f32 %v676_v2, %v689_v10  ;;  %v3818_v13 = vsub.f32 %v678_v3, %v691_v11 }
 0x199   : > { %v683_v14 = vpop.xlane.xlu0 %682  ;;  %v687_v15 = vpop.xlane.xlu1 %686 }
 0x19a   : > { %v690_v16 = vmul.f32 0.0078125, %v683_v14  ;;  %v697_v17 = vmul.f32 %v3816_v12, %v3816_v12  ;;  %v692_v18 = vmul.f32 0.0078125, %v687_v15  ;;  %v699_v21 = vmul.f32 %v3818_v13, %v3818_v13 }
 0x19c   : > { %v3822_v19 = vsub.f32 %v677_v4, %v690_v16  ;;  %701 = vadd.xlane.f32.xlu0 %v697_v17  ;;  %v3824_v20 = vsub.f32 %v679_v5, %v692_v18 }
 0x19e   : > { %v698_v22 = vmul.f32 %v3822_v19, %v3822_v19  ;;  %v700_v23 = vmul.f32 %v3824_v20, %v3824_v20 }
 0x1a0   : > { %705 = vadd.xlane.f32.xlu0 %v699_v21  ;;  %703 = vadd.xlane.f32.xlu1 %v698_v22 }
 0x1a4   : > { %707 = vadd.xlane.f32.xlu1 %v700_v23 }
 0x229   : > { %v702_v38 = vpop.xlane.xlu0 %701 }
 0x22a   : > { %v709_v39 = vmul.f32 0.0078125, %v702_v38 }
 0x22c   : > { %v713_v40 = vadd.f32 1e-05, %v709_v39 }
 0x22d   : > { %v704_v41 = vpop.xlane.xlu1 %703  ;;  %v706_v42 = vpop.xlane.xlu0 %705 }
 0x22e   : > { %2894 = vrsqrt.f32 %v713_v40  ;;  %v710_v43 = vmul.f32 0.0078125, %v704_v41  ;;  %v711_v44 = vmul.f32 0.0078125, %v706_v42 }
 0x230   : > { %v714_v45 = vadd.f32 1e-05, %v710_v43  ;;  %v715_v46 = vadd.f32 1e-05, %v711_v44 }
 0x231   : > { %v708_v47 = vpop.xlane.xlu1 %707 }
 0x232   : > { %2896 = vrsqrt.f32 %v714_v45  ;;  %v712_v48 = vmul.f32 0.0078125, %v708_v47 }
 0x233   : > { %2898 = vrsqrt.f32 %v715_v46 }
 0x234   : > { %v716_v49 = vadd.f32 1e-05, %v712_v48 }
 0x236   : > { %2900 = vrsqrt.f32 %v716_v49 }
 0x238   : > { %v2895_v50 = vpop.eup %2894 }
 0x239   : > { %v721_v51 = vmul.f32 %v2895_v50, %v3816_v12 }
 0x23b   : > { %v731_v55 = vmul.f32 %v3802_v0, %v721_v51 }
 0x23c   : > { %v2897_v52 = vpop.eup %2896 }
 0x23d   : > { %v2899_v53 = vpop.eup %2898  ;;  %v722_v54 = vmul.f32 %v2897_v52, %v3822_v19  ;;  %v741_v59 = vadd.f32 %v3807_v1, %v731_v55 }
 0x23e   : > { %v723_v56 = vmul.f32 %v2899_v53, %v3818_v13 }
 0x23f   : > { %v732_v57 = vmul.f32 %v3802_v0, %v722_v54 }
 0x240   : > { %v2901_v58 = vpop.eup %2900  ;;  %v733_v62 = vmul.f32 %v3802_v0, %v723_v56 }
 0x241   : > { %v742_v60 = vadd.f32 %v3807_v1, %v732_v57  ;;  %v724_v61 = vmul.f32 %v2901_v58, %v3824_v20 }
 0x242   : > { %v743_v3 = vadd.f32 %v3807_v1, %v733_v62 }
 0x243   : > { %v745_v63 = vpack.c.bf16 %v742_v60, %v741_v59  ;;  %v734_v2 = vmul.f32 %v3802_v0, %v724_v61  ;;  %v2393_v0 = vld [vmem:[%s4182_s27] ss:$0 sm:$0xff] }
 0x245   : > { %747 = vst [vmem:[#allocation2] sm:$0xff] %v745_v63  ;;  %2572 = vmatprep.mubr.bf16.mxu0 %v745_v63  ;;  %2592 = vmatprep.mubr.bf16.mxu1 %v745_v63  ;;  %v744_v4 = vadd.f32 %v3807_v1, %v734_v2 }
 0x247   : > { %v746_v5 = vpack.c.bf16 %v744_v4, %v743_v3 }
 0x249   : > { %748 = vst [vmem:[#allocation2 + $0x8] sm:$0xff] %v746_v5  ;;  %2573 = vmatmul.mubr.bf16.vlgmr.msra.gmra.mrb[0].mxu0 %v746_v5  ;;  %2593 = vmatmul.mubr.bf16.vlgmr.msra.gmra.mrb[0].mxu1 %v746_v5 }
 0x31c   : > { %v2574_v6 = vpop.f32.mrb[0].mxu0  ;;  %v2594_v8 = vpop.f32.mrb[0].mxu1 }
 0x31d   : > { %v854_v9 = vpop.f32.mrb[1].mxu0  ;;  %v974_v10 = vpop.f32.mrb[1].mxu1  ;;  %v863_v1 = vadd.f32 %v2574_v6, %v2384_v7  ;;  %v983_v13 = vadd.f32 %v2594_v8, %v2393_v0 }
 0x31e   : > { %v2575_v11 = vpop.f32.mrb[2].mxu0  ;;  %v2595_v12 = vpop.f32.mrb[2].mxu1  ;;  %v855_v18 = vadd.f32 %v2384_v7, %v854_v9  ;;  %v975_v19 = vadd.f32 %v2393_v0, %v974_v10 }
 0x31f   : > { %v866_v14 = vadd.f32 %v2575_v11, %v2384_v7  ;;  %v986_v15 = vadd.f32 %v2595_v12, %v2393_v0  ;;  %v857_v16 = vpop.f32.mrb[3].mxu0  ;;  %v977_v17 = vpop.f32.mrb[3].mxu1 }
 0x320   : > { %v858_v20 = vadd.f32 %v2384_v7, %v857_v16  ;;  %v978_v21 = vadd.f32 %v2393_v0, %v977_v17 }
 0x321   : > { %v990_v22 = vpack.c.bf16 %v866_v14, %v863_v1  ;;  %v995_v23 = vpack.c.bf16 %v986_v15, %v983_v13 }
 0x322   : > { %v989_v24 = vpack.c.bf16 %v858_v20, %v855_v18  ;;  %v994_v25 = vpack.c.bf16 %v978_v21, %v975_v19 }
 0x323   : > { %993 = vst.msk [vmem:[#allocation3 + $0x8] sm:$0xff] %vm991_vm0, %v990_v22  ;;  %997 = vst.msk [vmem:[#allocation4 + $0x8] sm:$0xff] %vm991_vm0, %v995_v23  ;;  %1002 = vrot.lane.b32.xlu1 %v990_v22, %s3339_s2 }
 0x324   : > { %992 = vst.msk [vmem:[#allocation3] sm:$0xff] %vm991_vm0, %v989_v24  ;;  %996 = vst.msk [vmem:[#allocation4] sm:$0xff] %vm991_vm0, %v994_v25  ;;  %1000 = vrot.lane.b32.xlu0 %v989_v24, %s3339_s2 }
 0x327   : > { %1013 = vrot.lane.b32.xlu1 %v995_v23, %s3339_s2 }
 0x328   : > { %1020 = vrot.lane.b32.xlu0 %v989_v24, %s3340_s14 }
 0x32b   : > { %1022 = vrot.lane.b32.xlu1 %v990_v22, %s3340_s14 }
 0x32c   : > { %1029 = vrot.lane.b32.xlu0 %v994_v25, %s3340_s14 }
 0x32f   : > { %1031 = vrot.lane.b32.xlu1 %v995_v23, %s3340_s14 }
 0x330   : > { %1038 = vrot.lane.b32.xlu0 %v989_v24, %s3341_s4 }
 0x333   : > { %1040 = vrot.lane.b32.xlu1 %v990_v22, %s3341_s4 }
 0x334   : > { %1047 = vrot.lane.b32.xlu0 %v994_v25, %s3341_s4 }
 0x337   : > { %1011 = vrot.lane.b32.xlu1 %v994_v25, %s3339_s2 }
 0x33b   : > { %1049 = vrot.lane.b32.xlu1 %v995_v23, %s3341_s4 }
 0x395   : > { %v1003_v26 = vpop.permute.xlu1 %1002 }
 0x396   : > { %1008 = vst.msk [vmem:[#allocation3 + $0x18] sm:$0xff] %vm991_vm0, %v1003_v26  ;;  %v1001_v27 = vpop.permute.xlu0 %1000 }
 0x397   : > { %1007 = vst.msk [vmem:[#allocation3 + $0x10] sm:$0xff] %vm991_vm0, %v1001_v27 }
 0x399   : > { %v1014_v28 = vpop.permute.xlu1 %1013 }
 0x39a   : > { %1019 = vst.msk [vmem:[#allocation4 + $0x18] sm:$0xff] %vm991_vm0, %v1014_v28  ;;  %v1021_v29 = vpop.permute.xlu0 %1020 }
 0x39b   : > { %1027 = vst.msk [vmem:[#allocation3 + $0x20] sm:$0xff] %vm991_vm0, %v1021_v29 }
 0x39d   : > { %v1023_v30 = vpop.permute.xlu1 %1022 }
 0x39e   : > { %1028 = vst.msk [vmem:[#allocation3 + $0x28] sm:$0xff] %vm991_vm0, %v1023_v30  ;;  %v1030_v31 = vpop.permute.xlu0 %1029 }
 0x39f   : > { %1036 = vst.msk [vmem:[#allocation4 + $0x20] sm:$0xff] %vm991_vm0, %v1030_v31 }
 0x3a1   : > { %v1032_v32 = vpop.permute.xlu1 %1031 }
 0x3a2   : > { %1037 = vst.msk [vmem:[#allocation4 + $0x28] sm:$0xff] %vm991_vm0, %v1032_v32  ;;  %v1039_v33 = vpop.permute.xlu0 %1038 }
 0x3a3   : > { %1045 = vst.msk [vmem:[#allocation3 + $0x30] sm:$0xff] %vm991_vm0, %v1039_v33 }
 0x3a5   : > { %v1041_v34 = vpop.permute.xlu1 %1040 }
 0x3a6   : > { %1046 = vst.msk [vmem:[#allocation3 + $0x38] sm:$0xff] %vm991_vm0, %v1041_v34  ;;  %v1048_v35 = vpop.permute.xlu0 %1047 }
 0x3a7   : > { %1054 = vst.msk [vmem:[#allocation4 + $0x30] sm:$0xff] %vm991_vm0, %v1048_v35 }
 0x3a9   : > { %v1012_v36 = vpop.permute.xlu1 %1011 }
 0x3aa   : > { %1018 = vst.msk [vmem:[#allocation4 + $0x10] sm:$0xff] %vm991_vm0, %v1012_v36 }
 0x3ad   : > { %v1050_v37 = vpop.permute.xlu1 %1049 }
 0x3ae   : > { %1055 = vst.msk [vmem:[#allocation4 + $0x38] sm:$0xff] %vm991_vm0, %v1050_v37 }
 0x3af PF: > { %v2902_v38 = vld [vmem:[#allocation9] sm:$0xff]   ;;  %s4183_s8 = sld [smem:[#allocation25_spill]]  ;;  %v3342_v39 = vmov 0.0   ;;  %v2903_v40 = vld [vmem:[#allocation9 + $0x8] sm:$0xff]   ;;  %vm3343_vm1 = vmmov 0   ;;  %v2904_v41 = vld [vmem:[#allocation9 + $0x10] sm:$0xff]  }
 0x3b0   : > { %2596 = vmatprep.subr.bf16.mxu0 %v3342_v39  ;;  %2616 = vmatprep.subr.bf16.mxu1 %v3342_v39  ;;  %vm1182_vm2 = vcmask 261120   ;;  %v2905_v42 = vld [vmem:[#allocation9 + $0x18] sm:$0xff]   ;;  %v2906_v45 = vld [vmem:[#allocation9 + $0x20] sm:$0xff]   ;;  %v2907_v46 = vld [vmem:[#allocation9 + $0x28] sm:$0xff]   ;;  %s4184_s2 = sld [smem:[#allocation31_spill]]  ;;  %s3344_s14 = smov 96  }
 0x3b1   : > { %2597 = vmatpush3.bf16.msra.mxu0 %v2902_v38  ;;  %2612 = vmatprep.mubr.msk.bf16.mxu0 %vm3343_vm1, %v3342_v39  ;;  %v1180_v43 = vld [vmem:[#allocation3] sm:$0xff]  ;;  %v2908_v47 = vld [vmem:[#allocation9 + $0x30] sm:$0xff]   ;;  %v1181_v50 = vld [vmem:[#allocation3 + $0x8] sm:$0xff]  ;;  %s3345_s4 = smov 64   ;;  %vm1435_vm3 = vcmask 523520   ;;  %vm1567_vm4 = vcmask 785920  }
 0x3b2   : > { %2598 = vmatprep.subr.bf16.mxu0 %v3342_v39  ;;  %2620 = vmatprep.mubr.msk.bf16.mxu1 %vm3343_vm1, %v3342_v39  ;;  %v1187_v44 = vsel %vm1182_vm2, %v1180_v43, 0  ;;  %v2909_v48 = vld [vmem:[#allocation9 + $0x38] sm:$0xff]   ;;  %v1190_v51 = vsel %vm1182_vm2, %v1181_v50, 0  ;;  %v1257_v15 = vld [vmem:[#allocation4 + $0x8] sm:$0xff]  ;;  %v1305_v20 = vld [vmem:[#allocation3 + $0x10] sm:$0xff]  ;;  %vm1699_vm5 = vcmask 1048320  }
 0x3b3   : > { %2617 = vmatpush3.bf16.xpose.msra.mxu1 %v1187_v44  ;;  %v1256_v14 = vld [vmem:[#allocation4] sm:$0xff]  ;;  %v1314_v24 = vsel %vm1182_vm2, %v1305_v20, 0  ;;  %v1306_v25 = vld [vmem:[#allocation3 + $0x18] sm:$0xff]  ;;  %v1439_v30 = vld [vmem:[#allocation3 + $0x28] sm:$0xff]  ;;  %s4185_s27 = sld [smem:[#allocation35_spill]]  ;;  %s4188_s24 = sld [smem:[#allocation36_spill]] }
 0x3b4   : > { %2618 = vmatprep.subr.bf16.mxu1 %v3342_v39  ;;  %v1317_v26 = vsel %vm1182_vm2, %v1306_v25, 0  ;;  %v1438_v27 = vld [vmem:[#allocation3 + $0x20] sm:$0xff]  ;;  %v1449_v31 = vsel %vm1182_vm2, %v1439_v30, 0  ;;  %p4194_p6 = scmp.ne.s32.totalorder %s4169_s22, 0 }
 0x3b5   : > { %s2402_s21 = sshll.u32 %s4183_s8, 4  ;;  %2599 = vmatpush3.bf16.msra.mxu0 %v2903_v40  ;;  %v1446_v28 = vsel %vm1182_vm2, %v1438_v27, 0 }
 0x3b6   : > { %2600 = vmatprep.subr.bf16.mxu0 %v3342_v39  ;;  %s1060_s12 = sshra.s32 %s2402_s21, 4  ;;  %v2404_v52 = vld [vmem:[%s4184_s2] ss:$0 sm:$0xff]  ;;  %s4186_s2 = sld [smem:[#allocation40_spill]] }
 0x3b7   : > { %s2403_s20 = sshll.u32 %s1060_s12, 3  ;;  %s3346_s12 = smov 32  }
 0x3b8   : > { %s1063_s10 = scalar_lea.vmem [#allocation2], %s2403_s20  ;;  %s1057_s20 = scalar_lea.vmem %s3778_s6, %s2402_s21 [#allocation6] }
 0x3b9   : > { %2601 = vmatpush3.bf16.msra.mxu0 %v2904_v41  ;;  %v1064_v49 = vld [vmem:[%s1063_s10] sm:$0xff]  ;;  %s2466_s6 = sshll.u32 %s4183_s8, 1  ;;  %s2211_s10 = sshll.u32 %s3809_s23, 4  ;;  %s4031_s10 = int_to_ptr.vmem [resolvable:$true] %s2211_s10 }
 0x3ba   : > { %2602 = vmatprep.subr.bf16.mxu0 %v3342_v39 }
 0x3bb   : > { %2619 = vmatpush3.bf16.xpose.msra.mxu1 %v1190_v51 }
 0x3bc   : > { %2624 = vmatprep.subr.bf16.mxu1 %v3342_v39 }
 0x3bd   : > { %2603 = vmatpush3.bf16.msra.mxu0 %v2905_v42 }
 0x3be   : > { %2604 = vmatprep.subr.bf16.mxu0 %v3342_v39 }
 0x3c1   : > { %2605 = vmatpush3.bf16.msra.mxu0 %v2906_v45 }
 0x3c2   : > { %2606 = vmatprep.subr.bf16.mxu0 %v3342_v39 }
 0x3c5   : > { %2607 = vmatpush3.bf16.msra.mxu0 %v2907_v46 }
 0x3c6   : > { %2608 = vmatprep.subr.bf16.mxu0 %v3342_v39 }
 0x3c9   : > { %2609 = vmatpush3.bf16.msra.mxu0 %v2908_v47 }
 0x3ca   : > { %2610 = vmatprep.subr.bf16.mxu0 %v3342_v39 }
 0x3cd   : > { %2611 = vmatpush3.bf16.msra.mxu0 %v2909_v48 }
 0x3ce   : > { %2640 = vmatprep.subr.bf16.mxu0 %v3342_v39 }
 0x3d0   : > { %2613 = vmatmul.mubr.bf16.vlgmr.msra.gmra.mrb[0].mxu0 %v1064_v49 }
 0x3d1   : > { %2644 = vmatprep.mubr.msk.bf16.mxu0 %vm3343_vm1, %v3342_v39 }
 0x4a3   : > { %v1170_v53 = vpop.f32.mrb[0].mxu0 }
 0x4a4   : > { %v1171_v54 = vadd.f32 %v2404_v52, %v1170_v53  ;;  %v2614_v55 = vpop.f32.mrb[1].mxu0 }
 0x4a5   : > { %v1173_v56 = vpop.f32.mrb[2].mxu0 }
 0x4a6   : > { %v1174_v57 = vadd.f32 %v2404_v52, %v1173_v56  ;;  %v2615_v58 = vpop.f32.mrb[3].mxu0  ;;  %v1177_v59 = vmul.f32 0.17677669, %v1171_v54 }
 0x4a8   : > { %v1178_v60 = vmul.f32 0.17677669, %v1174_v57 }
 0x4aa   : > { %v3892_v61 = vpack.c.bf16 %v1178_v60, %v1177_v59 }
 0x4ac   : > { %2621 = vmatmul.mubr.msk.bf16.vlgmr.msra.gmra.mrb[0].mxu1 %vm1182_vm2, %v3892_v61 }
 0x4ad   : > { %2628 = vmatprep.mubr.msk.bf16.mxu1 %vm3343_vm1, %v3342_v39  ;;  %2625 = vmatpush3.bf16.msra.mxu1 %v1256_v14 }
 0x4ae   : > { %2626 = vmatprep.subr.bf16.mxu1 %v3342_v39 }
 0x4b1   : > { %2627 = vmatpush3.bf16.msra.mxu1 %v1257_v15 }
 0x4b2   : > { %2632 = vmatprep.subr.bf16.mxu1 %v3342_v39 }
 0x57f   : > { %v1226_v62 = vpop.f32.mrb[0].mxu1 }
 0x580   : > { %v2622_v63 = vpop.f32.mrb[1].mxu1  ;;  %v1233_v2 = vsel %vm1182_vm2, %v1226_v62, -inf }
 0x581   : > { %1234 = vmax.xlane.f32.xlu0 %v1233_v2  ;;  %v1229_v3 = vpop.f32.mrb[2].mxu1  ;;  %v1517_v63 = vld [vmem:[#allocation4 + $0x28] sm:$0xff] }
 0x582   : > { %v2623_v4 = vpop.f32.mrb[3].mxu1  ;;  %v1236_v5 = vsel %vm1182_vm2, %v1229_v3, -inf }
 0x585   : > { %1237 = vmax.xlane.f32.xlu0 %v1236_v5 }
 0x59b   : > { %1308 = vrot.lane.b32.xlu0 %v3892_v61, %s3344_s14 }
 0x60e   : > { %v1235_v6 = vpop.xlane.xlu0 %1234 }
 0x60f   : > { %v1239_v7 = vsub.f32 %v1226_v62, %v1235_v6  ;;  %v1516_v62 = vld [vmem:[#allocation4 + $0x20] sm:$0xff]  ;;  %v1570_v6 = vld [vmem:[#allocation3 + $0x30] sm:$0xff] }
 0x611   : > { %v1241_v8 = vmul.f32 1.442695, %v1239_v7 }
 0x612   : > { %v1238_v0 = vpop.xlane.xlu0 %1237 }
 0x613   : > { %2958 = vpow2.f32 %v1241_v8  ;;  %v1240_v9 = vsub.f32 %v1229_v3, %v1238_v0 }
 0x615   : > { %v1243_v10 = vmul.f32 1.442695, %v1240_v9  ;;  %v1578_v9 = vsel %vm1182_vm2, %v1570_v6, 0  ;;  %v2911_v6 = vld [vmem:[#allocation14 + $0x8] sm:$0xff]  }
 0x616   : > { %v1309_v29 = vpop.permute.xlu0 %1308 }
 0x617   : > { %2960 = vpow2.f32 %v1243_v10 }
 0x61d   : > { %v2959_v11 = vpop.eup %2958 }
 0x61e   : > { %v1245_v12 = vsel %vm1182_vm2, %v2959_v11, 0.0 }
 0x61f   : > { %1246 = vadd.xlane.f32.xlu1 %v1245_v12 }
 0x621   : > { %v2961_v1 = vpop.eup %2960 }
 0x622   : > { %v1248_v13 = vsel %vm1182_vm2, %v2961_v1, 0.0 }
 0x623   : > { %1249 = vadd.xlane.f32.xlu1 %v1248_v13 }
 0x634   : > { %1440 = vrot.lane.b32.xlu1 %v3892_v61, %s3345_s4 }
 0x6ac   : > { %v1247_v16 = vpop.xlane.xlu1 %1246 }
 0x6ad   : > { %2962 = vrcp.f32 %v1247_v16 }
 0x6b0   : > { %v1250_v17 = vpop.xlane.xlu1 %1249 }
 0x6b1   : > { %2964 = vrcp.f32 %v1250_v17 }
 0x6b4   : > { %v1441_v32 = vpop.permute.xlu1 %1440 }
 0x6b7   : > { %v2963_v18 = vpop.eup %2962 }
 0x6b8   : > { %v1253_v21 = vmul.f32 %v2963_v18, %v2959_v11 }
 0x6bb   : > { %v2965_v19 = vpop.eup %2964 }
 0x6bc   : > { %v1254_v22 = vmul.f32 %v2965_v19, %v2961_v1 }
 0x6be   : > { %v1255_v23 = vpack.c.bf16 %v1254_v22, %v1253_v21 }
 0x6c0   : > { %2629 = vmatmul.mubr.msk.bf16.vlgmr.msra.gmra.mrb[4].mxu1 %vm1182_vm2, %v1255_v23 }
 0x6c1   : > { %2633 = vmatpush3.bf16.xpose.msra.mxu1 %v1314_v24  ;;  %2636 = vmatprep.mubr.msk.bf16.mxu1 %vm3343_vm1, %v3342_v39 }
 0x6c2   : > { %2634 = vmatprep.subr.bf16.mxu1 %v3342_v39 }
 0x6c9   : > { %2635 = vmatpush3.bf16.xpose.msra.mxu1 %v1317_v26 }
 0x6ca   : > { %2648 = vmatprep.subr.bf16.mxu1 %v3342_v39 }
 0x6d0   : > { %2637 = vmatmul.mubr.msk.bf16.vlgmr.msra.gmra.mrb[8].mxu1 %vm1182_vm2, %v1309_v29 }
 0x6d1   : > { %2649 = vmatpush3.bf16.xpose.msra.mxu1 %v1446_v28  ;;  %2652 = vmatprep.mubr.msk.bf16.mxu1 %vm3343_vm1, %v3342_v39 }
 0x6d2   : > { %2650 = vmatprep.subr.bf16.mxu1 %v3342_v39 }
 0x6d9   : > { %2651 = vmatpush3.bf16.xpose.msra.mxu1 %v1449_v31 }
 0x6da   : > { %2656 = vmatprep.subr.bf16.mxu1 %v3342_v39 }
 0x6e0   : > { %2653 = vmatmul.mubr.msk.bf16.vlgmr.msra.gmra.mrb[12].mxu1 %vm1182_vm2, %v1441_v32  ;;  %v1384_v32 = vld [vmem:[#allocation4 + $0x10] sm:$0xff] }
 0x6e1   : > { %2660 = vmatprep.mubr.msk.bf16.mxu1 %vm3343_vm1, %v3342_v39  ;;  %2657 = vmatpush3.bf16.msra.mxu1 %v1516_v62 }
 0x6e2   : > { %2658 = vmatprep.subr.bf16.mxu1 %v3342_v39  ;;  %2641 = vmatpush3.bf16.msra.mxu0 %v1384_v32  ;;  %v2921_v32 = vld [vmem:[#allocation15 + $0x10] ss:$8 sps:$4 sm:$0xff]  }
 0x6e3   : > { %2642 = vmatprep.subr.bf16.mxu0 %v3342_v39 }
 0x6e5   : > { %2659 = vmatpush3.bf16.msra.mxu1 %v1517_v63 }
 0x6e6   : > { %2664 = vmatprep.subr.bf16.mxu1 %v3342_v39 }
 0x793   : > { %v1295_v33 = vpop.f32.mrb[4].mxu1 }
 0x794   : > { %v2630_v34 = vpop.f32.mrb[5].mxu1 }
 0x795   : > { %v1298_v35 = vpop.f32.mrb[6].mxu1 }
 0x796   : > { %v1302_v36 = vpack.c.bf16 %v1298_v35, %v1295_v33  ;;  %v2631_v37 = vpop.f32.mrb[7].mxu1  ;;  %v1385_v33 = vld [vmem:[#allocation4 + $0x18] sm:$0xff] }
 0x797   : > { %2643 = vmatpush3.bf16.msra.mxu0 %v1385_v33 }
 0x798   : > { %1303 = vst.msk [vmem:[#allocation5] sm:$0xff] %vm1182_vm2, %v1302_v36  ;;  %2672 = vmatprep.subr.bf16.mxu0 %v3342_v39 }
 0x7a3   : > { %v3926_v38 = vpop.f32.mrb[8].mxu1 }
 0x7a4   : > { %v2638_v40 = vpop.f32.mrb[9].mxu1  ;;  %v1360_v59 = vsel %vm1182_vm2, %v3926_v38, -inf }
 0x7a5   : > { %v3928_v41 = vpop.f32.mrb[10].mxu1 }
 0x7a6   : > { %v2639_v42 = vpop.f32.mrb[11].mxu1  ;;  %v1363_v60 = vsel %vm1182_vm2, %v3928_v41, -inf }
 0x7b3   : > { %v1485_v43 = vpop.f32.mrb[12].mxu1 }
 0x7b4   : > { %v2654_v44 = vpop.f32.mrb[13].mxu1  ;;  %v1492_v45 = vsel %vm1182_vm2, %v1485_v43, -inf }
 0x7b5   : > { %1493 = vmax.xlane.f32.xlu1 %v1492_v45  ;;  %v1488_v46 = vpop.f32.mrb[14].mxu1 }
 0x7b6   : > { %v2655_v47 = vpop.f32.mrb[15].mxu1  ;;  %v1495_v48 = vsel %vm1182_vm2, %v1488_v46, -inf }
 0x7b7   : > { %1496 = vmax.xlane.f32.xlu0 %v1495_v48 }
 0x842   : > { %v1494_v49 = vpop.xlane.xlu1 %1493 }
 0x843   : > { %v1498_v50 = vsub.f32 %v1485_v43, %v1494_v49 }
 0x844   : > { %v1497_v51 = vpop.xlane.xlu0 %1496 }
 0x845   : > { %v1500_v52 = vmul.f32 1.442695, %v1498_v50  ;;  %v1499_v53 = vsub.f32 %v1488_v46, %v1497_v51 }
 0x847   : > { %2966 = vpow2.f32 %v1500_v52  ;;  %v1502_v54 = vmul.f32 1.442695, %v1499_v53  ;;  %v1648_v52 = vld [vmem:[#allocation4 + $0x30] sm:$0xff]  ;;  %v1649_v53 = vld [vmem:[#allocation4 + $0x38] sm:$0xff] }
 0x849   : > { %2968 = vpow2.f32 %v1502_v54 }
 0x851   : > { %v2967_v55 = vpop.eup %2966 }
 0x852   : > { %v1504_v56 = vsel %vm1182_vm2, %v2967_v55, 0.0 }
 0x853   : > { %v2969_v57 = vpop.eup %2968  ;;  %1505 = vadd.xlane.f32.xlu0 %v1504_v56 }
 0x854   : > { %v1507_v58 = vsel %vm1182_vm2, %v2969_v57, 0.0 }
 0x855   : > { %1508 = vadd.xlane.f32.xlu1 %v1507_v58 }
 0x859   : > { %1361 = vmax.xlane.f32.xlu1 %v1360_v59 }
 0x85d   : > { %1364 = vmax.xlane.f32.xlu1 %v1363_v60 }
 0x869   : > { %1572 = vrot.lane.b32.xlu0 %v3892_v61, %s3346_s12  ;;  %v1571_v61 = vld [vmem:[#allocation3 + $0x38] sm:$0xff] }
 0x86a   : > { %v1581_v10 = vsel %vm1182_vm2, %v1571_v61, 0 }
 0x8e0   : > { %v1506_v2 = vpop.xlane.xlu0 %1505 }
 0x8e1   : > { %2970 = vrcp.f32 %v1506_v2 }
 0x8e2   : > { %v1509_v3 = vpop.xlane.xlu1 %1508 }
 0x8e3   : > { %2972 = vrcp.f32 %v1509_v3 }
 0x8e4   : > { %v1573_v11 = vpop.permute.xlu0 %1572 }
 0x8e6   : > { %v1362_v12 = vpop.xlane.xlu1 %1361 }
 0x8e7   : > { %v1366_v17 = vsub.f32 %v3926_v38, %v1362_v12  ;;  %v2917_v12 = vld [vmem:[#allocation14 + $0x38] sm:$0xff]  }
 0x8e9   : > { %v1368_v19 = vmul.f32 1.442695, %v1366_v17 }
 0x8ea   : > { %v1365_v18 = vpop.xlane.xlu1 %1364 }
 0x8eb   : > { %v2971_v4 = vpop.eup %2970  ;;  %v1367_v20 = vsub.f32 %v3928_v41, %v1365_v18  ;;  %2974 = vpow2.f32 %v1368_v19  ;;  %v2421_v19 = vld [vmem:[%s4185_s27] ss:$0 sm:$0xff]  ;;  %s4189_s27 = sld [smem:[#allocation26_spill]] }
 0x8ec   : > { %v1512_v7 = vmul.f32 %v2971_v4, %v2967_v55 }
 0x8ed   : > { %v2973_v5 = vpop.eup %2972  ;;  %v1370_v21 = vmul.f32 1.442695, %v1367_v20 }
 0x8ee   : > { %v1513_v8 = vmul.f32 %v2973_v5, %v2969_v57  ;;  %v2910_v5 = vld [vmem:[#allocation14] sm:$0xff]  }
 0x8ef   : > { %2976 = vpow2.f32 %v1370_v21 }
 0x8f0   : > { %v1514_v0 = vpack.c.bf16 %v1513_v8, %v1512_v7  ;;  %v2912_v7 = vld [vmem:[#allocation14 + $0x10] sm:$0xff]   ;;  %v2913_v8 = vld [vmem:[#allocation14 + $0x18] sm:$0xff]  }
 0x8f1   : > { %s2467_s21 = sshll.u32 %s4189_s27, 2  ;;  %s4191_s27 = sld [smem:[#allocation42_spill]] }
 0x8f2   : > { %2661 = vmatmul.mubr.msk.bf16.vlgmr.msra.gmra.mrb[16].mxu1 %vm1182_vm2, %v1514_v0  ;;  %v2914_v0 = vld [vmem:[#allocation14 + $0x20] sm:$0xff]  }
 0x8f3   : > { %2665 = vmatpush3.bf16.xpose.msra.mxu1 %v1578_v9  ;;  %2668 = vmatprep.mubr.msk.bf16.mxu1 %vm3343_vm1, %v3342_v39  ;;  %v2915_v9 = vld [vmem:[#allocation14 + $0x28] sm:$0xff]  }
 0x8f4   : > { %2666 = vmatprep.subr.bf16.mxu1 %v3342_v39 }
 0x8f5   : > { %v2975_v28 = vpop.eup %2974 }
 0x8f6   : > { %v1372_v29 = vsel %vm1182_vm2, %v2975_v28, 0.0 }
 0x8f7   : > { %s4192_s3 = smov %s4191_s27 }
 0x8f9   : > { %v2977_v30 = vpop.eup %2976 }
 0x8fa   : > { %v1375_v31 = vsel %vm1182_vm2, %v2977_v30, 0.0 }
 0x8fb   : > { %2667 = vmatpush3.bf16.xpose.msra.mxu1 %v1581_v10 }
 0x902   : > { %2669 = vmatmul.mubr.msk.bf16.vlgmr.msra.gmra.mrb[20].mxu1 %vm1182_vm2, %v1573_v11  ;;  %v2916_v11 = vld [vmem:[#allocation14 + $0x30] sm:$0xff]  }
 0x9c5   : > { %v3949_v1 = vpop.f32.mrb[16].mxu1 }
 0x9c6   : > { %v2662_v13 = vpop.f32.mrb[17].mxu1 }
 0x9c7   : > { %v3951_v14 = vpop.f32.mrb[18].mxu1 }
 0x9c8   : > { %v1562_v15 = vpack.c.bf16 %v3951_v14, %v3949_v1  ;;  %v2663_v16 = vpop.f32.mrb[19].mxu1 }
 0x9d5   : > { %v1617_v22 = vpop.f32.mrb[20].mxu1 }
 0x9d6   : > { %v2670_v23 = vpop.f32.mrb[21].mxu1  ;;  %v1624_v24 = vsel %vm1182_vm2, %v1617_v22, -inf }
 0x9d7   : > { %1625 = vmax.xlane.f32.xlu1 %v1624_v24  ;;  %v1620_v25 = vpop.f32.mrb[22].mxu1  ;;  %v1059_v23 = vld [vmem:[%s1057_s20 + $0x8] sm:$0xff] }
 0x9d8   : > { %v2671_v26 = vpop.f32.mrb[23].mxu1  ;;  %v1627_v27 = vsel %vm1182_vm2, %v1620_v25, -inf }
 0x9db   : > { %1628 = vmax.xlane.f32.xlu1 %v1627_v27 }
 0x9df   : > { %1373 = vadd.xlane.f32.xlu1 %v1372_v29  ;;  %v2918_v29 = vld [vmem:[#allocation15] ss:$8 sps:$4 sm:$0xff]  }
 0x9e3   : > { %1376 = vadd.xlane.f32.xlu1 %v1375_v31  ;;  %v2923_v31 = vld [vmem:[#allocation15 + $0x14] ss:$8 sps:$4 sm:$0xff]  }
 0xa64   : > { %v1626_v34 = vpop.xlane.xlu1 %1625 }
 0xa65   : > { %v1630_v35 = vsub.f32 %v1617_v22, %v1626_v34 }
 0xa67   : > { %v1632_v36 = vmul.f32 1.442695, %v1630_v35 }
 0xa68   : > { %v1629_v37 = vpop.xlane.xlu1 %1628 }
 0xa69   : > { %2978 = vpow2.f32 %v1632_v36  ;;  %v1631_v38 = vsub.f32 %v1620_v25, %v1629_v37 }
 0xa6b   : > { %v1634_v40 = vmul.f32 1.442695, %v1631_v38 }
 0xa6c   : > { %v1374_v41 = vpop.xlane.xlu1 %1373 }
 0xa6d   : > { %2980 = vpow2.f32 %v1634_v40 }
 0xa6e   : > { %2982 = vrcp.f32 %v1374_v41 }
 0xa70   : > { %v1377_v42 = vpop.xlane.xlu1 %1376 }
 0xa71   : > { %2984 = vrcp.f32 %v1377_v42  ;;  %v2926_v42 = vld [vmem:[#allocation15 + $0x24] ss:$8 sps:$4 sm:$0xff]  }
 0xa73   : > { %v2979_v43 = vpop.eup %2978 }
 0xa74   : > { %v1636_v44 = vsel %vm1182_vm2, %v2979_v43, 0.0 }
 0xa75   : > { %1637 = vadd.xlane.f32.xlu0 %v1636_v44  ;;  %v2929_v44 = vld [vmem:[#allocation15 + $0x34] ss:$8 sps:$4 sm:$0xff]  }
 0xa77   : > { %v2981_v45 = vpop.eup %2980 }
 0xa78   : > { %v1639_v46 = vsel %vm1182_vm2, %v2981_v45, 0.0  ;;  %v2983_v47 = vpop.eup %2982 }
 0xa79   : > { %1640 = vadd.xlane.f32.xlu1 %v1639_v46  ;;  %v1380_v49 = vmul.f32 %v2983_v47, %v2975_v28  ;;  %v2932_v46 = vld [vmem:[#allocation15 + $0x44] ss:$8 sps:$4 sm:$0xff]   ;;  %v2930_v47 = vld [vmem:[#allocation15 + $0x40] ss:$8 sps:$4 sm:$0xff]  }
 0xa7b   : > { %v2985_v48 = vpop.eup %2984 }
 0xa7c   : > { %v1381_v50 = vmul.f32 %v2985_v48, %v2977_v30  ;;  %v2920_v30 = vld [vmem:[#allocation15 + $0x4] ss:$8 sps:$4 sm:$0xff]   ;;  %v2935_v48 = vld [vmem:[#allocation15 + $0x54] ss:$8 sps:$4 sm:$0xff]  }
 0xa7d   : > { %1966 = vmatprep.subr.bf16.mxu1 %v2920_v30 }
 0xa7e   : > { %v1382_v51 = vpack.c.bf16 %v1381_v50, %v1380_v49  ;;  %1967 = vmatpush1.bf16.msra.mxu1 %v2918_v29  ;;  %v2933_v49 = vld [vmem:[#allocation15 + $0x50] ss:$8 sps:$4 sm:$0xff]   ;;  %v2938_v50 = vld [vmem:[#allocation15 + $0x64] ss:$8 sps:$4 sm:$0xff]  }
 0xa7f   : > { %1968 = vmatprep.subr.bf16.mxu1 %v2923_v31 }
 0xa80   : > { %2645 = vmatmul.mubr.msk.bf16.vlgmr.msra.gmra.mrb[4].mxu0 %vm1182_vm2, %v1382_v51  ;;  %v2936_v51 = vld [vmem:[#allocation15 + $0x60] ss:$8 sps:$4 sm:$0xff]  }
 0xa81   : > { %2676 = vmatprep.mubr.msk.bf16.mxu0 %vm3343_vm1, %v3342_v39  ;;  %2673 = vmatpush3.bf16.msra.mxu0 %v1648_v52  ;;  %v2941_v52 = vld [vmem:[#allocation15 + $0x74] ss:$8 sps:$4 sm:$0xff]  }
 0xa82   : > { %2674 = vmatprep.subr.bf16.mxu0 %v3342_v39  ;;  %1969 = vmatpush1.bf16.msra.mxu1 %v2921_v32 }
 0xa83   : > { %1970 = vmatprep.subr.bf16.mxu1 %v2926_v42 }
 0xa85   : > { %2675 = vmatpush3.bf16.msra.mxu0 %v1649_v53  ;;  %v2939_v53 = vld [vmem:[#allocation15 + $0x70] ss:$8 sps:$4 sm:$0xff]  }
 0xa86   : > { %2680 = vmatprep.subr.bf16.mxu0 %v3342_v39 }
 0xb02   : > { %v1638_v54 = vpop.xlane.xlu0 %1637 }
 0xb03   : > { %2986 = vrcp.f32 %v1638_v54  ;;  %v3347_v54 = vmov 0  }
 0xb04   : > { %1998 = vmatprep.mubr.bf16.mxu1 %v3347_v54 }
 0xb06   : > { %v1641_v55 = vpop.xlane.xlu1 %1640 }
 0xb07   : > { %2988 = vrcp.f32 %v1641_v55  ;;  %v2942_v55 = vld [vmem:[#allocation17 + $0x40] sm:$0xff]  }
 0xb0d   : > { %v2987_v56 = vpop.eup %2986 }
 0xb0e   : > { %v1644_v58 = vmul.f32 %v2987_v56, %v2979_v43  ;;  %v2924_v43 = vld [vmem:[#allocation15 + $0x20] ss:$8 sps:$4 sm:$0xff]  }
 0xb0f   : > { %1971 = vmatpush1.bf16.msra.mxu1 %v2924_v43  ;;  %v2943_v56 = vld [vmem:[#allocation17] sm:$0xff]  }
 0xb10   : > { %1972 = vmatprep.subr.bf16.mxu1 %v2929_v44 }
 0xb11   : > { %v2989_v57 = vpop.eup %2988 }
 0xb12   : > { %v1645_v59 = vmul.f32 %v2989_v57, %v2981_v45  ;;  %v2927_v45 = vld [vmem:[#allocation15 + $0x30] ss:$8 sps:$4 sm:$0xff]   ;;  %v2944_v57 = vld [vmem:[#allocation17 + $0x48] sm:$0xff]  }
 0xb13   : > { %1973 = vmatpush1.bf16.msra.mxu1 %v2927_v45 }
 0xb14   : > { %v1646_v60 = vpack.c.bf16 %v1645_v59, %v1644_v58  ;;  %1974 = vmatprep.subr.bf16.mxu1 %v2932_v46  ;;  %v2945_v58 = vld [vmem:[#allocation17 + $0x8] sm:$0xff]   ;;  %v2946_v59 = vld [vmem:[#allocation17 + $0x50] sm:$0xff]  }
 0xb16   : > { %2677 = vmatmul.mubr.msk.bf16.vlgmr.msra.gmra.mrb[8].mxu0 %vm1182_vm2, %v1646_v60  ;;  %v2947_v60 = vld [vmem:[#allocation17 + $0x10] sm:$0xff]  }
 0xb17   : > { %2696 = vmatprep.mubr.msk.bf16.mxu0 %vm3343_vm1, %v3342_v39  ;;  %2681 = vmatpush3.bf16.msra.mxu0 %v2910_v5 }
 0xb18   : > { %2682 = vmatprep.subr.bf16.mxu0 %v3342_v39  ;;  %1975 = vmatpush1.bf16.msra.mxu1 %v2930_v47 }
 0xb19   : > { %1976 = vmatprep.subr.bf16.mxu1 %v2935_v48 }
 0xb1b   : > { %2683 = vmatpush3.bf16.msra.mxu0 %v2911_v6 }
 0xb1c   : > { %2684 = vmatprep.subr.bf16.mxu0 %v3342_v39  ;;  %1977 = vmatpush1.bf16.msra.mxu1 %v2933_v49 }
 0xb1d   : > { %1978 = vmatprep.subr.bf16.mxu1 %v2938_v50 }
 0xb1f   : > { %2685 = vmatpush3.bf16.msra.mxu0 %v2912_v7 }
 0xb20   : > { %2686 = vmatprep.subr.bf16.mxu0 %v3342_v39  ;;  %1979 = vmatpush1.bf16.msra.mxu1 %v2936_v51 }
 0xb21   : > { %1980 = vmatprep.subr.bf16.mxu1 %v2941_v52 }
 0xb23   : > { %2687 = vmatpush3.bf16.msra.mxu0 %v2913_v8 }
 0xb24   : > { %2688 = vmatprep.subr.bf16.mxu0 %v3342_v39  ;;  %1981 = vmatpush1.bf16.msra.mxu1 %v2939_v53 }
 0xb27   : > { %2689 = vmatpush3.bf16.msra.mxu0 %v2914_v0 }
 0xb28   : > { %2690 = vmatprep.subr.bf16.mxu0 %v3342_v39 }
 0xb2b   : > { %2691 = vmatpush3.bf16.msra.mxu0 %v2915_v9 }
 0xb2c   : > { %2692 = vmatprep.subr.bf16.mxu0 %v3342_v39 }
 0xb2f   : > { %2693 = vmatpush3.bf16.msra.mxu0 %v2916_v11  ;;  %v2430_v11 = vld [vmem:[%s4186_s2] ss:$0 sm:$0xff] }
 0xb30   : > { %2694 = vmatprep.subr.bf16.mxu0 %v3342_v39  ;;  %v1058_v39 = vld [vmem:[%s1057_s20] sm:$0xff] }
 0xb33   : > { %2695 = vmatpush3.bf16.msra.mxu0 %v2917_v12 }
 0xb34   : > { %2534 = vmatprep.subr.bf16.mxu0 %v2942_v55 }
 0xb53   : > { %v1423_v62 = vpop.f32.mrb[4].mxu0 }
 0xb54   : > { %v2646_v63 = vpop.f32.mrb[5].mxu0 }
 0xb55   : > { %v1426_v2 = vpop.f32.mrb[6].mxu0  ;;  %v2949_v63 = vld [vmem:[#allocation17 + $0x18] sm:$0xff]  }
 0xb56   : > { %v1430_v3 = vpack.c.bf16 %v1426_v2, %v1423_v62  ;;  %v2647_v4 = vpop.f32.mrb[7].mxu0  ;;  %v2948_v62 = vld [vmem:[#allocation17 + $0x58] sm:$0xff]   ;;  %v2950_v2 = vld [vmem:[#allocation17 + $0x60] sm:$0xff]  }
 0xb57   : > { %v2952_v4 = vld [vmem:[#allocation17 + $0x68] sm:$0xff]  }
 0xb58   : > { %1432 = vrot.lane.b32.xlu1 %v1430_v3, %s3346_s12  ;;  %v2951_v3 = vld [vmem:[#allocation17 + $0x20] sm:$0xff]   ;;  %s4187_s12 = sld [smem:[#allocation41_spill]] }
 0xb5c   : > { %1564 = vrot.lane.b32.xlu1 %v1562_v15, %s3345_s4  ;;  %s4190_s4 = sld [smem:[#allocation37_spill]] }
 0xb62   : > { %v2448_v48 = vld [vmem:[%s4190_s4] ss:$0 sm:$0xff]  ;;  %s3348_s4 = smov [#allocation18]  }
 0xbca   : > { %v1433_v61 = vpop.permute.xlu1 %1432 }
 0xbcb   : > { %1436 = vst.msk [vmem:[#allocation5] sm:$0xff] %vm1435_vm3, %v1433_v61 }
 0xbce   : > { %v1565_v10 = vpop.permute.xlu1 %1564 }
 0xbcf   : > { %1568 = vst.msk [vmem:[#allocation5] sm:$0xff] %vm1567_vm4, %v1565_v10 }
 0xbe9   : > { %v1687_v1 = vpop.f32.mrb[8].mxu0 }
 0xbea   : > { %v2678_v13 = vpop.f32.mrb[9].mxu0 }
 0xbeb   : > { %v1690_v14 = vpop.f32.mrb[10].mxu0 }
 0xbec   : > { %v1694_v15 = vpack.c.bf16 %v1690_v14, %v1687_v1  ;;  %v2679_v16 = vpop.f32.mrb[11].mxu0  ;;  %v2431_v14 = vld [vmem:[%s4187_s12] ss:$0 sm:$0xff]  ;;  %s2208_s12 = sadd.s32 %s2467_s21, %s2466_s6  ;;  %s4193_s6 = sand.u32 1, %s3290_s25  }
 0xbed   : > { %s2468_s20 = sshll.u32 %s2208_s12, 7  ;;  %s4038_s21 = scalar_lea.sflag [#allocation8], %s4193_s6 }
 0xbee   : > { %1696 = vrot.lane.b32.xlu1 %v1694_v15, %s3344_s14  ;;  %s4029_s2 = scalar_lea.hbm %s4191_s27, %s2468_s20  ;;  %s3192_s14 = scalar_lea.vmem %s4031_s10, 256 }
 0xbef   : > { %p3193_p13 = scmp.ne.s32.totalorder %s4031_s10, %s3192_s14  ;;  %s3196_s12 = sshll.u32 %s3348_s4, 4  ;;  %s3197_s12 = int_to_ptr.vmem [resolvable:$false] %s3196_s12 }
 0xbf0   : > { %s3198_s20 = scalar_lea.vmem %s3197_s12, 512  ;;  %p3199_p12 = scmp.lt.s32.totalorder %s4031_s10, %s3197_s12 }
 0xbf1   : > { %p3194_p9 = pnand %p3193_p13, %p4194_p6  ;;  %p3200_p1 = scmp.lt.s32.totalorder %s3198_s20, %s3192_s14 }
 0xbf3   : > { %p3195_p11 = pneg %p3194_p9  ;;  %p3201_p0 = por %p3200_p1, %p3199_p12 }
 0xbf5   : > { %p3202_p7 = pnand %p3201_p0, %p3195_p11 }
 0xc60   : > { %v1697_v17 = vpop.permute.xlu1 %1696 }
 0xc61   : > { %1700 = vst.msk [vmem:[#allocation5] sm:$0xff] %vm1699_vm5, %v1697_v17 }
 0xc68   : > { %v1701_v18 = vld [vmem:[#allocation5] sm:$0xff] }
 0xc69   : > { %2697 = vmatmul.mubr.bf16.vlgmr.msra.gmra.mrb[12].mxu0 %v1701_v18 }
 0xc6a   : > { %2535 = vmatpush3.bf16.msra.mxu0 %v2943_v56 }
 0xc6b   : > { %2536 = vmatprep.subr.bf16.mxu0 %v2944_v57 }
 0xc6e   : > { %2537 = vmatpush3.bf16.msra.mxu0 %v2945_v58 }
 0xc6f   : > { %2538 = vmatprep.subr.bf16.mxu0 %v2946_v59 }
 0xc72   : > { %2539 = vmatpush3.bf16.msra.mxu0 %v2947_v60 }
 0xc73   : > { %2540 = vmatprep.subr.bf16.mxu0 %v2948_v62 }
 0xc76   : > { %2541 = vmatpush3.bf16.msra.mxu0 %v2949_v63 }
 0xc77   : > { %2542 = vmatprep.subr.bf16.mxu0 %v2950_v2 }
 0xc7a   : > { %2543 = vmatpush3.bf16.msra.mxu0 %v2951_v3 }
 0xc7b   : > { %2544 = vmatprep.subr.bf16.mxu0 %v2952_v4 }
 0xd3c   : > { %v1807_v20 = vpop.f32.mrb[12].mxu0 }
 0xd3d   : > { %v1808_v21 = vadd.f32 %v2421_v19, %v1807_v20  ;;  %v2698_v22 = vpop.f32.mrb[13].mxu0  ;;  %v2955_v20 = vld [vmem:[#allocation17 + $0x30] sm:$0xff]  }
 0xd3e   : > { %v1810_v24 = vpop.f32.mrb[14].mxu0  ;;  %v2957_v22 = vld [vmem:[#allocation17 + $0x38] sm:$0xff]  }
 0xd3f   : > { %v3992_v25 = vadd.f32 %v1808_v21, %v1058_v39  ;;  %v1811_v26 = vadd.f32 %v2421_v19, %v1810_v24  ;;  %v2699_v27 = vpop.f32.mrb[15].mxu0  ;;  %v2953_v19 = vld [vmem:[#allocation17 + $0x28] sm:$0xff]   ;;  %v2954_v39 = vld [vmem:[#allocation17 + $0x70] sm:$0xff]   ;;  %v2956_v21 = vld [vmem:[#allocation17 + $0x78] sm:$0xff]  }
 0xd40   : > { %2545 = vmatpush3.bf16.msra.mxu0 %v2953_v19  ;;  %v1874_v27 = vld [vmem:[%s4188_s24] sm:$0x3] }
 0xd41   : > { %v3994_v28 = vadd.f32 %v1811_v26, %v1059_v23  ;;  %1818 = vadd.xlane.f32.xlu0 %v3992_v25  ;;  %2546 = vmatprep.subr.bf16.mxu0 %v2954_v39  ;;  %v1876_v23 = vlaneseq }
 0xd43   : > { %1820 = vadd.xlane.f32.xlu1 %v3994_v28  ;;  %v1877_v24 = vshrl.u32 %v1876_v23, 7 }
 0xd44   : > { %2547 = vmatpush3.bf16.msra.mxu0 %v2955_v20 }
 0xd45   : > { %2548 = vmatprep.subr.bf16.mxu0 %v2956_v21  ;;  %v1878_v26 = vsub.s32 0, %v1877_v24  ;;  %v1882_v29 = vsub.s32 1, %v1877_v24 }
 0xd47   : > { %v1879_v30 = vrot.slane %v1874_v27, %v1878_v26  ;;  %v1883_v31 = vrot.slane %v1874_v27, %v1882_v29 }
 0xd48   : > { %2549 = vmatpush3.bf16.msra.mxu0 %v2957_v22 }
 0xdce   : > { %v1819_v33 = vpop.xlane.xlu0 %1818 }
 0xdcf   : > { %v1823_v34 = vmul.f32 0.0078125, %v1819_v33 }
 0xdd0   : > { %v1821_v35 = vpop.xlane.xlu1 %1820 }
 0xdd1   : > { %v3999_v36 = vsub.f32 %v3992_v25, %v1823_v34  ;;  %v1824_v37 = vmul.f32 0.0078125, %v1821_v35 }
 0xdd3   : > { %v4002_v38 = vsub.f32 %v3994_v28, %v1824_v37  ;;  %v1827_v40 = vmul.f32 %v3999_v36, %v3999_v36 }
 0xdd5   : > { %1829 = vadd.xlane.f32.xlu0 %v1827_v40  ;;  %v1828_v41 = vmul.f32 %v4002_v38, %v4002_v38 }
 0xdd9   : > { %1831 = vadd.xlane.f32.xlu0 %v1828_v41 }
 0xe62   : > { %v1830_v5 = vpop.xlane.xlu0 %1829 }
 0xe63   : > { %v1833_v6 = vmul.f32 0.0078125, %v1830_v5 }
 0xe65   : > { %v1835_v7 = vadd.f32 1e-05, %v1833_v6 }
 0xe66   : > { %v1832_v8 = vpop.xlane.xlu0 %1831 }
 0xe67   : > { %2990 = vrsqrt.f32 %v1835_v7  ;;  %v1834_v0 = vmul.f32 0.0078125, %v1832_v8 }
 0xe69   : > { %v1836_v9 = vadd.f32 1e-05, %v1834_v0 }
 0xe6b   : > { %2992 = vrsqrt.f32 %v1836_v9 }
 0xe71   : > { %v2991_v61 = vpop.eup %2990 }
 0xe72   : > { %v1839_v10 = vmul.f32 %v2991_v61, %v3999_v36 }
 0xe74   : > { %v1847_v13 = vmul.f32 %v2430_v11, %v1839_v10 }
 0xe75   : > { %v2993_v12 = vpop.eup %2992 }
 0xe76   : > { %v1840_v1 = vmul.f32 %v2993_v12, %v4002_v38  ;;  %v1855_v16 = vadd.f32 %v2431_v14, %v1847_v13 }
 0xe78   : > { %v1848_v15 = vmul.f32 %v2430_v11, %v1840_v1 }
 0xe7a   : > { %v1856_v17 = vadd.f32 %v2431_v14, %v1848_v15 }
 0xe7c   : > { %v1857_v18 = vpack.c.bf16 %v1856_v17, %v1855_v16 }
 0xe7e   : > { %1999 = vmatmul.mubr.bf16.vlgmr.msra.gmra.mrb[24].mxu1 %v1857_v18 }
 0xf51   : > { %v2000_v32 = vpop.f32.mrb[24].mxu1 }
 0xf52   : > { %v2001_v33 = vadd.f32 %v2000_v32, %v1879_v30  ;;  %v2002_v34 = vpop.f32.mrb[25].mxu1 }
 0xf53   : > { %v2003_v35 = vadd.f32 %v2002_v34, %v1883_v31  ;;  %v2004_v36 = vpop.f32.mrb[26].mxu1 }
 0xf54   : > { %v2005_v37 = vadd.f32 %v2004_v36, %v1879_v30  ;;  %v2006_v38 = vpop.f32.mrb[27].mxu1  ;;  %v2009_v41 = vmax.f32 %v2001_v33, 0.0 }
 0xf55   : > { %v2007_v40 = vadd.f32 %v2006_v38, %v1883_v31  ;;  %v2010_v43 = vmax.f32 %v2003_v35, 0.0 }
 0xf56   : > { %v2011_v42 = vmax.f32 %v2005_v37, 0.0 }
 0xf57   : > { %v2012_v44 = vmax.f32 %v2007_v40, 0.0 }
 0xf58   : > { %v2013_v45 = vpack.c.bf16 %v2011_v42, %v2009_v41 }
 0xf59   : > { %v2014_v46 = vpack.c.bf16 %v2012_v44, %v2010_v43 }
 0xf5b   : > { %2182 = vmatprep.mubr.bf16.mxu0 %v2014_v46 }
 0xf5c   : > { %2183 = vmatmul.mubr.bf16.vlgmr.msra.gmra.mrb[16].mxu0 %v2013_v45 }
0x102f   : > { %v2550_v47 = vpop.f32.mrb[16].mxu0 }
0x1030   : > { %v2551_v49 = vpop.f32.mrb[17].mxu0 }
0x1031   : > { %v2552_v50 = vadd.f32 %v2551_v49, %v2550_v47  ;;  %v2553_v51 = vpop.f32.mrb[18].mxu0 }
0x1032   : > { %v2554_v52 = vpop.f32.mrb[19].mxu0 }
0x1033   : > { %v2185_v53 = vadd.f32 %v2552_v50, %v2448_v48  ;;  %v2555_v54 = vadd.f32 %v2554_v52, %v2553_v51 }
0x1035   : > { %v2191_v55 = vadd.f32 %v2185_v53, %v3992_v25  ;;  %v2188_v56 = vadd.f32 %v2555_v54, %v2448_v48 }
0x1037   : > { %2193 = vst [vmem:[%s3809_s23] sm:$0xff] %v2191_v55  ;;  %v2192_v57 = vadd.f32 %v2188_v56, %v3994_v28 }
0x1039   : > { %2194 = vst [vmem:[%s3809_s23 + $0x8] sm:$0xff] %v2192_v57 }
0x103a   : > { %3205 = shalt.err (!%p3202_p7)
}
0x103b   : > { %s3206_s23 = scalar_lea.hbm %s4029_s2, 256  ;;  %s3210_s27 = scalar_lea.hbm %s4192_s3, 1024 }
0x103c   : > { %p3207_p2 = scmp.ne.s32.totalorder %s4029_s2, %s3206_s23  ;;  %p3211_p3 = scmp.lt.u32.totalorder %s4029_s2, %s4192_s3 }
0x103d   : > { %p3212_p8 = scmp.lt.u32.totalorder %s3210_s27, %s3206_s23  ;;  %p3214_p13 = scmp.lt.u32.totalorder %s3206_s23, %s4029_s2 }
0x103e   : > { %p3208_p4 = pnand %p3207_p2, %p4194_p6 }
0x103f   : > { %p3213_p5 = por %p3212_p8, %p3211_p3 }
0x1040   : > { %p3209_p10 = pneg %p3208_p4 }
0x1041   : > { %p3215_p9 = por %p3214_p13, %p3213_p5 }
0x1043   : > { %p3216_p11 = pnand %p3215_p9, %p3209_p10 }
0x1045   : > { %3219 = shalt.err (!%p3216_p11)
}
0x1046   : > { %s3349_s14 = smov 128   ;;  %s3350_s12 = smov 8  }
0x1047   : > { %2726 = dma.vmem_to_hbm [thread:$0]  (%p4194_p6), %s4031_s10, 256, %s4029_s2, %s4038_s21, %s3349_s14, %s3349_s14, %s3350_s12  }
0x1048 PF: > { %s4195_s20 = sld [smem:[#allocation24_spill]]  ;;  %p2768_p12 = scmp.ge.s32.totalorder %s3326_s1, 2 }
0x1049   : > { %p4196_p1 = scmp.ne.s32.totalorder %s4170_s13, 0 }
0x104b   : > { %p2752_p0 = pnand %p2768_p12, %p4196_p1 }
0x104e   : > { %s2226_s8 = sand.u32 1, %s4195_s20  }
0x104f   : > { %s2227_s23 = scalar_lea.sflag [#allocation8], %s2226_s8 }
0x1050   : > { %3281 = dma.done.wait (!%p2752_p0), %s2227_s23, 256  }
0x1051   : > { %3283 = vsyncadd (!%p2752_p0), %s2227_s23, 4294967040  ;;  %s36_s1 = sadd.s32 1, %s3326_s1   ;;  %s4197_s22 = smov %s4209_s30 }
0x1052   : > { %p33_p7 = scmp.ge.s32.totalorder %s36_s1, 6   ;;  %s4198_s24 = smov %s3290_s25 }
0x1053   : > { %s4199_s25 = smov %s3294_s26  ;;  %s4200_s26 = smov %s3722_s16 }
0x1054   : > { %s4201_s27 = smov %s3302_s28  ;;  %s4202_s28 = smov %s3306_s29 }
0x1055   : > { %s4203_s29 = smov %s3719_s0  ;;  %s4204_s0 = smov %s3318_s18 }
0x1056   : > { %s4205_s30 = smov %s3322_s19  ;;  %s4206_s18 = smov %s4197_s22 }
0x1057   : > { %s4207_s19 = smov %s4213_s17  ;;  %35 = sbr.rel (!%p33_p7) target bundleno = 27 (0x1b), region = 175 }
0x105e   :  { %2232 = vsyncpa [#allocation7], 1 }
0x105f   :  { %2234 = vsyncpa [#allocation7 + $0x1], 1 }
0x1060   :  { %2235 = vsyncpa [#allocation10], 1 }
0x1061   :  { %2236 = vsyncpa [#allocation13], 1 }
0x1062   :  { %2237 = vsyncpa [#allocation16], 1 }
0x1063   :  { %2238 = vsyncpa [#allocation8], 1 }
0x1064   :  { %2240 = vsyncpa [#allocation8 + $0x1], 1 }

</bundles_post_ra>
